<compile_context>
chip_gen: v6e
topology: v6e:2x2x1
jax: 0.10.0
libtpu: 0.0.40
codegen_flags: <defaults>
</compile_context>

<pallas_src>
import functools
import numpy as np
import jax
import jax.numpy as jnp
from jax import lax
from jax.experimental import pallas as pl
from jax.experimental.pallas import tpu as pltpu

NEG_SLOPE = 0.01   # torch LeakyReLU default
LN_EPS = 1e-5      # torch LayerNorm default
LANES = 128


def _leaky(v):
    return jnp.where(v >= 0, v, NEG_SLOPE * v)


def _round_up(a, m):
    return (a + m - 1) // m * m


def gnn_layer_kernel(x_ref, gamma_ref, beta_ref,
                     ea_ref, src_ref, dst_ref, invdeg_ref,
                     w1_ref, b1_ref, w2_ref, b2m_ref, wr_ref, bc_ref,
                     out_ref,
                     hext_scr,
                     *, d, k_chunk):
    core = pl.program_id(0)          # edge-set split ("parallel" -> megacore on v7x)
    step = pl.program_id(1)          # edge-tile reduction axis ("arbitrary")
    n_pad, dp = x_ref.shape
    te = ea_ref.shape[0]

    # ---- step 0 (per core): h = LeakyReLU(LN(x)), hb2 = h @ b2, zero the out block ----
    @pl.when(step == 0)
    def _init():
        x = x_ref[...]
        lane_ok = lax.broadcasted_iota(jnp.int32, (n_pad, dp), 1) < d
        mu = jnp.sum(x, axis=-1, keepdims=True) * (1.0 / d)
        diff = jnp.where(lane_ok, x - mu, 0.0)      # two-pass LN; padded lanes masked out
        var = jnp.sum(diff * diff, axis=-1, keepdims=True) * (1.0 / d)
        h = diff * lax.rsqrt(var + LN_EPS) * gamma_ref[...] + beta_ref[...]
        h = _leaky(h)
        hb2 = jnp.dot(h, b2m_ref[...], preferred_element_type=jnp.float32)
        hext_scr[:, :dp] = h.astype(jnp.bfloat16)          # [N, 0:128]   = h
        hext_scr[:, dp:] = hb2.astype(jnp.bfloat16)         # [N, 128:256] = h @ b2
        out_ref[...] = jnp.zeros_like(out_ref)

    # ---- MapE2NxN edge network: bf16 on the MXU, f32 accumulation ----
    t = jnp.dot(ea_ref[...], w1_ref[...], preferred_element_type=jnp.float32) + b1_ref[...]
    t = _leaky(t).astype(jnp.bfloat16)                      # [TE, HP]

    # ---- gather [h | h@b2] for the source nodes (bf16 one-hot MXU gather, 256 lanes) ----
    node_iota = lax.broadcasted_iota(jnp.int32, (te, n_pad), 1)
    src_oh = (node_iota == src_ref[...]).astype(jnp.bfloat16)        # [TE, N_pad]
    gath = jnp.dot(src_oh, hext_scr[...], preferred_element_type=jnp.float32)
    h_src = gath[:, :dp]                                    # [TE, DP] f32
    msg = gath[:, dp:]                                      # b2 term already folded in

    # ---- per-edge message msg[e] += sum_k h_src[e,k] * (t[e] @ W2[:,k,:]) ----
    # k is chunked: each MXU push sees a (k_chunk*128)-lane-wide RHS instead of d
    # back-to-back 128-wide matmuls with the same LHS.
    for k0 in range(0, d, k_chunk):
        kc = min(k_chunk, d - k0)
        w_chunk = jnp.dot(t, w2_ref[:, k0 * dp:(k0 + kc) * dp],
                          preferred_element_type=jnp.float32)        # [TE, kc*DP]
        for j in range(kc):
            msg = msg + h_src[:, k0 + j:k0 + j + 1] * w_chunk[:, j * dp:(j + 1) * dp]

    # ---- scatter-add messages onto destination nodes (bf16 one-hot^T @ msg, MXU) ----
    dst_oh = (node_iota == dst_ref[...]).astype(jnp.bfloat16)        # [TE, N_pad]
    out_ref[...] += lax.dot_general(dst_oh, msg.astype(jnp.bfloat16),
                                    (((0,), (0,)), ((), ())),
                                    preferred_element_type=jnp.float32)

    # ---- last step: mean (1/deg); core 0 also adds root weight, conv bias, residual ----
    @pl.when(step == pl.num_programs(1) - 1)
    def _finalize():
        agg = out_ref[...] * invdeg_ref[...]                 # f32 VPU scale

        @pl.when(core == 0)
        def _with_residual():
            root = jnp.dot(hext_scr[:, :dp], wr_ref[...],
                           preferred_element_type=jnp.float32)
            out_ref[...] = x_ref[...] + agg + root + bc_ref[...]

        @pl.when(core != 0)
        def _partial_only():
            out_ref[...] = agg


@functools.partial(jax.jit, static_argnames=("edge_tile", "k_chunk", "n_split"))
def gnn_layer(x, edge_index, edge_attr, params, *, edge_tile=256, k_chunk=2, n_split=2):
    n, d = x.shape
    e = edge_attr.shape[0]
    h_dim = params["w1"].shape[1]

    dp = LANES                        # lane-padded feature width
    hp = _round_up(h_dim, LANES)      # lane-padded hidden width
    n_pad = _round_up(n, 16)          # bf16 sublane tile
    te = edge_tile                    # must be a multiple of 16 (bf16 sublane tile)
    e_pad = _round_up(e, te * n_split)
    tiles_per_split = e_pad // (te * n_split)

    src = edge_index[0]
    dst = edge_index[1]

    # ---- plain-JAX glue (O(E + N*d)): padding, casts, index vectors, 1/deg ----
    x_p = jnp.pad(x, ((0, n_pad - n), (0, dp - d)))
    gamma_p = jnp.pad(params["gamma"], ((0, 0), (0, dp - d)))
    beta_p = jnp.pad(params["beta"], ((0, 0), (0, dp - d)))
    ea_p = jnp.pad(edge_attr, ((0, e_pad - e), (0, dp - d))).astype(jnp.bfloat16)

    src_p = jnp.pad(src.astype(jnp.int32), (0, e_pad - e))[:, None]
    dst_p = jnp.pad(dst.astype(jnp.int32), (0, e_pad - e),
                    constant_values=-1)[:, None]          # padded edges scatter nowhere

    deg = jax.ops.segment_sum(jnp.ones((e,), jnp.float32), dst, num_segments=n)
    inv_deg = 1.0 / jnp.maximum(deg, 1.0)
    inv_deg_p = jnp.pad(inv_deg, (0, n_pad - n))[:, None]

    w1_p = jnp.pad(params["w1"], ((0, dp - d), (0, hp - h_dim))).astype(jnp.bfloat16)
    b1_p = jnp.pad(params["b1"], ((0, 0), (0, hp - h_dim)))
    # k-major, 128-lane-padded layout for the per-edge weights: [HP, d*DP]
    w2_3d = params["w2"].reshape(h_dim, d, d)
    w2_p = jnp.pad(w2_3d, ((0, hp - h_dim), (0, 0), (0, dp - d)))
    w2_p = w2_p.reshape(hp, d * dp).astype(jnp.bfloat16)
    b2m_p = jnp.pad(params["b2"].reshape(d, d), ((0, dp - d), (0, dp - d)))
    wr_p = jnp.pad(params["w_root"], ((0, dp - d), (0, dp - d))).astype(jnp.bfloat16)
    bc_p = jnp.pad(params["b_conv"], ((0, 0), (0, dp - d)))

    def whole(shape):
        return pl.BlockSpec(shape, lambda c, i: (0, 0))

    def edge_map(c, i):
        return (c * tiles_per_split + i, 0)

    # ---- VMEM budget from actual (tile-padded) buffer sizes ----
    def _tile_bytes(shape, dtype):
        it = jnp.dtype(dtype).itemsize
        sub = 32 // it
        return _round_up(shape[0], sub) * _round_up(shape[1], 128) * it

    block_bytes = (_tile_bytes((n_pad, dp), jnp.float32)          # x
                   + 2 * _tile_bytes((1, dp), jnp.float32)        # gamma, beta
                   + _tile_bytes((te, dp), jnp.bfloat16)          # edge_attr tile
                   + 2 * _tile_bytes((te, 1), jnp.int32)          # src, dst tiles
                   + _tile_bytes((n_pad, 1), jnp.float32)         # 1/deg
                   + _tile_bytes((dp, hp), jnp.bfloat16)          # w1
                   + _tile_bytes((1, hp), jnp.float32)            # b1
                   + _tile_bytes((hp, d * dp), jnp.bfloat16)      # w2
                   + _tile_bytes((dp, dp), jnp.float32)           # b2 matrix
                   + _tile_bytes((dp, dp), jnp.bfloat16)          # w_root
                   + _tile_bytes((1, dp), jnp.float32)            # b_conv
                   + _tile_bytes((n_pad, dp), jnp.float32))       # output block
    scratch_bytes = _tile_bytes((n_pad, 2 * dp), jnp.bfloat16)
    vmem_need = 2 * block_bytes + scratch_bytes + (4 << 20)       # double-buffer + headroom
    vmem_limit = int(min(max(vmem_need, 16 << 20), 64 << 20))

    flops = int(e_pad * (2 * dp * hp              # edge net linear1
                         + 2 * hp * d * dp        # edge net linear2
                         + 4 * n_pad * dp         # gather (256-lane RHS)
                         + 2 * d * dp             # per-edge contraction
                         + 2 * n_pad * dp)        # scatter
                + n_split * 4 * n_pad * dp * dp)  # hb2 + root weight per core
    bytes_accessed = int(x_p.size * 4 + ea_p.size * 2 + w1_p.size * 2 + w2_p.size * 2
                         + (b1_p.size + b2m_p.size + bc_p.size
                            + gamma_p.size + beta_p.size) * 4
                         + wr_p.size * 2
                         + (src_p.size + dst_p.size) * 4 + inv_deg_p.size * 4
                         + n_split * n_pad * dp * 4)

    kernel = pl.pallas_call(
        functools.partial(gnn_layer_kernel, d=d, k_chunk=k_chunk),
        out_shape=jax.ShapeDtypeStruct((n_split * n_pad, dp), jnp.float32),
        grid=(n_split, tiles_per_split),
        in_specs=[
            whole((n_pad, dp)),                          # x (resident)
            whole((1, dp)),                              # gamma
            whole((1, dp)),                              # beta
            pl.BlockSpec((te, dp), edge_map),            # edge_attr tile (pipelined)
            pl.BlockSpec((te, 1), edge_map),             # src ids tile
            pl.BlockSpec((te, 1), edge_map),             # dst ids tile
            whole((n_pad, 1)),                           # 1/deg
            whole((dp, hp)),                             # w1 (bf16, resident)
            whole((1, hp)),                              # b1
            whole((hp, d * dp)),                         # w2 (bf16, k-major lane-padded)
            whole((dp, dp)),                             # b2 reshaped as a matrix
            whole((dp, dp)),                             # w_root (bf16)
            whole((1, dp)),                              # b_conv
        ],
        out_specs=pl.BlockSpec((n_pad, dp), lambda c, i: (c, 0)),   # per-core partial slab
        scratch_shapes=[
            pltpu.VMEM((n_pad, 2 * dp), jnp.bfloat16),   # [h | h @ b2] (bf16, resident)
        ],
        compiler_params=pltpu.CompilerParams(
            dimension_semantics=("parallel", "arbitrary"),
            vmem_limit_bytes=vmem_limit,
        ),
        cost_estimate=pl.CostEstimate(flops=flops, transcendentals=n_pad * n_split,
                                      bytes_accessed=bytes_accessed),
    )
    out = kernel(x_p, gamma_p, beta_p, ea_p, src_p, dst_p, inv_deg_p,
                 w1_p, b1_p, w2_p, b2m_p, wr_p, bc_p)
    out = out.reshape(n_split, n_pad, dp).sum(axis=0)    # combine per-core partials
    return out[:n, :d]


def reference(x, edge_index, edge_attr, params):
    """Pure-JAX f32 reference of the same forward pass."""
    src, dst = edge_index[0], edge_index[1]
    n, d = x.shape
    mu = jnp.mean(x, axis=-1, keepdims=True)
    var = jnp.mean((x - mu) ** 2, axis=-1, keepdims=True)
    h = (x - mu) / jnp.sqrt(var + LN_EPS) * params["gamma"] + params["beta"]
    h = _leaky(h)
    t = _leaky(edge_attr @ params["w1"] + params["b1"])
    w_edge = (t @ params["w2"] + params["b2"]).reshape(-1, d, d)
    msg = jnp.einsum("ek,ekf->ef", h[src], w_edge)
    summed = jax.ops.segment_sum(msg, dst, num_segments=n)
    deg = jax.ops.segment_sum(jnp.ones_like(dst, jnp.float32), dst, num_segments=n)
    agg = summed / jnp.maximum(deg, 1.0)[:, None]
    out = agg + h @ params["w_root"] + params["b_conv"]
    return x + out


if __name__ == "__main__":
    N, E, D, H = 16, 90, 32, 64   # nodes, edges, d_model, ffn_hidden_dim

    key = jax.random.PRNGKey(0)
    keys = jax.random.split(key, 10)
    x = jax.random.normal(keys[0], (N, D), jnp.float32)
    edge_attr = jax.random.normal(keys[1], (E, D), jnp.float32)
    src = jax.random.randint(keys[2], (E,), 0, N)
    dst = jax.random.randint(keys[3], (E,), 0, N)
    edge_index = jnp.stack([src, dst], axis=0)       # [2, E]

    scale = 0.1
    params = {
        "w1":     scale * jax.random.normal(keys[4], (D, H), jnp.float32),
        "b1":     scale * jax.random.normal(keys[5], (1, H), jnp.float32),
        "w2":     scale * jax.random.normal(keys[6], (H, D * D), jnp.float32),
        "b2":     scale * jax.random.normal(keys[7], (1, D * D), jnp.float32),
        "w_root": scale * jax.random.normal(keys[8], (D, D), jnp.float32),
        "b_conv": scale * jax.random.normal(keys[9], (1, D), jnp.float32),
        "gamma":  jnp.ones((1, D), jnp.float32),
        "beta":   jnp.zeros((1, D), jnp.float32),
    }

    # edge_tile=32, n_split=2 -> grid (2, 2): exercises init / accumulate / finalize,
    # the padded-edge masking, and both core-0 (residual) and core-1 (partial) paths.
    y = gnn_layer(x, edge_index, edge_attr, params, edge_tile=32, k_chunk=2, n_split=2)
    y = jax.block_until_ready(y)

    y_ref = reference(x, edge_index, edge_attr, params)
    # tolerance reflects intentional bf16 MXU operands (edge net, gather/scatter, root)
    np.testing.assert_allclose(np.asarray(y), np.asarray(y_ref), rtol=5e-2, atol=5e-2)

    print("KERNEL_OK")
</pallas_src>

<mosaic_0001>
module attributes {stable_mosaic.version = 11 : i64} {
  func.func @gnn_layer_kernel(%arg0: i32, %arg1: i32, %arg2: memref<16x128xf32, #tpu.memory_space<vmem>>, %arg3: memref<1x128xf32, #tpu.memory_space<vmem>>, %arg4: memref<1x128xf32, #tpu.memory_space<vmem>>, %arg5: memref<32x128xbf16, #tpu.memory_space<vmem>>, %arg6: memref<32x1xi32, #tpu.memory_space<vmem>>, %arg7: memref<32x1xi32, #tpu.memory_space<vmem>>, %arg8: memref<16x1xf32, #tpu.memory_space<vmem>>, %arg9: memref<128x128xbf16, #tpu.memory_space<vmem>>, %arg10: memref<1x128xf32, #tpu.memory_space<vmem>>, %arg11: memref<128x4096xbf16, #tpu.memory_space<vmem>>, %arg12: memref<128x128xf32, #tpu.memory_space<vmem>>, %arg13: memref<128x128xbf16, #tpu.memory_space<vmem>>, %arg14: memref<1x128xf32, #tpu.memory_space<vmem>>, %arg15: memref<16x128xf32, #tpu.memory_space<vmem>>, %arg16: memref<16x256xbf16, #tpu.memory_space<vmem>>) attributes {dimension_semantics = [#tpu.dimension_semantics<parallel>, #tpu.dimension_semantics<arbitrary>], iteration_bounds = array<i64: 2, 2>, scalar_prefetch = 0 : i64, scratch_operands = 1 : i64, tpu.core_type = #tpu.core_type<tc>, window_params = [{pipeline_mode = #tpu.pipeline_mode<synchronous>, transform_indices = @transform_0, window_bounds = array<i64: 16, 128>}, {pipeline_mode = #tpu.pipeline_mode<synchronous>, transform_indices = @transform_1, window_bounds = array<i64: 1, 128>}, {pipeline_mode = #tpu.pipeline_mode<synchronous>, transform_indices = @transform_2, window_bounds = array<i64: 1, 128>}, {transform_indices = @transform_3, window_bounds = array<i64: 32, 128>}, {transform_indices = @transform_4, window_bounds = array<i64: 32, 1>}, {transform_indices = @transform_5, window_bounds = array<i64: 32, 1>}, {pipeline_mode = #tpu.pipeline_mode<synchronous>, transform_indices = @transform_6, window_bounds = array<i64: 16, 1>}, {pipeline_mode = #tpu.pipeline_mode<synchronous>, transform_indices = @transform_7, window_bounds = array<i64: 128, 128>}, {pipeline_mode = #tpu.pipeline_mode<synchronous>, transform_indices = @transform_8, window_bounds = array<i64: 1, 128>}, {pipeline_mode = #tpu.pipeline_mode<synchronous>, transform_indices = @transform_9, window_bounds = array<i64: 128, 4096>}, {pipeline_mode = #tpu.pipeline_mode<synchronous>, transform_indices = @transform_10, window_bounds = array<i64: 128, 128>}, {pipeline_mode = #tpu.pipeline_mode<synchronous>, transform_indices = @transform_11, window_bounds = array<i64: 128, 128>}, {pipeline_mode = #tpu.pipeline_mode<synchronous>, transform_indices = @transform_12, window_bounds = array<i64: 1, 128>}, {transform_indices = @transform_13, window_bounds = array<i64: 16, 128>}]} {
    %c0_i32 = arith.constant 0 : i32
    %0 = arith.cmpi eq, %arg1, %c0_i32 : i32
    %1 = arith.extui %0 : i1 to i32
    %c0_i32_0 = arith.constant 0 : i32
    %2 = arith.cmpi ne, %1, %c0_i32_0 : i32
    scf.if %2 {
      %c0_54 = arith.constant 0 : index
      %c0_55 = arith.constant 0 : index
      %232 = vector.load %arg2[%c0_54, %c0_55] : memref<16x128xf32, #tpu.memory_space<vmem>>, vector<16x128xf32>
      %233 = tpu.iota {dimensions = array<i32: 1>} : vector<16x128xi32>
      %c32_i32 = arith.constant 32 : i32
      %234 = vector.broadcast %c32_i32 : i32 to vector<16x128xi32>
      %235 = arith.cmpi slt, %233, %234 : vector<16x128xi32>
      %cst_56 = arith.constant dense<0.000000e+00> : vector<16xf32>
      %236 = vector.multi_reduction <add>, %232, %cst_56 [1] : vector<16x128xf32> to vector<16xf32>
      %237 = vector.shape_cast %236 : vector<16xf32> to vector<16x1xf32>
      %cst_57 = arith.constant 3.125000e-02 : f32
      %238 = vector.broadcast %cst_57 : f32 to vector<16x1xf32>
      %239 = arith.mulf %237, %238 : vector<16x1xf32>
      %240 = vector.broadcast %239 : vector<16x1xf32> to vector<16x128xf32>
      %241 = arith.subf %232, %240 : vector<16x128xf32>
      %cst_58 = arith.constant 0.000000e+00 : f32
      %242 = vector.broadcast %cst_58 : f32 to vector<16x128xf32>
      %243 = arith.select %235, %241, %242 : vector<16x128xi1>, vector<16x128xf32>
      %244 = arith.mulf %243, %243 : vector<16x128xf32>
      %cst_59 = arith.constant dense<0.000000e+00> : vector<16xf32>
      %245 = vector.multi_reduction <add>, %244, %cst_59 [1] : vector<16x128xf32> to vector<16xf32>
      %246 = vector.shape_cast %245 : vector<16xf32> to vector<16x1xf32>
      %cst_60 = arith.constant 3.125000e-02 : f32
      %247 = vector.broadcast %cst_60 : f32 to vector<16x1xf32>
      %248 = arith.mulf %246, %247 : vector<16x1xf32>
      %cst_61 = arith.constant 9.99999974E-6 : f32
      %249 = vector.broadcast %cst_61 : f32 to vector<16x1xf32>
      %250 = arith.addf %248, %249 : vector<16x1xf32>
      %251 = math.rsqrt %250 : vector<16x1xf32>
      %252 = vector.broadcast %251 : vector<16x1xf32> to vector<16x128xf32>
      %253 = arith.mulf %243, %252 : vector<16x128xf32>
      %c0_62 = arith.constant 0 : index
      %c0_63 = arith.constant 0 : index
      %254 = vector.load %arg3[%c0_62, %c0_63] : memref<1x128xf32, #tpu.memory_space<vmem>>, vector<1x128xf32>
      %255 = vector.broadcast %254 : vector<1x128xf32> to vector<16x128xf32>
      %256 = arith.mulf %253, %255 : vector<16x128xf32>
      %c0_64 = arith.constant 0 : index
      %c0_65 = arith.constant 0 : index
      %257 = vector.load %arg4[%c0_64, %c0_65] : memref<1x128xf32, #tpu.memory_space<vmem>>, vector<1x128xf32>
      %258 = vector.broadcast %257 : vector<1x128xf32> to vector<16x128xf32>
      %259 = arith.addf %256, %258 : vector<16x128xf32>
      %cst_66 = arith.constant 0.000000e+00 : f32
      %260 = vector.broadcast %cst_66 : f32 to vector<16x128xf32>
      %261 = arith.cmpf oge, %259, %260 : vector<16x128xf32>
      %cst_67 = arith.constant 0.00999999977 : f32
      %262 = vector.broadcast %cst_67 : f32 to vector<16x128xf32>
      %263 = arith.mulf %262, %259 : vector<16x128xf32>
      %264 = arith.select %261, %259, %263 : vector<16x128xi1>, vector<16x128xf32>
      %c0_68 = arith.constant 0 : index
      %c0_69 = arith.constant 0 : index
      %265 = vector.load %arg12[%c0_68, %c0_69] : memref<128x128xf32, #tpu.memory_space<vmem>>, vector<128x128xf32>
      %cst_70 = arith.constant dense<0.000000e+00> : vector<16x128xf32>
      %266 = tpu.matmul %264, %265, %cst_70 {dimension_numbers = #tpu.dot_dimension_numbers<[1], [0], [0], [1], [0, 0, 1, 1], [], []>} : vector<16x128xf32>, vector<128x128xf32>, vector<16x128xf32> -> vector<16x128xf32>
      %267 = arith.truncf %264 : vector<16x128xf32> to vector<16x128xbf16>
      %c0_71 = arith.constant 0 : index
      %c0_72 = arith.constant 0 : index
      %268 = vector.load %arg16[%c0_71, %c0_72] : memref<16x256xbf16, #tpu.memory_space<vmem>>, vector<16x128xbf16>
      tpu.vector_store %arg16[%c0_71, %c0_72], %267 {strides = array<i32>} : memref<16x256xbf16, #tpu.memory_space<vmem>>, vector<16x128xbf16>,
      %269 = arith.truncf %266 : vector<16x128xf32> to vector<16x128xbf16>
      %c0_73 = arith.constant 0 : index
      %c128 = arith.constant 128 : index
      %270 = vector.load %arg16[%c0_73, %c128] : memref<16x256xbf16, #tpu.memory_space<vmem>>, vector<16x128xbf16>
      tpu.vector_store %arg16[%c0_73, %c128], %269 {strides = array<i32>} : memref<16x256xbf16, #tpu.memory_space<vmem>>, vector<16x128xbf16>,
      %cst_74 = arith.constant 0.000000e+00 : f32
      %271 = vector.broadcast %cst_74 : f32 to vector<16x128xf32>
      %c0_75 = arith.constant 0 : index
      %c0_76 = arith.constant 0 : index
      %272 = vector.load %arg15[%c0_75, %c0_76] : memref<16x128xf32, #tpu.memory_space<vmem>>, vector<16x128xf32>
      tpu.vector_store %arg15[%c0_75, %c0_76], %271 {strides = array<i32>} : memref<16x128xf32, #tpu.memory_space<vmem>>, vector<16x128xf32>,
    } else {
    }
    %c0 = arith.constant 0 : index
    %c0_1 = arith.constant 0 : index
    %3 = vector.load %arg5[%c0, %c0_1] : memref<32x128xbf16, #tpu.memory_space<vmem>>, vector<32x128xbf16>
    %c0_2 = arith.constant 0 : index
    %c0_3 = arith.constant 0 : index
    %4 = vector.load %arg9[%c0_2, %c0_3] : memref<128x128xbf16, #tpu.memory_space<vmem>>, vector<128x128xbf16>
    %cst = arith.constant dense<0.000000e+00> : vector<32x128xf32>
    %5 = tpu.matmul %3, %4, %cst {dimension_numbers = #tpu.dot_dimension_numbers<[1], [0], [0], [1], [0, 0, 1, 1], [], []>} : vector<32x128xbf16>, vector<128x128xbf16>, vector<32x128xf32> -> vector<32x128xf32>
    %c0_4 = arith.constant 0 : index
    %c0_5 = arith.constant 0 : index
    %6 = vector.load %arg10[%c0_4, %c0_5] : memref<1x128xf32, #tpu.memory_space<vmem>>, vector<1x128xf32>
    %7 = vector.broadcast %6 : vector<1x128xf32> to vector<32x128xf32>
    %8 = arith.addf %5, %7 : vector<32x128xf32>
    %cst_6 = arith.constant 0.000000e+00 : f32
    %9 = vector.broadcast %cst_6 : f32 to vector<32x128xf32>
    %10 = arith.cmpf oge, %8, %9 : vector<32x128xf32>
    %cst_7 = arith.constant 0.00999999977 : f32
    %11 = vector.broadcast %cst_7 : f32 to vector<32x128xf32>
    %12 = arith.mulf %11, %8 : vector<32x128xf32>
    %13 = arith.select %10, %8, %12 : vector<32x128xi1>, vector<32x128xf32>
    %14 = arith.truncf %13 : vector<32x128xf32> to vector<32x128xbf16>
    %15 = tpu.iota {dimensions = array<i32: 1>} : vector<32x16xi32>
    %c0_8 = arith.constant 0 : index
    %c0_9 = arith.constant 0 : index
    %16 = vector.load %arg6[%c0_8, %c0_9] : memref<32x1xi32, #tpu.memory_space<vmem>>, vector<32x1xi32>
    %17 = vector.broadcast %16 : vector<32x1xi32> to vector<32x16xi32>
    %18 = arith.cmpi eq, %15, %17 : vector<32x16xi32>
    %19 = arith.extui %18 : vector<32x16xi1> to vector<32x16xi32>
    %20 = arith.sitofp %19 : vector<32x16xi32> to vector<32x16xf32>
    %21 = arith.truncf %20 : vector<32x16xf32> to vector<32x16xbf16>
    %c0_10 = arith.constant 0 : index
    %c0_11 = arith.constant 0 : index
    %22 = vector.load %arg16[%c0_10, %c0_11] : memref<16x256xbf16, #tpu.memory_space<vmem>>, vector<16x256xbf16>
    %cst_12 = arith.constant dense<0.000000e+00> : vector<32x256xf32>
    %23 = tpu.matmul %21, %22, %cst_12 {dimension_numbers = #tpu.dot_dimension_numbers<[1], [0], [0], [1], [0, 0, 1, 1], [], []>} : vector<32x16xbf16>, vector<16x256xbf16>, vector<32x256xf32> -> vector<32x256xf32>
    %24 = vector.extract_strided_slice %23 {offsets = [0, 0], sizes = [32, 128], strides = [1, 1]} : vector<32x256xf32> to vector<32x128xf32>
    %25 = vector.extract_strided_slice %23 {offsets = [0, 128], sizes = [32, 128], strides = [1, 1]} : vector<32x256xf32> to vector<32x128xf32>
    %c0_13 = arith.constant 0 : index
    %c0_14 = arith.constant 0 : index
    %26 = vector.load %arg11[%c0_13, %c0_14] : memref<128x4096xbf16, #tpu.memory_space<vmem>>, vector<128x256xbf16>
    %cst_15 = arith.constant dense<0.000000e+00> : vector<32x256xf32>
    %27 = tpu.matmul %14, %26, %cst_15 {dimension_numbers = #tpu.dot_dimension_numbers<[1], [0], [0], [1], [0, 0, 1, 1], [], []>} : vector<32x128xbf16>, vector<128x256xbf16>, vector<32x256xf32> -> vector<32x256xf32>
    %28 = vector.extract_strided_slice %24 {offsets = [0, 0], sizes = [32, 1], strides = [1, 1]} : vector<32x128xf32> to vector<32x1xf32>
    %29 = vector.extract_strided_slice %27 {offsets = [0, 0], sizes = [32, 128], strides = [1, 1]} : vector<32x256xf32> to vector<32x128xf32>
    %30 = vector.broadcast %28 : vector<32x1xf32> to vector<32x128xf32>
    %31 = arith.mulf %30, %29 : vector<32x128xf32>
    %32 = arith.addf %25, %31 : vector<32x128xf32>
    %33 = vector.extract_strided_slice %24 {offsets = [0, 1], sizes = [32, 1], strides = [1, 1]} : vector<32x128xf32> to vector<32x1xf32>
    %34 = vector.extract_strided_slice %27 {offsets = [0, 128], sizes = [32, 128], strides = [1, 1]} : vector<32x256xf32> to vector<32x128xf32>
    %35 = vector.broadcast %33 : vector<32x1xf32> to vector<32x128xf32>
    %36 = arith.mulf %35, %34 : vector<32x128xf32>
    %37 = arith.addf %32, %36 : vector<32x128xf32>
    %c0_16 = arith.constant 0 : index
    %c256 = arith.constant 256 : index
    %38 = vector.load %arg11[%c0_16, %c256] : memref<128x4096xbf16, #tpu.memory_space<vmem>>, vector<128x256xbf16>
    %cst_17 = arith.constant dense<0.000000e+00> : vector<32x256xf32>
    %39 = tpu.matmul %14, %38, %cst_17 {dimension_numbers = #tpu.dot_dimension_numbers<[1], [0], [0], [1], [0, 0, 1, 1], [], []>} : vector<32x128xbf16>, vector<128x256xbf16>, vector<32x256xf32> -> vector<32x256xf32>
    %40 = vector.extract_strided_slice %24 {offsets = [0, 2], sizes = [32, 1], strides = [1, 1]} : vector<32x128xf32> to vector<32x1xf32>
    %41 = vector.extract_strided_slice %39 {offsets = [0, 0], sizes = [32, 128], strides = [1, 1]} : vector<32x256xf32> to vector<32x128xf32>
    %42 = vector.broadcast %40 : vector<32x1xf32> to vector<32x128xf32>
    %43 = arith.mulf %42, %41 : vector<32x128xf32>
    %44 = arith.addf %37, %43 : vector<32x128xf32>
    %45 = vector.extract_strided_slice %24 {offsets = [0, 3], sizes = [32, 1], strides = [1, 1]} : vector<32x128xf32> to vector<32x1xf32>
    %46 = vector.extract_strided_slice %39 {offsets = [0, 128], sizes = [32, 128], strides = [1, 1]} : vector<32x256xf32> to vector<32x128xf32>
    %47 = vector.broadcast %45 : vector<32x1xf32> to vector<32x128xf32>
    %48 = arith.mulf %47, %46 : vector<32x128xf32>
    %49 = arith.addf %44, %48 : vector<32x128xf32>
    %c0_18 = arith.constant 0 : index
    %c512 = arith.constant 512 : index
    %50 = vector.load %arg11[%c0_18, %c512] : memref<128x4096xbf16, #tpu.memory_space<vmem>>, vector<128x256xbf16>
    %cst_19 = arith.constant dense<0.000000e+00> : vector<32x256xf32>
    %51 = tpu.matmul %14, %50, %cst_19 {dimension_numbers = #tpu.dot_dimension_numbers<[1], [0], [0], [1], [0, 0, 1, 1], [], []>} : vector<32x128xbf16>, vector<128x256xbf16>, vector<32x256xf32> -> vector<32x256xf32>
    %52 = vector.extract_strided_slice %24 {offsets = [0, 4], sizes = [32, 1], strides = [1, 1]} : vector<32x128xf32> to vector<32x1xf32>
    %53 = vector.extract_strided_slice %51 {offsets = [0, 0], sizes = [32, 128], strides = [1, 1]} : vector<32x256xf32> to vector<32x128xf32>
    %54 = vector.broadcast %52 : vector<32x1xf32> to vector<32x128xf32>
    %55 = arith.mulf %54, %53 : vector<32x128xf32>
    %56 = arith.addf %49, %55 : vector<32x128xf32>
    %57 = vector.extract_strided_slice %24 {offsets = [0, 5], sizes = [32, 1], strides = [1, 1]} : vector<32x128xf32> to vector<32x1xf32>
    %58 = vector.extract_strided_slice %51 {offsets = [0, 128], sizes = [32, 128], strides = [1, 1]} : vector<32x256xf32> to vector<32x128xf32>
    %59 = vector.broadcast %57 : vector<32x1xf32> to vector<32x128xf32>
    %60 = arith.mulf %59, %58 : vector<32x128xf32>
    %61 = arith.addf %56, %60 : vector<32x128xf32>
    %c0_20 = arith.constant 0 : index
    %c768 = arith.constant 768 : index
    %62 = vector.load %arg11[%c0_20, %c768] : memref<128x4096xbf16, #tpu.memory_space<vmem>>, vector<128x256xbf16>
    %cst_21 = arith.constant dense<0.000000e+00> : vector<32x256xf32>
    %63 = tpu.matmul %14, %62, %cst_21 {dimension_numbers = #tpu.dot_dimension_numbers<[1], [0], [0], [1], [0, 0, 1, 1], [], []>} : vector<32x128xbf16>, vector<128x256xbf16>, vector<32x256xf32> -> vector<32x256xf32>
    %64 = vector.extract_strided_slice %24 {offsets = [0, 6], sizes = [32, 1], strides = [1, 1]} : vector<32x128xf32> to vector<32x1xf32>
    %65 = vector.extract_strided_slice %63 {offsets = [0, 0], sizes = [32, 128], strides = [1, 1]} : vector<32x256xf32> to vector<32x128xf32>
    %66 = vector.broadcast %64 : vector<32x1xf32> to vector<32x128xf32>
    %67 = arith.mulf %66, %65 : vector<32x128xf32>
    %68 = arith.addf %61, %67 : vector<32x128xf32>
    %69 = vector.extract_strided_slice %24 {offsets = [0, 7], sizes = [32, 1], strides = [1, 1]} : vector<32x128xf32> to vector<32x1xf32>
    %70 = vector.extract_strided_slice %63 {offsets = [0, 128], sizes = [32, 128], strides = [1, 1]} : vector<32x256xf32> to vector<32x128xf32>
    %71 = vector.broadcast %69 : vector<32x1xf32> to vector<32x128xf32>
    %72 = arith.mulf %71, %70 : vector<32x128xf32>
    %73 = arith.addf %68, %72 : vector<32x128xf32>
    %c0_22 = arith.constant 0 : index
    %c1024 = arith.constant 1024 : index
    %74 = vector.load %arg11[%c0_22, %c1024] : memref<128x4096xbf16, #tpu.memory_space<vmem>>, vector<128x256xbf16>
    %cst_23 = arith.constant dense<0.000000e+00> : vector<32x256xf32>
    %75 = tpu.matmul %14, %74, %cst_23 {dimension_numbers = #tpu.dot_dimension_numbers<[1], [0], [0], [1], [0, 0, 1, 1], [], []>} : vector<32x128xbf16>, vector<128x256xbf16>, vector<32x256xf32> -> vector<32x256xf32>
    %76 = vector.extract_strided_slice %24 {offsets = [0, 8], sizes = [32, 1], strides = [1, 1]} : vector<32x128xf32> to vector<32x1xf32>
    %77 = vector.extract_strided_slice %75 {offsets = [0, 0], sizes = [32, 128], strides = [1, 1]} : vector<32x256xf32> to vector<32x128xf32>
    %78 = vector.broadcast %76 : vector<32x1xf32> to vector<32x128xf32>
    %79 = arith.mulf %78, %77 : vector<32x128xf32>
    %80 = arith.addf %73, %79 : vector<32x128xf32>
    %81 = vector.extract_strided_slice %24 {offsets = [0, 9], sizes = [32, 1], strides = [1, 1]} : vector<32x128xf32> to vector<32x1xf32>
    %82 = vector.extract_strided_slice %75 {offsets = [0, 128], sizes = [32, 128], strides = [1, 1]} : vector<32x256xf32> to vector<32x128xf32>
    %83 = vector.broadcast %81 : vector<32x1xf32> to vector<32x128xf32>
    %84 = arith.mulf %83, %82 : vector<32x128xf32>
    %85 = arith.addf %80, %84 : vector<32x128xf32>
    %c0_24 = arith.constant 0 : index
    %c1280 = arith.constant 1280 : index
    %86 = vector.load %arg11[%c0_24, %c1280] : memref<128x4096xbf16, #tpu.memory_space<vmem>>, vector<128x256xbf16>
    %cst_25 = arith.constant dense<0.000000e+00> : vector<32x256xf32>
    %87 = tpu.matmul %14, %86, %cst_25 {dimension_numbers = #tpu.dot_dimension_numbers<[1], [0], [0], [1], [0, 0, 1, 1], [], []>} : vector<32x128xbf16>, vector<128x256xbf16>, vector<32x256xf32> -> vector<32x256xf32>
    %88 = vector.extract_strided_slice %24 {offsets = [0, 10], sizes = [32, 1], strides = [1, 1]} : vector<32x128xf32> to vector<32x1xf32>
    %89 = vector.extract_strided_slice %87 {offsets = [0, 0], sizes = [32, 128], strides = [1, 1]} : vector<32x256xf32> to vector<32x128xf32>
    %90 = vector.broadcast %88 : vector<32x1xf32> to vector<32x128xf32>
    %91 = arith.mulf %90, %89 : vector<32x128xf32>
    %92 = arith.addf %85, %91 : vector<32x128xf32>
    %93 = vector.extract_strided_slice %24 {offsets = [0, 11], sizes = [32, 1], strides = [1, 1]} : vector<32x128xf32> to vector<32x1xf32>
    %94 = vector.extract_strided_slice %87 {offsets = [0, 128], sizes = [32, 128], strides = [1, 1]} : vector<32x256xf32> to vector<32x128xf32>
    %95 = vector.broadcast %93 : vector<32x1xf32> to vector<32x128xf32>
    %96 = arith.mulf %95, %94 : vector<32x128xf32>
    %97 = arith.addf %92, %96 : vector<32x128xf32>
    %c0_26 = arith.constant 0 : index
    %c1536 = arith.constant 1536 : index
    %98 = vector.load %arg11[%c0_26, %c1536] : memref<128x4096xbf16, #tpu.memory_space<vmem>>, vector<128x256xbf16>
    %cst_27 = arith.constant dense<0.000000e+00> : vector<32x256xf32>
    %99 = tpu.matmul %14, %98, %cst_27 {dimension_numbers = #tpu.dot_dimension_numbers<[1], [0], [0], [1], [0, 0, 1, 1], [], []>} : vector<32x128xbf16>, vector<128x256xbf16>, vector<32x256xf32> -> vector<32x256xf32>
    %100 = vector.extract_strided_slice %24 {offsets = [0, 12], sizes = [32, 1], strides = [1, 1]} : vector<32x128xf32> to vector<32x1xf32>
    %101 = vector.extract_strided_slice %99 {offsets = [0, 0], sizes = [32, 128], strides = [1, 1]} : vector<32x256xf32> to vector<32x128xf32>
    %102 = vector.broadcast %100 : vector<32x1xf32> to vector<32x128xf32>
    %103 = arith.mulf %102, %101 : vector<32x128xf32>
    %104 = arith.addf %97, %103 : vector<32x128xf32>
    %105 = vector.extract_strided_slice %24 {offsets = [0, 13], sizes = [32, 1], strides = [1, 1]} : vector<32x128xf32> to vector<32x1xf32>
    %106 = vector.extract_strided_slice %99 {offsets = [0, 128], sizes = [32, 128], strides = [1, 1]} : vector<32x256xf32> to vector<32x128xf32>
    %107 = vector.broadcast %105 : vector<32x1xf32> to vector<32x128xf32>
    %108 = arith.mulf %107, %106 : vector<32x128xf32>
    %109 = arith.addf %104, %108 : vector<32x128xf32>
    %c0_28 = arith.constant 0 : index
    %c1792 = arith.constant 1792 : index
    %110 = vector.load %arg11[%c0_28, %c1792] : memref<128x4096xbf16, #tpu.memory_space<vmem>>, vector<128x256xbf16>
    %cst_29 = arith.constant dense<0.000000e+00> : vector<32x256xf32>
    %111 = tpu.matmul %14, %110, %cst_29 {dimension_numbers = #tpu.dot_dimension_numbers<[1], [0], [0], [1], [0, 0, 1, 1], [], []>} : vector<32x128xbf16>, vector<128x256xbf16>, vector<32x256xf32> -> vector<32x256xf32>
    %112 = vector.extract_strided_slice %24 {offsets = [0, 14], sizes = [32, 1], strides = [1, 1]} : vector<32x128xf32> to vector<32x1xf32>
    %113 = vector.extract_strided_slice %111 {offsets = [0, 0], sizes = [32, 128], strides = [1, 1]} : vector<32x256xf32> to vector<32x128xf32>
    %114 = vector.broadcast %112 : vector<32x1xf32> to vector<32x128xf32>
    %115 = arith.mulf %114, %113 : vector<32x128xf32>
    %116 = arith.addf %109, %115 : vector<32x128xf32>
    %117 = vector.extract_strided_slice %24 {offsets = [0, 15], sizes = [32, 1], strides = [1, 1]} : vector<32x128xf32> to vector<32x1xf32>
    %118 = vector.extract_strided_slice %111 {offsets = [0, 128], sizes = [32, 128], strides = [1, 1]} : vector<32x256xf32> to vector<32x128xf32>
    %119 = vector.broadcast %117 : vector<32x1xf32> to vector<32x128xf32>
    %120 = arith.mulf %119, %118 : vector<32x128xf32>
    %121 = arith.addf %116, %120 : vector<32x128xf32>
    %c0_30 = arith.constant 0 : index
    %c2048 = arith.constant 2048 : index
    %122 = vector.load %arg11[%c0_30, %c2048] : memref<128x4096xbf16, #tpu.memory_space<vmem>>, vector<128x256xbf16>
    %cst_31 = arith.constant dense<0.000000e+00> : vector<32x256xf32>
    %123 = tpu.matmul %14, %122, %cst_31 {dimension_numbers = #tpu.dot_dimension_numbers<[1], [0], [0], [1], [0, 0, 1, 1], [], []>} : vector<32x128xbf16>, vector<128x256xbf16>, vector<32x256xf32> -> vector<32x256xf32>
    %124 = vector.extract_strided_slice %24 {offsets = [0, 16], sizes = [32, 1], strides = [1, 1]} : vector<32x128xf32> to vector<32x1xf32>
    %125 = vector.extract_strided_slice %123 {offsets = [0, 0], sizes = [32, 128], strides = [1, 1]} : vector<32x256xf32> to vector<32x128xf32>
    %126 = vector.broadcast %124 : vector<32x1xf32> to vector<32x128xf32>
    %127 = arith.mulf %126, %125 : vector<32x128xf32>
    %128 = arith.addf %121, %127 : vector<32x128xf32>
    %129 = vector.extract_strided_slice %24 {offsets = [0, 17], sizes = [32, 1], strides = [1, 1]} : vector<32x128xf32> to vector<32x1xf32>
    %130 = vector.extract_strided_slice %123 {offsets = [0, 128], sizes = [32, 128], strides = [1, 1]} : vector<32x256xf32> to vector<32x128xf32>
    %131 = vector.broadcast %129 : vector<32x1xf32> to vector<32x128xf32>
    %132 = arith.mulf %131, %130 : vector<32x128xf32>
    %133 = arith.addf %128, %132 : vector<32x128xf32>
    %c0_32 = arith.constant 0 : index
    %c2304 = arith.constant 2304 : index
    %134 = vector.load %arg11[%c0_32, %c2304] : memref<128x4096xbf16, #tpu.memory_space<vmem>>, vector<128x256xbf16>
    %cst_33 = arith.constant dense<0.000000e+00> : vector<32x256xf32>
    %135 = tpu.matmul %14, %134, %cst_33 {dimension_numbers = #tpu.dot_dimension_numbers<[1], [0], [0], [1], [0, 0, 1, 1], [], []>} : vector<32x128xbf16>, vector<128x256xbf16>, vector<32x256xf32> -> vector<32x256xf32>
    %136 = vector.extract_strided_slice %24 {offsets = [0, 18], sizes = [32, 1], strides = [1, 1]} : vector<32x128xf32> to vector<32x1xf32>
    %137 = vector.extract_strided_slice %135 {offsets = [0, 0], sizes = [32, 128], strides = [1, 1]} : vector<32x256xf32> to vector<32x128xf32>
    %138 = vector.broadcast %136 : vector<32x1xf32> to vector<32x128xf32>
    %139 = arith.mulf %138, %137 : vector<32x128xf32>
    %140 = arith.addf %133, %139 : vector<32x128xf32>
    %141 = vector.extract_strided_slice %24 {offsets = [0, 19], sizes = [32, 1], strides = [1, 1]} : vector<32x128xf32> to vector<32x1xf32>
    %142 = vector.extract_strided_slice %135 {offsets = [0, 128], sizes = [32, 128], strides = [1, 1]} : vector<32x256xf32> to vector<32x128xf32>
    %143 = vector.broadcast %141 : vector<32x1xf32> to vector<32x128xf32>
    %144 = arith.mulf %143, %142 : vector<32x128xf32>
    %145 = arith.addf %140, %144 : vector<32x128xf32>
    %c0_34 = arith.constant 0 : index
    %c2560 = arith.constant 2560 : index
    %146 = vector.load %arg11[%c0_34, %c2560] : memref<128x4096xbf16, #tpu.memory_space<vmem>>, vector<128x256xbf16>
    %cst_35 = arith.constant dense<0.000000e+00> : vector<32x256xf32>
    %147 = tpu.matmul %14, %146, %cst_35 {dimension_numbers = #tpu.dot_dimension_numbers<[1], [0], [0], [1], [0, 0, 1, 1], [], []>} : vector<32x128xbf16>, vector<128x256xbf16>, vector<32x256xf32> -> vector<32x256xf32>
    %148 = vector.extract_strided_slice %24 {offsets = [0, 20], sizes = [32, 1], strides = [1, 1]} : vector<32x128xf32> to vector<32x1xf32>
    %149 = vector.extract_strided_slice %147 {offsets = [0, 0], sizes = [32, 128], strides = [1, 1]} : vector<32x256xf32> to vector<32x128xf32>
    %150 = vector.broadcast %148 : vector<32x1xf32> to vector<32x128xf32>
    %151 = arith.mulf %150, %149 : vector<32x128xf32>
    %152 = arith.addf %145, %151 : vector<32x128xf32>
    %153 = vector.extract_strided_slice %24 {offsets = [0, 21], sizes = [32, 1], strides = [1, 1]} : vector<32x128xf32> to vector<32x1xf32>
    %154 = vector.extract_strided_slice %147 {offsets = [0, 128], sizes = [32, 128], strides = [1, 1]} : vector<32x256xf32> to vector<32x128xf32>
    %155 = vector.broadcast %153 : vector<32x1xf32> to vector<32x128xf32>
    %156 = arith.mulf %155, %154 : vector<32x128xf32>
    %157 = arith.addf %152, %156 : vector<32x128xf32>
    %c0_36 = arith.constant 0 : index
    %c2816 = arith.constant 2816 : index
    %158 = vector.load %arg11[%c0_36, %c2816] : memref<128x4096xbf16, #tpu.memory_space<vmem>>, vector<128x256xbf16>
    %cst_37 = arith.constant dense<0.000000e+00> : vector<32x256xf32>
    %159 = tpu.matmul %14, %158, %cst_37 {dimension_numbers = #tpu.dot_dimension_numbers<[1], [0], [0], [1], [0, 0, 1, 1], [], []>} : vector<32x128xbf16>, vector<128x256xbf16>, vector<32x256xf32> -> vector<32x256xf32>
    %160 = vector.extract_strided_slice %24 {offsets = [0, 22], sizes = [32, 1], strides = [1, 1]} : vector<32x128xf32> to vector<32x1xf32>
    %161 = vector.extract_strided_slice %159 {offsets = [0, 0], sizes = [32, 128], strides = [1, 1]} : vector<32x256xf32> to vector<32x128xf32>
    %162 = vector.broadcast %160 : vector<32x1xf32> to vector<32x128xf32>
    %163 = arith.mulf %162, %161 : vector<32x128xf32>
    %164 = arith.addf %157, %163 : vector<32x128xf32>
    %165 = vector.extract_strided_slice %24 {offsets = [0, 23], sizes = [32, 1], strides = [1, 1]} : vector<32x128xf32> to vector<32x1xf32>
    %166 = vector.extract_strided_slice %159 {offsets = [0, 128], sizes = [32, 128], strides = [1, 1]} : vector<32x256xf32> to vector<32x128xf32>
    %167 = vector.broadcast %165 : vector<32x1xf32> to vector<32x128xf32>
    %168 = arith.mulf %167, %166 : vector<32x128xf32>
    %169 = arith.addf %164, %168 : vector<32x128xf32>
    %c0_38 = arith.constant 0 : index
    %c3072 = arith.constant 3072 : index
    %170 = vector.load %arg11[%c0_38, %c3072] : memref<128x4096xbf16, #tpu.memory_space<vmem>>, vector<128x256xbf16>
    %cst_39 = arith.constant dense<0.000000e+00> : vector<32x256xf32>
    %171 = tpu.matmul %14, %170, %cst_39 {dimension_numbers = #tpu.dot_dimension_numbers<[1], [0], [0], [1], [0, 0, 1, 1], [], []>} : vector<32x128xbf16>, vector<128x256xbf16>, vector<32x256xf32> -> vector<32x256xf32>
    %172 = vector.extract_strided_slice %24 {offsets = [0, 24], sizes = [32, 1], strides = [1, 1]} : vector<32x128xf32> to vector<32x1xf32>
    %173 = vector.extract_strided_slice %171 {offsets = [0, 0], sizes = [32, 128], strides = [1, 1]} : vector<32x256xf32> to vector<32x128xf32>
    %174 = vector.broadcast %172 : vector<32x1xf32> to vector<32x128xf32>
    %175 = arith.mulf %174, %173 : vector<32x128xf32>
    %176 = arith.addf %169, %175 : vector<32x128xf32>
    %177 = vector.extract_strided_slice %24 {offsets = [0, 25], sizes = [32, 1], strides = [1, 1]} : vector<32x128xf32> to vector<32x1xf32>
    %178 = vector.extract_strided_slice %171 {offsets = [0, 128], sizes = [32, 128], strides = [1, 1]} : vector<32x256xf32> to vector<32x128xf32>
    %179 = vector.broadcast %177 : vector<32x1xf32> to vector<32x128xf32>
    %180 = arith.mulf %179, %178 : vector<32x128xf32>
    %181 = arith.addf %176, %180 : vector<32x128xf32>
    %c0_40 = arith.constant 0 : index
    %c3328 = arith.constant 3328 : index
    %182 = vector.load %arg11[%c0_40, %c3328] : memref<128x4096xbf16, #tpu.memory_space<vmem>>, vector<128x256xbf16>
    %cst_41 = arith.constant dense<0.000000e+00> : vector<32x256xf32>
    %183 = tpu.matmul %14, %182, %cst_41 {dimension_numbers = #tpu.dot_dimension_numbers<[1], [0], [0], [1], [0, 0, 1, 1], [], []>} : vector<32x128xbf16>, vector<128x256xbf16>, vector<32x256xf32> -> vector<32x256xf32>
    %184 = vector.extract_strided_slice %24 {offsets = [0, 26], sizes = [32, 1], strides = [1, 1]} : vector<32x128xf32> to vector<32x1xf32>
    %185 = vector.extract_strided_slice %183 {offsets = [0, 0], sizes = [32, 128], strides = [1, 1]} : vector<32x256xf32> to vector<32x128xf32>
    %186 = vector.broadcast %184 : vector<32x1xf32> to vector<32x128xf32>
    %187 = arith.mulf %186, %185 : vector<32x128xf32>
    %188 = arith.addf %181, %187 : vector<32x128xf32>
    %189 = vector.extract_strided_slice %24 {offsets = [0, 27], sizes = [32, 1], strides = [1, 1]} : vector<32x128xf32> to vector<32x1xf32>
    %190 = vector.extract_strided_slice %183 {offsets = [0, 128], sizes = [32, 128], strides = [1, 1]} : vector<32x256xf32> to vector<32x128xf32>
    %191 = vector.broadcast %189 : vector<32x1xf32> to vector<32x128xf32>
    %192 = arith.mulf %191, %190 : vector<32x128xf32>
    %193 = arith.addf %188, %192 : vector<32x128xf32>
    %c0_42 = arith.constant 0 : index
    %c3584 = arith.constant 3584 : index
    %194 = vector.load %arg11[%c0_42, %c3584] : memref<128x4096xbf16, #tpu.memory_space<vmem>>, vector<128x256xbf16>
    %cst_43 = arith.constant dense<0.000000e+00> : vector<32x256xf32>
    %195 = tpu.matmul %14, %194, %cst_43 {dimension_numbers = #tpu.dot_dimension_numbers<[1], [0], [0], [1], [0, 0, 1, 1], [], []>} : vector<32x128xbf16>, vector<128x256xbf16>, vector<32x256xf32> -> vector<32x256xf32>
    %196 = vector.extract_strided_slice %24 {offsets = [0, 28], sizes = [32, 1], strides = [1, 1]} : vector<32x128xf32> to vector<32x1xf32>
    %197 = vector.extract_strided_slice %195 {offsets = [0, 0], sizes = [32, 128], strides = [1, 1]} : vector<32x256xf32> to vector<32x128xf32>
    %198 = vector.broadcast %196 : vector<32x1xf32> to vector<32x128xf32>
    %199 = arith.mulf %198, %197 : vector<32x128xf32>
    %200 = arith.addf %193, %199 : vector<32x128xf32>
    %201 = vector.extract_strided_slice %24 {offsets = [0, 29], sizes = [32, 1], strides = [1, 1]} : vector<32x128xf32> to vector<32x1xf32>
    %202 = vector.extract_strided_slice %195 {offsets = [0, 128], sizes = [32, 128], strides = [1, 1]} : vector<32x256xf32> to vector<32x128xf32>
    %203 = vector.broadcast %201 : vector<32x1xf32> to vector<32x128xf32>
    %204 = arith.mulf %203, %202 : vector<32x128xf32>
    %205 = arith.addf %200, %204 : vector<32x128xf32>
    %c0_44 = arith.constant 0 : index
    %c3840 = arith.constant 3840 : index
    %206 = vector.load %arg11[%c0_44, %c3840] : memref<128x4096xbf16, #tpu.memory_space<vmem>>, vector<128x256xbf16>
    %cst_45 = arith.constant dense<0.000000e+00> : vector<32x256xf32>
    %207 = tpu.matmul %14, %206, %cst_45 {dimension_numbers = #tpu.dot_dimension_numbers<[1], [0], [0], [1], [0, 0, 1, 1], [], []>} : vector<32x128xbf16>, vector<128x256xbf16>, vector<32x256xf32> -> vector<32x256xf32>
    %208 = vector.extract_strided_slice %24 {offsets = [0, 30], sizes = [32, 1], strides = [1, 1]} : vector<32x128xf32> to vector<32x1xf32>
    %209 = vector.extract_strided_slice %207 {offsets = [0, 0], sizes = [32, 128], strides = [1, 1]} : vector<32x256xf32> to vector<32x128xf32>
    %210 = vector.broadcast %208 : vector<32x1xf32> to vector<32x128xf32>
    %211 = arith.mulf %210, %209 : vector<32x128xf32>
    %212 = arith.addf %205, %211 : vector<32x128xf32>
    %213 = vector.extract_strided_slice %24 {offsets = [0, 31], sizes = [32, 1], strides = [1, 1]} : vector<32x128xf32> to vector<32x1xf32>
    %214 = vector.extract_strided_slice %207 {offsets = [0, 128], sizes = [32, 128], strides = [1, 1]} : vector<32x256xf32> to vector<32x128xf32>
    %215 = vector.broadcast %213 : vector<32x1xf32> to vector<32x128xf32>
    %216 = arith.mulf %215, %214 : vector<32x128xf32>
    %217 = arith.addf %212, %216 : vector<32x128xf32>
    %c0_46 = arith.constant 0 : index
    %c0_47 = arith.constant 0 : index
    %218 = vector.load %arg7[%c0_46, %c0_47] : memref<32x1xi32, #tpu.memory_space<vmem>>, vector<32x1xi32>
    %219 = vector.broadcast %218 : vector<32x1xi32> to vector<32x16xi32>
    %220 = arith.cmpi eq, %15, %219 : vector<32x16xi32>
    %221 = arith.extui %220 : vector<32x16xi1> to vector<32x16xi32>
    %222 = arith.sitofp %221 : vector<32x16xi32> to vector<32x16xf32>
    %223 = arith.truncf %222 : vector<32x16xf32> to vector<32x16xbf16>
    %c0_48 = arith.constant 0 : index
    %c0_49 = arith.constant 0 : index
    %224 = vector.load %arg15[%c0_48, %c0_49] : memref<16x128xf32, #tpu.memory_space<vmem>>, vector<16x128xf32>
    %225 = arith.truncf %217 : vector<32x128xf32> to vector<32x128xbf16>
    %cst_50 = arith.constant dense<0.000000e+00> : vector<16x128xf32>
    %226 = tpu.matmul %223, %225, %cst_50 {dimension_numbers = #tpu.dot_dimension_numbers<[0], [0], [1], [1], [0, 1, 1, 1], [], []>} : vector<32x16xbf16>, vector<32x128xbf16>, vector<16x128xf32> -> vector<16x128xf32>
    %227 = arith.addf %224, %226 : vector<16x128xf32>
    %c0_51 = arith.constant 0 : index
    %c0_52 = arith.constant 0 : index
    %228 = vector.load %arg15[%c0_51, %c0_52] : memref<16x128xf32, #tpu.memory_space<vmem>>, vector<16x128xf32>
    tpu.vector_store %arg15[%c0_51, %c0_52], %227 {strides = array<i32>} : memref<16x128xf32, #tpu.memory_space<vmem>>, vector<16x128xf32>,
    %c1_i32 = arith.constant 1 : i32
    %229 = arith.cmpi eq, %arg1, %c1_i32 : i32
    %230 = arith.extui %229 : i1 to i32
    %c0_i32_53 = arith.constant 0 : i32
    %231 = arith.cmpi ne, %230, %c0_i32_53 : i32
    scf.if %231 {
      %c0_54 = arith.constant 0 : index
      %c0_55 = arith.constant 0 : index
      %232 = vector.load %arg15[%c0_54, %c0_55] : memref<16x128xf32, #tpu.memory_space<vmem>>, vector<16x128xf32>
      %c0_56 = arith.constant 0 : index
      %c0_57 = arith.constant 0 : index
      %233 = vector.load %arg8[%c0_56, %c0_57] : memref<16x1xf32, #tpu.memory_space<vmem>>, vector<16x1xf32>
      %234 = vector.broadcast %233 : vector<16x1xf32> to vector<16x128xf32>
      %235 = arith.mulf %232, %234 : vector<16x128xf32>
      %c0_i32_58 = arith.constant 0 : i32
      %236 = arith.cmpi eq, %arg0, %c0_i32_58 : i32
      %237 = arith.extui %236 : i1 to i32
      %c0_i32_59 = arith.constant 0 : i32
      %238 = arith.cmpi ne, %237, %c0_i32_59 : i32
      scf.if %238 {
        %c0_62 = arith.constant 0 : index
        %c0_63 = arith.constant 0 : index
        %242 = vector.load %arg16[%c0_62, %c0_63] : memref<16x256xbf16, #tpu.memory_space<vmem>>, vector<16x128xbf16>
        %c0_64 = arith.constant 0 : index
        %c0_65 = arith.constant 0 : index
        %243 = vector.load %arg13[%c0_64, %c0_65] : memref<128x128xbf16, #tpu.memory_space<vmem>>, vector<128x128xbf16>
        %cst_66 = arith.constant dense<0.000000e+00> : vector<16x128xf32>
        %244 = tpu.matmul %242, %243, %cst_66 {dimension_numbers = #tpu.dot_dimension_numbers<[1], [0], [0], [1], [0, 0, 1, 1], [], []>} : vector<16x128xbf16>, vector<128x128xbf16>, vector<16x128xf32> -> vector<16x128xf32>
        %c0_67 = arith.constant 0 : index
        %c0_68 = arith.constant 0 : index
        %245 = vector.load %arg2[%c0_67, %c0_68] : memref<16x128xf32, #tpu.memory_space<vmem>>, vector<16x128xf32>
        %246 = arith.addf %245, %235 : vector<16x128xf32>
        %247 = arith.addf %246, %244 : vector<16x128xf32>
        %c0_69 = arith.constant 0 : index
        %c0_70 = arith.constant 0 : index
        %248 = vector.load %arg14[%c0_69, %c0_70] : memref<1x128xf32, #tpu.memory_space<vmem>>, vector<1x128xf32>
        %249 = vector.broadcast %248 : vector<1x128xf32> to vector<16x128xf32>
        %250 = arith.addf %247, %249 : vector<16x128xf32>
        %c0_71 = arith.constant 0 : index
        %c0_72 = arith.constant 0 : index
        %251 = vector.load %arg15[%c0_71, %c0_72] : memref<16x128xf32, #tpu.memory_space<vmem>>, vector<16x128xf32>
        tpu.vector_store %arg15[%c0_71, %c0_72], %250 {strides = array<i32>} : memref<16x128xf32, #tpu.memory_space<vmem>>, vector<16x128xf32>,
      } else {
      }
      %c0_i32_60 = arith.constant 0 : i32
      %239 = arith.cmpi ne, %arg0, %c0_i32_60 : i32
      %240 = arith.extui %239 : i1 to i32
      %c0_i32_61 = arith.constant 0 : i32
      %241 = arith.cmpi ne, %240, %c0_i32_61 : i32
      scf.if %241 {
        %c0_62 = arith.constant 0 : index
        %c0_63 = arith.constant 0 : index
        %242 = vector.load %arg15[%c0_62, %c0_63] : memref<16x128xf32, #tpu.memory_space<vmem>>, vector<16x128xf32>
        tpu.vector_store %arg15[%c0_62, %c0_63], %235 {strides = array<i32>} : memref<16x128xf32, #tpu.memory_space<vmem>>, vector<16x128xf32>,
      } else {
      }
    } else {
    }
    return
  }
  func.func @transform_0(%arg0: i32, %arg1: i32) -> (i32, i32) {
    %c0_i32 = arith.constant 0 : i32
    %c0_i32_0 = arith.constant 0 : i32
    %c0_i32_1 = arith.constant 0 : i32
    return %c0_i32, %c0_i32_0 : i32, i32
  }
  func.func @transform_1(%arg0: i32, %arg1: i32) -> (i32, i32) {
    %c0_i32 = arith.constant 0 : i32
    %c0_i32_0 = arith.constant 0 : i32
    %c0_i32_1 = arith.constant 0 : i32
    return %c0_i32, %c0_i32_0 : i32, i32
  }
  func.func @transform_2(%arg0: i32, %arg1: i32) -> (i32, i32) {
    %c0_i32 = arith.constant 0 : i32
    %c0_i32_0 = arith.constant 0 : i32
    %c0_i32_1 = arith.constant 0 : i32
    return %c0_i32, %c0_i32_0 : i32, i32
  }
  func.func @transform_3(%arg0: i32, %arg1: i32) -> (i32, i32) {
    %c2_i32 = arith.constant 2 : i32
    %0 = arith.muli %arg0, %c2_i32 : i32
    %1 = arith.addi %0, %arg1 : i32
    %c0_i32 = arith.constant 0 : i32
    %c0_i32_0 = arith.constant 0 : i32
    return %1, %c0_i32 : i32, i32
  }
  func.func @transform_4(%arg0: i32, %arg1: i32) -> (i32, i32) {
    %c2_i32 = arith.constant 2 : i32
    %0 = arith.muli %arg0, %c2_i32 : i32
    %1 = arith.addi %0, %arg1 : i32
    %c0_i32 = arith.constant 0 : i32
    %c0_i32_0 = arith.constant 0 : i32
    return %1, %c0_i32 : i32, i32
  }
  func.func @transform_5(%arg0: i32, %arg1: i32) -> (i32, i32) {
    %c2_i32 = arith.constant 2 : i32
    %0 = arith.muli %arg0, %c2_i32 : i32
    %1 = arith.addi %0, %arg1 : i32
    %c0_i32 = arith.constant 0 : i32
    %c0_i32_0 = arith.constant 0 : i32
    return %1, %c0_i32 : i32, i32
  }
  func.func @transform_6(%arg0: i32, %arg1: i32) -> (i32, i32) {
    %c0_i32 = arith.constant 0 : i32
    %c0_i32_0 = arith.constant 0 : i32
    %c0_i32_1 = arith.constant 0 : i32
    return %c0_i32, %c0_i32_0 : i32, i32
  }
  func.func @transform_7(%arg0: i32, %arg1: i32) -> (i32, i32) {
    %c0_i32 = arith.constant 0 : i32
    %c0_i32_0 = arith.constant 0 : i32
    %c0_i32_1 = arith.constant 0 : i32
    return %c0_i32, %c0_i32_0 : i32, i32
  }
  func.func @transform_8(%arg0: i32, %arg1: i32) -> (i32, i32) {
    %c0_i32 = arith.constant 0 : i32
    %c0_i32_0 = arith.constant 0 : i32
    %c0_i32_1 = arith.constant 0 : i32
    return %c0_i32, %c0_i32_0 : i32, i32
  }
  func.func @transform_9(%arg0: i32, %arg1: i32) -> (i32, i32) {
    %c0_i32 = arith.constant 0 : i32
    %c0_i32_0 = arith.constant 0 : i32
    %c0_i32_1 = arith.constant 0 : i32
    return %c0_i32, %c0_i32_0 : i32, i32
  }
  func.func @transform_10(%arg0: i32, %arg1: i32) -> (i32, i32) {
    %c0_i32 = arith.constant 0 : i32
    %c0_i32_0 = arith.constant 0 : i32
    %c0_i32_1 = arith.constant 0 : i32
    return %c0_i32, %c0_i32_0 : i32, i32
  }
  func.func @transform_11(%arg0: i32, %arg1: i32) -> (i32, i32) {
    %c0_i32 = arith.constant 0 : i32
    %c0_i32_0 = arith.constant 0 : i32
    %c0_i32_1 = arith.constant 0 : i32
    return %c0_i32, %c0_i32_0 : i32, i32
  }
  func.func @transform_12(%arg0: i32, %arg1: i32) -> (i32, i32) {
    %c0_i32 = arith.constant 0 : i32
    %c0_i32_0 = arith.constant 0 : i32
    %c0_i32_1 = arith.constant 0 : i32
    return %c0_i32, %c0_i32_0 : i32, i32
  }
  func.func @transform_13(%arg0: i32, %arg1: i32) -> (i32, i32) {
    %c0_i32 = arith.constant 0 : i32
    %c0_i32_0 = arith.constant 0 : i32
    return %arg0, %c0_i32 : i32, i32
  }
}

</mosaic_0001>

<bundles_post_ra>
// kernel: gnn_layer.1
= control target key start
LH: loop header
LB: loop body
LE: loop exit
PB: predicated region body
PF: predicated region fallthrough
CT: control target
= control target key end

     0   :  { %s5317_s25 = smov 0   ;;  %s5319_s26 = smov 0   ;;  %s7075_s0 = inlined_call_operand.vmem [shape: f32[16,128], index: 0, kind: input, shape index: {}]   ;;  %s7076_s1 = inlined_call_operand.vmem [shape: f32[1,128], index: 1, kind: input, shape index: {}]   ;;  %s7077_s2 = inlined_call_operand.vmem [shape: f32[1,128], index: 2, kind: input, shape index: {}]   ;;  %s7078_s3 = inlined_call_operand.vmem [shape: bf16[128,128], index: 3, kind: input, shape index: {}]   ;;  %s7079_s4 = inlined_call_operand.vmem [shape: s32[128,1], index: 4, kind: input, shape index: {}]   ;;  %s7080_s5 = inlined_call_operand.vmem [shape: s32[128,1], index: 5, kind: input, shape index: {}]   ;;  %s7081_s6 = inlined_call_operand.vmem [shape: f32[16,1], index: 6, kind: input, shape index: {}]   ;;  %s7082_s7 = inlined_call_operand.vmem [shape: bf16[128,128], index: 7, kind: input, shape index: {}]   ;;  %s7083_s8 = inlined_call_operand.vmem [shape: f32[1,128], index: 8, kind: input, shape index: {}]   ;;  %s7084_s9 = inlined_call_operand.vmem [shape: bf16[128,4096], index: 9, kind: input, shape index: {}]   ;;  %s7085_s10 = inlined_call_operand.vmem [shape: f32[128,128], index: 10, kind: input, shape index: {}]   ;;  %s7086_s11 = inlined_call_operand.vmem [shape: bf16[128,128], index: 11, kind: input, shape index: {}]   ;;  %s7087_s12 = inlined_call_operand.vmem [shape: f32[1,128], index: 12, kind: input, shape index: {}]   ;;  %s7088_s13 = inlined_call_operand.vmem [shape: f32[32,128], index: 13, kind: output, shape index: {}]  }
   0x1   :  { %7152 = sst [smem:[#allocation52_spill]] %s7087_s12  ;;  %s5321_s27 = smov 0  }
   0x2   :  { %s5323_s28 = smov 0   ;;  %s5325_s29 = smov 0  }
   0x3 LB: > { %7153 = sst [smem:[#allocation3_spill]] %s5199_s27  ;;  %s32_s30 = sadd.s32 1, %s5199_s27  ;;  %s5207_s29 = sphi %s5325_s29, %s23_s29   ;;  %s5203_s28 = sphi %s5323_s28, %s7285_s28   ;;  %s5199_s27 = sphi %s5321_s27, %s7284_s27   ;;  %s5195_s26 = sphi %s5319_s26, %s7283_s26   ;;  %s5191_s25 = sphi %s5317_s25, %s7282_s25  }
   0x4   : > { %7154 = sst [smem:[#allocation4_spill]] %s5203_s28  ;;  %s35_s14 = sadd.s32 1, %s5203_s28 }
   0x5   : > { %7155 = sst [smem:[#allocation5_spill]] %s5207_s29  ;;  %p33_p0 = scmp.ge.s32.totalorder %s32_s30, 2 }
   0x6   : > { %p4484_p1 = scmp.ge.s32.totalorder %s5207_s29, 1  ;;  %p446_p2 = scmp.lt.s32.totalorder %s5207_s29, 5 }
   0x7   : > { %s7287_s30 = smov (%p33_p0, %s32_s30), 0  ;;  %s7289_s14 = smov (!%p33_p0, %s35_s14), %s5203_s28 }
   0x8   : > { %7156 = sst [smem:[#allocation6_spill]] %s7287_s30  ;;  %p447_p3 = pnand %p4484_p1, %p446_p2 }
   0x9   : > { %p37_p4 = scmp.ge.s32.totalorder %s7289_s14, 2 }
   0xa   : > { %450 = sbr.rel (%p447_p3) target bundleno = 1980 (0x7bc), region = 72 }
   0xb   : > { %s7291_s14 = smov (%p37_p4, %s7289_s14), 0 }
   0xc   : > { %7157 = sst [smem:[#allocation7_spill]] %s7291_s14 }
   0xf   : > { %s4485_s15 = sshll.u32 %s5195_s26, 1  ;;  %p4496_p7 = scmp.ne.s32.totalorder %s5191_s25, 0 }
  0x10   : > { %s507_s16 = sadd.s32 %s5191_s25, %s4485_s15  ;;  %p537_p5 = scmp.lt.s32.totalorder %s4485_s15, 3 }
  0x11   : > { %s4486_s17 = sshll.u32 %s507_s16, 2 }
  0x12   : > { %p509_p6 = scmp.lt.s32.totalorder %s4486_s17, 15  ;;  %s7293_s15 = smov (!%p537_p5, %s4485_s15), 3 }
  0x13   : > { %s4495_s18 = sshll.u32 %s7293_s15, 3  ;;  %546 = sbr.rel (%p4496_p7) target bundleno = 537 (0x219), region = 76 }
  0x14   : > { %s7295_s17 = smov (!%p509_p6, %s4486_s17), 15  ;;  %s5371_s15 = scalar_lea.vmem %s7088_s13, %s4495_s18 }
  0x15   : > { %s4487_s19 = sshll.u32 %s7295_s17, 2  ;;  %s4490_s20 = sshll.u32 %s7295_s17, 3 }
  0x16   : > { %s5356_s23 = scalar_lea.vmem %s7078_s3, %s4487_s19  ;;  %s5361_s30 = scalar_lea.vmem %s7079_s4, %s4490_s20 }
  0x17   : > { %s5366_s16 = scalar_lea.vmem %s7080_s5, %s4490_s20 }
  0x18   : > { %v547_v0 = vld [vmem:[%s7075_s0] sm:$0xff]  ;;  %v548_v1 = vld [vmem:[%s7075_s0 + $0x8] sm:$0xff]  ;;  %v615_v2 = vld [vmem:[%s7085_s10 + $0x78] sm:$0xff]  ;;  %v549_v3 = vlaneseq  ;;  %v5209_v50 = vmov 0.0  }
  0x19   : > { %552 = vadd.xlane.f32.xlu0 %v547_v0  ;;  %4853 = vmatprep.subr.mxu0 %v615_v2  ;;  %v614_v15 = vld [vmem:[%s7085_s10 + $0x70] sm:$0xff]  ;;  %v613_v16 = vld [vmem:[%s7085_s10 + $0x68] sm:$0xff]  ;;  %v612_v17 = vld [vmem:[%s7085_s10 + $0x60] sm:$0xff]  ;;  %711 = vst [vmem:[%s5371_s15] sm:$0xff] %v5209_v50 }
  0x1a   : > { %4854 = vmatpush3.msra.mxu0 %v615_v2  ;;  %v550_v4 = vand.u32 127, %v549_v3  ;;  %v611_v18 = vld [vmem:[%s7085_s10 + $0x58] sm:$0xff]  ;;  %v610_v19 = vld [vmem:[%s7085_s10 + $0x50] sm:$0xff]  ;;  %v609_v20 = vld [vmem:[%s7085_s10 + $0x48] sm:$0xff]  ;;  %712 = vst [vmem:[%s5371_s15 + $0x8] sm:$0xff] %v5209_v50 }
  0x1b   : > { %4855 = vmatprep.subr.mxu0 %v614_v15  ;;  %v608_v21 = vld [vmem:[%s7085_s10 + $0x40] sm:$0xff]  ;;  %v607_v22 = vld [vmem:[%s7085_s10 + $0x38] sm:$0xff]  ;;  %v606_v23 = vld [vmem:[%s7085_s10 + $0x30] sm:$0xff] }
  0x1c   : > { %vm551_vm0 = vcmp.lt.s32.totalorder %v550_v4, 32  ;;  %4856 = vmatpush3.msra.mxu0 %v614_v15  ;;  %v605_v24 = vld [vmem:[%s7085_s10 + $0x28] sm:$0xff]  ;;  %v604_v25 = vld [vmem:[%s7085_s10 + $0x20] sm:$0xff]  ;;  %v603_v26 = vld [vmem:[%s7085_s10 + $0x18] sm:$0xff] }
  0x1d   : > { %554 = vadd.xlane.f32.xlu0 %v548_v1  ;;  %4857 = vmatprep.subr.mxu0 %v613_v16  ;;  %v602_v27 = vld [vmem:[%s7085_s10 + $0x10] sm:$0xff]  ;;  %v601_v28 = vld [vmem:[%s7085_s10 + $0x8] sm:$0xff]  ;;  %v600_v29 = vld [vmem:[%s7085_s10] sm:$0xff] }
  0x1e   : > { %4858 = vmatpush3.msra.mxu0 %v613_v16  ;;  %v4497_v37 = vld [vmem:[%s7076_s1] ss:$0 sm:$0xff] }
  0x1f   : > { %4859 = vmatprep.subr.mxu0 %v612_v17  ;;  %v4498_v39 = vld [vmem:[%s7077_s2] ss:$0 sm:$0xff] }
  0x20   : > { %4860 = vmatpush3.msra.mxu0 %v612_v17 }
  0x21   : > { %4861 = vmatprep.subr.mxu0 %v611_v18 }
  0x22   : > { %4862 = vmatpush3.msra.mxu0 %v611_v18 }
  0x23   : > { %4863 = vmatprep.subr.mxu0 %v610_v19 }
  0x24   : > { %4864 = vmatpush3.msra.mxu0 %v610_v19 }
  0x25   : > { %4865 = vmatprep.subr.mxu0 %v609_v20 }
  0x26   : > { %4866 = vmatpush3.msra.mxu0 %v609_v20 }
  0x27   : > { %4867 = vmatprep.subr.mxu0 %v608_v21 }
  0x28   : > { %4868 = vmatpush3.msra.mxu0 %v608_v21 }
  0x29   : > { %4869 = vmatprep.subr.mxu0 %v607_v22 }
  0x2a   : > { %4870 = vmatpush3.msra.mxu0 %v607_v22 }
  0x2b   : > { %4871 = vmatprep.subr.mxu0 %v606_v23 }
  0x2c   : > { %4872 = vmatpush3.msra.mxu0 %v606_v23 }
  0x2d   : > { %4873 = vmatprep.subr.mxu0 %v605_v24 }
  0x2e   : > { %4874 = vmatpush3.msra.mxu0 %v605_v24 }
  0x2f   : > { %4875 = vmatprep.subr.mxu0 %v604_v25 }
  0x30   : > { %4876 = vmatpush3.msra.mxu0 %v604_v25 }
  0x31   : > { %4877 = vmatprep.subr.mxu0 %v603_v26 }
  0x32   : > { %4878 = vmatpush3.msra.mxu0 %v603_v26 }
  0x33   : > { %4879 = vmatprep.subr.mxu0 %v602_v27 }
  0x34   : > { %4880 = vmatpush3.msra.mxu0 %v602_v27 }
  0x35   : > { %4881 = vmatprep.subr.mxu0 %v601_v28 }
  0x36   : > { %4882 = vmatpush3.msra.mxu0 %v601_v28 }
  0x37   : > { %4883 = vmatprep.subr.mxu0 %v600_v29 }
  0x38   : > { %4884 = vmatpush3.msra.mxu0 %v600_v29 }
  0xa2   : > { %v553_v5 = vpop.xlane.xlu0 %552 }
  0xa3   : > { %v556_v6 = vmul.f32 0.03125, %v553_v5 }
  0xa5   : > { %v558_v7 = vsub.f32 %v547_v0, %v556_v6 }
  0xa6   : > { %v555_v8 = vpop.xlane.xlu0 %554 }
  0xa7   : > { %v557_v9 = vmul.f32 0.03125, %v555_v8  ;;  %v560_v10 = vsel %vm551_vm0, %v558_v7, 0.0 }
  0xa8   : > { %v562_v11 = vmul.f32 %v560_v10, %v560_v10 }
  0xa9   : > { %v559_v12 = vsub.f32 %v548_v1, %v557_v9 }
  0xaa   : > { %564 = vadd.xlane.f32.xlu1 %v562_v11 }
  0xab   : > { %v5383_v13 = vsel %vm551_vm0, %v559_v12, 0.0 }
  0xac   : > { %v563_v14 = vmul.f32 %v5383_v13, %v5383_v13 }
  0xae   : > { %566 = vadd.xlane.f32.xlu1 %v563_v14 }
 0x133   : > { %v565_v30 = vpop.xlane.xlu1 %564 }
 0x134   : > { %v568_v31 = vmul.f32 0.03125, %v565_v30 }
 0x136   : > { %v570_v32 = vadd.f32 1e-05, %v568_v31 }
 0x137   : > { %v567_v33 = vpop.xlane.xlu1 %566 }
 0x138   : > { %5014 = vrsqrt.f32 %v570_v32  ;;  %v569_v34 = vmul.f32 0.03125, %v567_v33 }
 0x13a   : > { %v571_v35 = vadd.f32 1e-05, %v569_v34 }
 0x13c   : > { %5016 = vrsqrt.f32 %v571_v35 }
 0x145   : > { %v5015_v36 = vpop.eup %5014 }
 0x146   : > { %v574_v38 = vmul.f32 %v5015_v36, %v560_v10 }
 0x148   : > { %v583_v40 = vmul.f32 %v4497_v37, %v574_v38 }
 0x149   : > { %v5017_v41 = vpop.eup %5016 }
 0x14a   : > { %v592_v42 = vadd.f32 %v4498_v39, %v583_v40  ;;  %v575_v43 = vmul.f32 %v5017_v41, %v5383_v13 }
 0x14c   : > { %vm594_vm1 = vcmp.ge.f32.partialorder %v592_v42, 0.0  ;;  %v596_v44 = vmul.f32 0.01, %v592_v42  ;;  %v584_v45 = vmul.f32 %v4497_v37, %v575_v43 }
 0x14e   : > { %v598_v46 = vsel %vm594_vm1, %v592_v42, %v596_v44  ;;  %v593_v47 = vadd.f32 %v4498_v39, %v584_v45 }
 0x14f   : > { %4885 = vmatprep.mubr.f32.mxu0 %v598_v46 }
 0x150   : > { %vm595_vm2 = vcmp.ge.f32.partialorder %v593_v47, 0.0  ;;  %v597_v48 = vmul.f32 0.01, %v593_v47 }
 0x152   : > { %v599_v49 = vsel %vm595_vm2, %v593_v47, %v597_v48 }
 0x153   : > { %4886 = vmatmul.mubr.f32.vlgmr.msra.gmra.mxu0 %v599_v49 }
 0x213   : > { %v4887_v51 = vpop.f32.mrf.mxu0 }
 0x214   : > { %v4810_v52 = vpack.c.bf16 %v4887_v51, %v599_v49 }
 0x215   : > { %v682_v53 = vpop.f32.mrf.mxu0 }
 0x216   : > { %4812 = vst [vmem:[#allocation2 + $0x8] sm:$0xff] %v4810_v52   ;;  %v4805_v54 = vpack.c.bf16 %v682_v53, %v598_v46 }
 0x218   : > { %4806 = vst [vmem:[#allocation2] sm:$0xff] %v4805_v54  }
 0x219 PF: > { %v865_v55 = vld [vmem:[%s5361_s30] sm:$0xff]  ;;  %v7134_v56 = vmov 0   ;;  %v5146_v57 = vld [vmem:[%s7082_s7 + $0x38] sm:$0xff]   ;;  %v5147_v58 = vld [vmem:[%s7082_s7 + $0x30] sm:$0xff]   ;;  %vm907_vm5 = vcmask 130048   ;;  %vm5243_vm0 = vmmov 0  }
 0x21a   : > { %5018 = vset.pattern.permute.xlu0 %v7134_v56  ;;  %5019 = vset.pattern.permute.xlu1 %v7134_v56  ;;  %v866_v59 = vld [vmem:[%s5361_s30 + $0x8] sm:$0xff]  ;;  %v5149_v61 = vld [vmem:[%s7082_s7 + $0x20] sm:$0xff]   ;;  %v867_v63 = vld [vmem:[%s5361_s30 + $0x10] sm:$0xff]  ;;  %vm4173_vm1 = vcmask 261120   ;;  %p4783_p8 = scmp.ne.s32.totalorder %s5191_s25, 1 }
 0x21b   : > { %870 = vperm.xlu0 %5018, %v865_v55   ;;  %946 = vmatprep.mubr.bf16.mxu1 %v7134_v56  ;;  %v5148_v60 = vld [vmem:[%s7082_s7 + $0x28] sm:$0xff]   ;;  %v5154_v62 = vld [vmem:[%s5356_s23] sm:$0xff]   ;;  %v868_v0 = vld [vmem:[%s5361_s30 + $0x18] sm:$0xff]  ;;  %v863_v55 = vlaneseq  ;;  %p4784_p9 = scmp.ne.s32.totalorder (!%p4783_p8), %s5195_s26, 0 }
 0x21c   : > { %4888 = vmatprep.subr.bf16.mxu0 %v5146_v57  ;;  %4904 = vmatprep.mubr.bf16.mxu0 %v5154_v62  ;;  %v5150_v3 = vld [vmem:[%s7082_s7 + $0x18] sm:$0xff]   ;;  %v5467_v4 = vld [vmem:[%s7084_s9 + $0x700] sm:$0xff]  ;;  %v5151_v9 = vld [vmem:[%s7082_s7 + $0x10] sm:$0xff]   ;;  %v7126_v62 = vmov 0.0  }
 0x21d   : > { %4889 = vmatpush3.bf16.msra.mxu0 %v5146_v57  ;;  %876 = vperm.xlu1 %5019, %v867_v63   ;;  %v5472_v5 = vld [vmem:[%s7084_s9 + $0x780] sm:$0xff]  ;;  %v4124_v10 = vld [vmem:[%s5366_s16 + $0x8] sm:$0xff]  ;;  %v4125_v12 = vld [vmem:[%s5366_s16 + $0x10] sm:$0xff]  ;;  %v5567_v57 = vand.u32 127, %v863_v55 }
 0x21e   : > { %4890 = vmatprep.subr.bf16.mxu0 %v5147_v58  ;;  %v4536_v6 = vcombine.low %v5467_v4, %v5472_v5  ;;  %v4537_v7 = vcombine.high %v5467_v4, %v5472_v5  ;;  %v4123_v8 = vld [vmem:[%s5366_s16] sm:$0xff]  ;;  %v5152_v11 = vld [vmem:[%s7082_s7 + $0x8] sm:$0xff]   ;;  %v4126_v16 = vld [vmem:[%s5366_s16 + $0x18] sm:$0xff] }
 0x21f   : > { %873 = vperm.xlu0 %5018, %v866_v59   ;;  %v5156_v1 = vld [vmem:[#allocation2 + $0x4] ss:$8 sps:$4 sm:$0xff]   ;;  %v5158_v2 = vld [vmem:[#allocation2] ss:$8 sps:$4 sm:$0xff]   ;;  %v5544_v48 = vld [vmem:[%s7084_s9 + $0x710] sm:$0xff] }
 0x220   : > { %928 = vmatprep.subr.bf16.mxu1 %v5156_v1  ;;  %v5153_v13 = vld [vmem:[%s7082_s7] sm:$0xff]   ;;  %v1182_v14 = vld [vmem:[%s7084_s9 + $0x708] sm:$0xff]  ;;  %v5549_v49 = vld [vmem:[%s7084_s9 + $0x790] sm:$0xff] }
 0x221   : > { %4891 = vmatpush3.bf16.msra.mxu0 %v5147_v58  ;;  %879 = vperm.xlu1 %5019, %v868_v0   ;;  %v1183_v15 = vld [vmem:[%s7084_s9 + $0x788] sm:$0xff]  ;;  %v5554_v50 = vld [vmem:[%s7084_s9 + $0x718] sm:$0xff]  ;;  %v4568_v52 = vcombine.low %v5544_v48, %v5549_v49 }
 0x222   : > { %4892 = vmatprep.subr.bf16.mxu0 %v5148_v60  ;;  %929 = vmatpush1.bf16.msra.mxu1 %v5158_v2  ;;  %v4553_v17 = vcombine.high %v1182_v14, %v1183_v15  ;;  %v1180_v18 = vld [vmem:[%s7084_s9 + $0x608] sm:$0xff]  ;;  %v4552_v21 = vcombine.low %v1182_v14, %v1183_v15  ;;  %v5559_v51 = vld [vmem:[%s7084_s9 + $0x798] sm:$0xff]  ;;  %v973_v15 = vld [vmem:[%s7084_s9 + $0x300] sm:$0xff] }
 0x223   : > { %1063 = vmatprep.subr.bf16.mxu1 %v4537_v7  ;;  %v1181_v19 = vld [vmem:[%s7084_s9 + $0x688] sm:$0xff]  ;;  %v4584_v53 = vcombine.low %v5554_v50, %v5559_v51  ;;  %v4585_v54 = vcombine.high %v5554_v50, %v5559_v51  ;;  %v978_v7 = vld [vmem:[%s7084_s9 + $0x580] sm:$0xff] }
 0x224   : > { %v5155_v20 = vld [vmem:[%s5356_s23 + $0x8] sm:$0xff]   ;;  %v4551_v22 = vcombine.high %v1180_v18, %v1181_v19  ;;  %v4550_v25 = vcombine.low %v1180_v18, %v1181_v19 }
 0x225   : > { %4893 = vmatpush3.bf16.msra.mxu0 %v5148_v60  ;;  %4128 = vperm.xlu1 %5019, %v4123_v8   ;;  %v1178_v23 = vld [vmem:[%s7084_s9 + $0x508] sm:$0xff]  ;;  %v979_v60 = vld [vmem:[%s7084_s9 + $0x600] sm:$0xff] }
 0x226   : > { %4894 = vmatprep.subr.bf16.mxu0 %v5149_v61  ;;  %v1179_v24 = vld [vmem:[%s7084_s9 + $0x588] sm:$0xff] }
 0x227   : > { %v4549_v26 = vcombine.high %v1178_v23, %v1179_v24  ;;  %v1176_v27 = vld [vmem:[%s7084_s9 + $0x408] sm:$0xff]  ;;  %v4548_v29 = vcombine.low %v1178_v23, %v1179_v24  ;;  %v969_v24 = vld [vmem:[%s7084_s9 + $0x100] sm:$0xff] }
 0x228   : > { %v1177_v28 = vld [vmem:[%s7084_s9 + $0x488] sm:$0xff] }
 0x229   : > { %4895 = vmatpush3.bf16.msra.mxu0 %v5149_v61  ;;  %4131 = vperm.xlu1 %5019, %v4124_v10   ;;  %v4547_v30 = vcombine.high %v1176_v27, %v1177_v28  ;;  %v1174_v31 = vld [vmem:[%s7084_s9 + $0x308] sm:$0xff]  ;;  %v4546_v33 = vcombine.low %v1176_v27, %v1177_v28  ;;  %v980_v61 = vld [vmem:[%s7084_s9 + $0x680] sm:$0xff] }
 0x22a   : > { %4896 = vmatprep.subr.bf16.mxu0 %v5150_v3  ;;  %v1175_v32 = vld [vmem:[%s7084_s9 + $0x388] sm:$0xff]  ;;  %v4535_v2 = vcombine.high %v979_v60, %v980_v61  ;;  %v967_v28 = vld [vmem:[%s7084_s9] sm:$0xff] }
 0x22b   : > { %v4545_v34 = vcombine.high %v1174_v31, %v1175_v32  ;;  %v4544_v35 = vcombine.low %v1174_v31, %v1175_v32  ;;  %v1172_v36 = vld [vmem:[%s7084_s9 + $0x208] sm:$0xff] }
 0x22c   : > { %v1173_v37 = vld [vmem:[%s7084_s9 + $0x288] sm:$0xff] }
 0x22d   : > { %4897 = vmatpush3.bf16.msra.mxu0 %v5150_v3  ;;  %4134 = vperm.xlu1 %5019, %v4125_v12   ;;  %v4542_v38 = vcombine.low %v1172_v36, %v1173_v37  ;;  %v4543_v39 = vcombine.high %v1172_v36, %v1173_v37  ;;  %v1170_v40 = vld [vmem:[%s7084_s9 + $0x108] sm:$0xff]  ;;  %v977_v3 = vld [vmem:[%s7084_s9 + $0x500] sm:$0xff] }
 0x22e   : > { %4898 = vmatprep.subr.bf16.mxu0 %v5151_v9  ;;  %v1171_v41 = vld [vmem:[%s7084_s9 + $0x188] sm:$0xff]  ;;  %v4533_v10 = vcombine.high %v977_v3, %v978_v7  ;;  %v976_v12 = vld [vmem:[%s7084_s9 + $0x480] sm:$0xff]  ;;  %v4532_v4 = vcombine.low %v977_v3, %v978_v7  ;;  %v1574_v3 = vld [vmem:[%s7084_s9 + $0x618] sm:$0xff] }
 0x22f   : > { %v4540_v42 = vcombine.low %v1170_v40, %v1171_v41  ;;  %v4541_v43 = vcombine.high %v1170_v40, %v1171_v41  ;;  %v1168_v44 = vld [vmem:[%s7084_s9 + $0x8] sm:$0xff]  ;;  %v1575_v7 = vld [vmem:[%s7084_s9 + $0x698] sm:$0xff] }
 0x230   : > { %v1169_v45 = vld [vmem:[%s7084_s9 + $0x88] sm:$0xff] }
 0x231   : > { %4899 = vmatpush3.bf16.msra.mxu0 %v5151_v9  ;;  %4137 = vperm.xlu1 %5019, %v4126_v16   ;;  %v4538_v46 = vcombine.low %v1168_v44, %v1169_v45  ;;  %v4539_v47 = vcombine.high %v1168_v44, %v1169_v45  ;;  %v4534_v9 = vcombine.low %v979_v60, %v980_v61  ;;  %v974_v16 = vld [vmem:[%s7084_s9 + $0x380] sm:$0xff]  ;;  %v7116_v44 = vmov 2  }
 0x232   : > { %4900 = vmatprep.subr.bf16.mxu0 %v5152_v11  ;;  %v4529_v19 = vcombine.high %v973_v15, %v974_v16 }
 0x235   : > { %4901 = vmatpush3.bf16.msra.mxu0 %v5152_v11  ;;  %v975_v11 = vld [vmem:[%s7084_s9 + $0x400] sm:$0xff]  ;;  %5021 = vset.pattern.permute.xlu1 %v7116_v44 }
 0x236   : > { %4902 = vmatprep.subr.bf16.mxu0 %v5153_v13  ;;  %v4531_v5 = vcombine.high %v975_v11, %v976_v12  ;;  %v4530_v18 = vcombine.low %v975_v11, %v976_v12 }
 0x239   : > { %4903 = vmatpush3.bf16.msra.mxu0 %v5153_v13 }
 0x23a   : > { %1264 = vmatprep.subr.bf16.mxu0 %v4553_v17 }
 0x23c   : > { %4905 = vmatmul.mubr.bf16.vlgmr.msra.gmra.mxu0 %v5155_v20  ;;  %v971_v20 = vld [vmem:[%s7084_s9 + $0x200] sm:$0xff] }
 0x23d   : > { %1265 = vmatpush1.bf16.msra.mxu0 %v4552_v21  ;;  %1296 = vmatprep.mubr.bf16.mxu0 %v7134_v56  ;;  %v972_v21 = vld [vmem:[%s7084_s9 + $0x280] sm:$0xff] }
 0x23e   : > { %1266 = vmatprep.subr.bf16.mxu0 %v4551_v22  ;;  %v4528_v22 = vcombine.low %v973_v15, %v974_v16  ;;  %v4527_v23 = vcombine.high %v971_v20, %v972_v21 }
 0x241   : > { %1267 = vmatpush1.bf16.msra.mxu0 %v4550_v25  ;;  %v970_v25 = vld [vmem:[%s7084_s9 + $0x180] sm:$0xff] }
 0x242   : > { %1268 = vmatprep.subr.bf16.mxu0 %v4549_v26  ;;  %v4526_v26 = vcombine.low %v971_v20, %v972_v21  ;;  %v4525_v27 = vcombine.high %v969_v24, %v970_v25  ;;  %v1373_v21 = vld [vmem:[%s7084_s9 + $0x410] sm:$0xff] }
 0x245   : > { %1269 = vmatpush1.bf16.msra.mxu0 %v4548_v29  ;;  %v968_v29 = vld [vmem:[%s7084_s9 + $0x80] sm:$0xff] }
 0x246   : > { %1270 = vmatprep.subr.bf16.mxu0 %v4547_v30  ;;  %v4524_v30 = vcombine.low %v969_v24, %v970_v25  ;;  %v4523_v31 = vcombine.high %v967_v28, %v968_v29  ;;  %v1371_v24 = vld [vmem:[%s7084_s9 + $0x310] sm:$0xff] }
 0x247   : > { %v1372_v25 = vld [vmem:[%s7084_s9 + $0x390] sm:$0xff] }
 0x249   : > { %1271 = vmatpush1.bf16.msra.mxu0 %v4546_v33  ;;  %v4522_v33 = vcombine.low %v967_v28, %v968_v29 }
 0x24a   : > { %1272 = vmatprep.subr.bf16.mxu0 %v4545_v34  ;;  %v4569_v34 = vcombine.high %v5544_v48, %v5549_v49  ;;  %v1570_v48 = vld [vmem:[%s7084_s9 + $0x418] sm:$0xff] }
 0x24b   : > { %v1571_v49 = vld [vmem:[%s7084_s9 + $0x498] sm:$0xff] }
 0x24c   : > { %v4578_v29 = vcombine.low %v1570_v48, %v1571_v49 }
 0x24d   : > { %1273 = vmatpush1.bf16.msra.mxu0 %v4544_v35 }
 0x24e   : > { %1274 = vmatprep.subr.bf16.mxu0 %v4543_v39 }
 0x251   : > { %1275 = vmatpush1.bf16.msra.mxu0 %v4542_v38 }
 0x252   : > { %1276 = vmatprep.subr.bf16.mxu0 %v4541_v43 }
 0x255   : > { %1277 = vmatpush1.bf16.msra.mxu0 %v4540_v42 }
 0x256   : > { %1278 = vmatprep.subr.bf16.mxu0 %v4539_v47 }
 0x259   : > { %1279 = vmatpush1.bf16.msra.mxu0 %v4538_v46  ;;  %v4503_v46 = vld [vmem:[%s7083_s8] ss:$0 sm:$0xff] }
 0x25a   : > { %1658 = vmatprep.subr.bf16.mxu0 %v4585_v54 }
 0x296   : > { %v871_v58 = vpop.permute.xlu0 %870 }
 0x297   : > { %vm881_vm3 = vcmp.eq.s32.totalorder %v5567_v57, %v871_v58 }
 0x298   : > { %v4514_v63 = vsel %vm881_vm3, 1.0, %v7126_v62  ;;  %v877_v8 = vpop.permute.xlu1 %876 }
 0x299   : > { %vm883_vm6 = vcmp.eq.s32.totalorder %v5567_v57, %v877_v8 }
 0x29a   : > { %v874_v59 = vpop.permute.xlu0 %873  ;;  %v4516_v13 = vsel %vm883_vm6, 1.0, %v7126_v62 }
 0x29b   : > { %vm882_vm4 = vcmp.eq.s32.totalorder %v5567_v57, %v874_v59 }
 0x29c   : > { %v4515_v0 = vsel %vm882_vm4, 1.0, %v7126_v62  ;;  %v880_v14 = vpop.permute.xlu1 %879 }
 0x29d   : > { %v893_v1 = vpack.c.bf16 %v4515_v0, %v4514_v63  ;;  %vm884_vm7 = vcmp.eq.s32.totalorder %v5567_v57, %v880_v14  ;;  %v1377_v63 = vld [vmem:[%s7084_s9 + $0x610] sm:$0xff] }
 0x29e   : > { %v1378_v0 = vld [vmem:[%s7084_s9 + $0x690] sm:$0xff] }
 0x29f   : > { %4520 = vmatmul.mubr.msk.bf16.vlgmr.msra.gmra.mxu1 %vm907_vm5, %v893_v1  ;;  %v4567_v11 = vcombine.high %v1377_v63, %v1378_v0  ;;  %v1375_v14 = vld [vmem:[%s7084_s9 + $0x510] sm:$0xff]  ;;  %v4566_v15 = vcombine.low %v1377_v63, %v1378_v0 }
 0x2a0   : > { %1064 = vmatpush1.bf16.msra.mxu1 %v4536_v6  ;;  %956 = vmatprep.mubr.bf16.mxu1 %v7134_v56  ;;  %v4517_v6 = vsel %vm884_vm7, 1.0, %v7126_v62  ;;  %v4129_v32 = vpop.permute.xlu1 %4128  ;;  %v1365_v63 = vld [vmem:[%s7084_s9 + $0x10] sm:$0xff] }
 0x2a1   : > { %1065 = vmatprep.subr.bf16.mxu1 %v4535_v2  ;;  %v894_v17 = vpack.c.bf16 %v4517_v6, %v4516_v13  ;;  %vm4139_vm8 = vcmp.eq.s32.totalorder %v5567_v57, %v4129_v32  ;;  %v4583_v13 = vcombine.high %v1574_v3, %v1575_v7  ;;  %v1573_v6 = vld [vmem:[%s7084_s9 + $0x598] sm:$0xff]  ;;  %v1369_v32 = vld [vmem:[%s7084_s9 + $0x210] sm:$0xff] }
 0x2a2   : > { %v5630_v35 = vsel %vm4139_vm8, 1.0, %v7126_v62  ;;  %v1366_v0 = vld [vmem:[%s7084_s9 + $0x90] sm:$0xff] }
 0x2a4   : > { %1066 = vmatpush1.bf16.msra.mxu1 %v4534_v9  ;;  %v4132_v36 = vpop.permute.xlu1 %4131 }
 0x2a5   : > { %1067 = vmatprep.subr.bf16.mxu1 %v4533_v10  ;;  %vm4140_vm9 = vcmp.eq.s32.totalorder %v5567_v57, %v4132_v36  ;;  %v1567_v36 = vld [vmem:[%s7084_s9 + $0x298] sm:$0xff] }
 0x2a6   : > { %v5634_v37 = vsel %vm4140_vm9, 1.0, %v7126_v62 }
 0x2a7   : > { %4521 = vmatmul.mubr.msk.bf16.gmra.mxu1 %vm907_vm5, %v894_v17 }
 0x2a8   : > { %1068 = vmatpush1.bf16.msra.mxu1 %v4532_v4  ;;  %1095 = vmatprep.mubr.bf16.mxu1 %v7134_v56  ;;  %v4135_v39 = vpop.permute.xlu1 %4134  ;;  %v1376_v4 = vld [vmem:[%s7084_s9 + $0x590] sm:$0xff] }
 0x2a9   : > { %1069 = vmatprep.subr.bf16.mxu1 %v4531_v5  ;;  %vm4141_vm10 = vcmp.eq.s32.totalorder %v5567_v57, %v4135_v39  ;;  %v1572_v5 = vld [vmem:[%s7084_s9 + $0x518] sm:$0xff]  ;;  %v4564_v51 = vcombine.low %v1375_v14, %v1376_v4  ;;  %v4560_v39 = vcombine.low %v1371_v24, %v1372_v25 }
 0x2aa   : > { %v5640_v40 = vsel %vm4141_vm10, 1.0, %v7126_v62  ;;  %v4581_v20 = vcombine.high %v1572_v5, %v1573_v6 }
 0x2ac   : > { %1070 = vmatpush1.bf16.msra.mxu1 %v4530_v18  ;;  %v4138_v41 = vpop.permute.xlu1 %4137  ;;  %v4582_v18 = vcombine.low %v1574_v3, %v1575_v7 }
 0x2ad   : > { %1071 = vmatprep.subr.bf16.mxu1 %v4529_v19  ;;  %vm4142_vm11 = vcmp.eq.s32.totalorder %v5567_v57, %v4138_v41  ;;  %v4565_v19 = vcombine.high %v1375_v14, %v1376_v4  ;;  %v1971_v14 = vld [vmem:[%s7084_s9 + $0x7a8] sm:$0xff]  ;;  %v4554_v4 = vcombine.low %v1365_v63, %v1366_v0 }
 0x2ae   : > { %v5644_v42 = vsel %vm4142_vm11, 1.0, %v7126_v62 }
 0x2b0   : > { %1072 = vmatpush1.bf16.msra.mxu1 %v4528_v22  ;;  %v1374_v22 = vld [vmem:[%s7084_s9 + $0x490] sm:$0xff] }
 0x2b1   : > { %1073 = vmatprep.subr.bf16.mxu1 %v4527_v23  ;;  %v4579_v23 = vcombine.high %v1570_v48, %v1571_v49  ;;  %v4562_v28 = vcombine.low %v1373_v21, %v1374_v22  ;;  %v1769_v49 = vld [vmem:[%s7084_s9 + $0x520] sm:$0xff] }
 0x2b4   : > { %1074 = vmatpush1.bf16.msra.mxu1 %v4526_v26  ;;  %v1568_v26 = vld [vmem:[%s7084_s9 + $0x318] sm:$0xff] }
 0x2b5   : > { %1075 = vmatprep.subr.bf16.mxu1 %v4525_v27  ;;  %v1569_v27 = vld [vmem:[%s7084_s9 + $0x398] sm:$0xff] }
 0x2b6   : > { %v4576_v41 = vcombine.low %v1568_v26, %v1569_v27 }
 0x2b8   : > { %1076 = vmatpush1.bf16.msra.mxu1 %v4524_v30  ;;  %v4561_v30 = vcombine.high %v1371_v24, %v1372_v25 }
 0x2b9   : > { %1077 = vmatprep.subr.bf16.mxu1 %v4523_v31  ;;  %v4577_v31 = vcombine.high %v1568_v26, %v1569_v27  ;;  %v1767_v27 = vld [vmem:[%s7084_s9 + $0x420] sm:$0xff] }
 0x2bc   : > { %1078 = vmatpush1.bf16.msra.mxu1 %v4522_v33  ;;  %v1370_v33 = vld [vmem:[%s7084_s9 + $0x290] sm:$0xff] }
 0x2bd   : > { %1461 = vmatprep.subr.bf16.mxu1 %v4569_v34  ;;  %v1566_v34 = vld [vmem:[%s7084_s9 + $0x218] sm:$0xff] }
 0x2fc   : > { %v4906_v45 = vpop.f32.mrf.mxu0 }
 0x2fd   : > { %v843_v59 = vadd.f32 %v4906_v45, %v4503_v46  ;;  %v4559_v45 = vcombine.high %v1369_v32, %v1370_v33 }
 0x2fe   : > { %v834_v47 = vpop.f32.mrf.mxu0 }
 0x2ff   : > { %v835_v54 = vadd.f32 %v4503_v46, %v834_v47  ;;  %v855_v8 = vmul.f32 0.01, %v843_v59  ;;  %vm851_vm14 = vcmp.ge.f32.partialorder %v843_v59, 0.0  ;;  %v1367_v47 = vld [vmem:[%s7084_s9 + $0x110] sm:$0xff] }
 0x300   : > { %v4907_v55 = vpop.f32.mrf.mxu0 }
 0x301   : > { %v853_v58 = vmul.f32 0.01, %v835_v54  ;;  %vm849_vm12 = vcmp.ge.f32.partialorder %v835_v54, 0.0  ;;  %v846_v60 = vadd.f32 %v4907_v55, %v4503_v46  ;;  %v859_v16 = vsel %vm851_vm14, %v843_v59, %v855_v8  ;;  %v1564_v55 = vld [vmem:[%s7084_s9 + $0x118] sm:$0xff] }
 0x302   : > { %v837_v57 = vpop.f32.mrf.mxu0  ;;  %v4574_v59 = vcombine.low %v1566_v34, %v1567_v36  ;;  %v4555_v8 = vcombine.high %v1365_v63, %v1366_v0 }
 0x303   : > { %v838_v61 = vadd.f32 %v4503_v46, %v837_v57  ;;  %v857_v1 = vsel %vm849_vm12, %v835_v54, %v853_v58  ;;  %v856_v9 = vmul.f32 0.01, %v846_v60  ;;  %vm852_vm15 = vcmp.ge.f32.partialorder %v846_v60, 0.0  ;;  %v1368_v54 = vld [vmem:[%s7084_s9 + $0x190] sm:$0xff]  ;;  %v1565_v58 = vld [vmem:[%s7084_s9 + $0x198] sm:$0xff] }
 0x304   : > { %v4575_v46 = vcombine.high %v1566_v34, %v1567_v36  ;;  %v4558_v57 = vcombine.low %v1369_v32, %v1370_v33  ;;  %v4556_v3 = vcombine.low %v1367_v47, %v1368_v54  ;;  %v4572_v7 = vcombine.low %v1564_v55, %v1565_v58  ;;  %v1765_v36 = vld [vmem:[%s7084_s9 + $0x320] sm:$0xff] }
 0x305   : > { %vm850_vm13 = vcmp.ge.f32.partialorder %v838_v61, 0.0  ;;  %v854_v2 = vmul.f32 0.01, %v838_v61  ;;  %v860_v17 = vsel %vm852_vm15, %v846_v60, %v856_v9  ;;  %v4557_v60 = vcombine.high %v1367_v47, %v1368_v54 }
 0x306   : > { %v5700_v50 = vpack.c.bf16 %v860_v17, %v859_v16  ;;  %v1771_v16 = vld [vmem:[%s7084_s9 + $0x620] sm:$0xff] }
 0x307   : > { %v858_v10 = vsel %vm850_vm13, %v838_v61, %v854_v2  ;;  %v4573_v61 = vcombine.high %v1564_v55, %v1565_v58  ;;  %v1563_v2 = vld [vmem:[%s7084_s9 + $0x98] sm:$0xff]  ;;  %v1772_v17 = vld [vmem:[%s7084_s9 + $0x6a0] sm:$0xff] }
 0x308   : > { %v5664_v12 = vpack.c.bf16 %v858_v10, %v857_v1  ;;  %v1562_v1 = vld [vmem:[%s7084_s9 + $0x18] sm:$0xff]  ;;  %v1773_v10 = vld [vmem:[%s7084_s9 + $0x720] sm:$0xff] }
 0x309   : > { %v4571_v9 = vcombine.high %v1562_v1, %v1563_v2  ;;  %v1763_v58 = vld [vmem:[%s7084_s9 + $0x220] sm:$0xff] }
 0x30a   : > { %1096 = vmatmul.mubr.bf16.vlgmr.msra.gmra.mxu1 %v5664_v12  ;;  %1297 = vmatmul.mubr.bf16.vlgmr.msra.gmra.mxu0 %v5664_v12 }
 0x30b   : > { %1462 = vmatpush1.bf16.msra.mxu1 %v4568_v52  ;;  %1659 = vmatpush1.bf16.msra.mxu0 %v4584_v53  ;;  %v4580_v52 = vcombine.low %v1572_v5, %v1573_v6  ;;  %v4563_v53 = vcombine.high %v1373_v21, %v1374_v22  ;;  %v4570_v5 = vcombine.low %v1562_v1, %v1563_v2  ;;  %v1761_v2 = vld [vmem:[%s7084_s9 + $0x120] sm:$0xff] }
 0x30c   : > { %1463 = vmatprep.subr.bf16.mxu1 %v4567_v11  ;;  %1660 = vmatprep.subr.bf16.mxu0 %v4583_v13  ;;  %v1774_v11 = vld [vmem:[%s7084_s9 + $0x7a0] sm:$0xff]  ;;  %v1970_v13 = vld [vmem:[%s7084_s9 + $0x728] sm:$0xff]  ;;  %v4599_v22 = vcombine.high %v1771_v16, %v1772_v17 }
 0x30d   : > { %1105 = vmatprep.mubr.bf16.mxu1 %v7134_v56  ;;  %1306 = vmatprep.mubr.bf16.mxu0 %v7134_v56  ;;  %v4601_v6 = vcombine.high %v1773_v10, %v1774_v11  ;;  %v4616_v21 = vcombine.low %v1970_v13, %v1971_v14 }
 0x30f   : > { %1464 = vmatpush1.bf16.msra.mxu1 %v4566_v15  ;;  %1661 = vmatpush1.bf16.msra.mxu0 %v4582_v18  ;;  %v4617_v15 = vcombine.high %v1970_v13, %v1971_v14  ;;  %v1968_v18 = vld [vmem:[%s7084_s9 + $0x628] sm:$0xff]  ;;  %v1759_v14 = vld [vmem:[%s7084_s9 + $0x20] sm:$0xff] }
 0x310   : > { %1465 = vmatprep.subr.bf16.mxu1 %v4565_v19  ;;  %1662 = vmatprep.subr.bf16.mxu0 %v4581_v20  ;;  %v1969_v19 = vld [vmem:[%s7084_s9 + $0x6a8] sm:$0xff]  ;;  %v4600_v20 = vcombine.low %v1773_v10, %v1774_v11 }
 0x311   : > { %v4615_v48 = vcombine.high %v1968_v18, %v1969_v19  ;;  %v4614_v24 = vcombine.low %v1968_v18, %v1969_v19  ;;  %v2167_v19 = vld [vmem:[%s7084_s9 + $0x730] sm:$0xff] }
 0x312   : > { %1106 = vmatmul.mubr.bf16.gmra.mxu1 %v5700_v50  ;;  %1307 = vmatmul.mubr.bf16.gmra.mxu0 %v5700_v50 }
 0x313   : > { %1466 = vmatpush1.bf16.msra.mxu1 %v4564_v51  ;;  %1663 = vmatpush1.bf16.msra.mxu0 %v4580_v52  ;;  %v1770_v51 = vld [vmem:[%s7084_s9 + $0x5a0] sm:$0xff]  ;;  %v1966_v52 = vld [vmem:[%s7084_s9 + $0x528] sm:$0xff] }
 0x314   : > { %1467 = vmatprep.subr.bf16.mxu1 %v4563_v53  ;;  %1664 = vmatprep.subr.bf16.mxu0 %v4579_v23  ;;  %v1967_v53 = vld [vmem:[%s7084_s9 + $0x5a8] sm:$0xff]  ;;  %v4598_v23 = vcombine.low %v1771_v16, %v1772_v17  ;;  %v4597_v25 = vcombine.high %v1769_v49, %v1770_v51 }
 0x315   : > { %1493 = vmatprep.mubr.bf16.mxu1 %v7134_v56  ;;  %1690 = vmatprep.mubr.bf16.mxu0 %v7134_v56  ;;  %v4613_v26 = vcombine.high %v1966_v52, %v1967_v53  ;;  %v4612_v32 = vcombine.low %v1966_v52, %v1967_v53  ;;  %v2165_v53 = vld [vmem:[%s7084_s9 + $0x630] sm:$0xff] }
 0x317   : > { %1468 = vmatpush1.bf16.msra.mxu1 %v4562_v28  ;;  %1665 = vmatpush1.bf16.msra.mxu0 %v4578_v29  ;;  %v1768_v28 = vld [vmem:[%s7084_s9 + $0x4a0] sm:$0xff]  ;;  %v1964_v29 = vld [vmem:[%s7084_s9 + $0x428] sm:$0xff] }
 0x318   : > { %1469 = vmatprep.subr.bf16.mxu1 %v4561_v30  ;;  %1666 = vmatprep.subr.bf16.mxu0 %v4577_v31  ;;  %v1965_v30 = vld [vmem:[%s7084_s9 + $0x4a8] sm:$0xff]  ;;  %v4596_v31 = vcombine.low %v1769_v49, %v1770_v51  ;;  %v4595_v33 = vcombine.high %v1767_v27, %v1768_v28 }
 0x319   : > { %v4611_v34 = vcombine.high %v1964_v29, %v1965_v30  ;;  %v4610_v47 = vcombine.low %v1964_v29, %v1965_v30  ;;  %v2163_v30 = vld [vmem:[%s7084_s9 + $0x530] sm:$0xff] }
 0x31b   : > { %1470 = vmatpush1.bf16.msra.mxu1 %v4560_v39  ;;  %1667 = vmatpush1.bf16.msra.mxu0 %v4576_v41  ;;  %v1766_v39 = vld [vmem:[%s7084_s9 + $0x3a0] sm:$0xff]  ;;  %v1962_v41 = vld [vmem:[%s7084_s9 + $0x328] sm:$0xff] }
 0x31c   : > { %1471 = vmatprep.subr.bf16.mxu1 %v4559_v45  ;;  %1668 = vmatprep.subr.bf16.mxu0 %v4575_v46  ;;  %v1963_v45 = vld [vmem:[%s7084_s9 + $0x3a8] sm:$0xff]  ;;  %v4594_v46 = vcombine.low %v1767_v27, %v1768_v28  ;;  %v4593_v54 = vcombine.high %v1765_v36, %v1766_v39 }
 0x31d   : > { %v4609_v55 = vcombine.high %v1962_v41, %v1963_v45  ;;  %v4608_v63 = vcombine.low %v1962_v41, %v1963_v45  ;;  %v2161_v45 = vld [vmem:[%s7084_s9 + $0x430] sm:$0xff] }
 0x31f   : > { %1472 = vmatpush1.bf16.msra.mxu1 %v4558_v57  ;;  %1669 = vmatpush1.bf16.msra.mxu0 %v4574_v59  ;;  %v1764_v57 = vld [vmem:[%s7084_s9 + $0x2a0] sm:$0xff]  ;;  %v1960_v59 = vld [vmem:[%s7084_s9 + $0x228] sm:$0xff] }
 0x320   : > { %1473 = vmatprep.subr.bf16.mxu1 %v4557_v60  ;;  %1670 = vmatprep.subr.bf16.mxu0 %v4573_v61  ;;  %v1961_v60 = vld [vmem:[%s7084_s9 + $0x2a8] sm:$0xff]  ;;  %v4592_v61 = vcombine.low %v1765_v36, %v1766_v39  ;;  %v4591_v0 = vcombine.high %v1763_v58, %v1764_v57 }
 0x321   : > { %v4607_v1 = vcombine.high %v1960_v59, %v1961_v60  ;;  %v4606_v10 = vcombine.low %v1960_v59, %v1961_v60  ;;  %v2159_v60 = vld [vmem:[%s7084_s9 + $0x330] sm:$0xff] }
 0x323   : > { %1474 = vmatpush1.bf16.msra.mxu1 %v4556_v3  ;;  %1671 = vmatpush1.bf16.msra.mxu0 %v4572_v7  ;;  %v1762_v3 = vld [vmem:[%s7084_s9 + $0x1a0] sm:$0xff]  ;;  %v1958_v7 = vld [vmem:[%s7084_s9 + $0x128] sm:$0xff] }
 0x324   : > { %1475 = vmatprep.subr.bf16.mxu1 %v4555_v8  ;;  %1672 = vmatprep.subr.bf16.mxu0 %v4571_v9  ;;  %v1959_v8 = vld [vmem:[%s7084_s9 + $0x1a8] sm:$0xff]  ;;  %v4590_v9 = vcombine.low %v1763_v58, %v1764_v57  ;;  %v4589_v11 = vcombine.high %v1761_v2, %v1762_v3 }
 0x325   : > { %v4605_v13 = vcombine.high %v1958_v7, %v1959_v8  ;;  %v4604_v16 = vcombine.low %v1958_v7, %v1959_v8  ;;  %v2157_v8 = vld [vmem:[%s7084_s9 + $0x230] sm:$0xff] }
 0x327   : > { %1476 = vmatpush1.bf16.msra.mxu1 %v4554_v4  ;;  %1673 = vmatpush1.bf16.msra.mxu0 %v4570_v5  ;;  %v1760_v4 = vld [vmem:[%s7084_s9 + $0xa0] sm:$0xff]  ;;  %v1956_v5 = vld [vmem:[%s7084_s9 + $0x28] sm:$0xff] }
 0x328   : > { %1855 = vmatprep.subr.bf16.mxu1 %v4601_v6  ;;  %2052 = vmatprep.subr.bf16.mxu0 %v4617_v15  ;;  %v1957_v6 = vld [vmem:[%s7084_s9 + $0xa8] sm:$0xff]  ;;  %v4588_v15 = vcombine.low %v1761_v2, %v1762_v3  ;;  %v4587_v17 = vcombine.high %v1759_v14, %v1760_v4 }
 0x329   : > { %v4603_v18 = vcombine.high %v1956_v5, %v1957_v6  ;;  %v4602_v49 = vcombine.low %v1956_v5, %v1957_v6  ;;  %v2155_v6 = vld [vmem:[%s7084_s9 + $0x130] sm:$0xff] }
 0x32a   : > { %1494 = vmatmul.mubr.bf16.vlgmr.msra.gmra.mxu1 %v5664_v12  ;;  %1691 = vmatmul.mubr.bf16.vlgmr.msra.gmra.mxu0 %v5664_v12 }
 0x32b   : > { %1856 = vmatpush1.bf16.msra.mxu1 %v4600_v20  ;;  %2053 = vmatpush1.bf16.msra.mxu0 %v4616_v21  ;;  %v2168_v20 = vld [vmem:[%s7084_s9 + $0x7b0] sm:$0xff]  ;;  %v2364_v21 = vld [vmem:[%s7084_s9 + $0x738] sm:$0xff] }
 0x32c   : > { %1857 = vmatprep.subr.bf16.mxu1 %v4599_v22  ;;  %2054 = vmatprep.subr.bf16.mxu0 %v4615_v48  ;;  %v2365_v22 = vld [vmem:[%s7084_s9 + $0x7b8] sm:$0xff]  ;;  %v4586_v48 = vcombine.low %v1759_v14, %v1760_v4  ;;  %v4633_v51 = vcombine.high %v2167_v19, %v2168_v20 }
 0x32d   : > { %1503 = vmatprep.mubr.bf16.mxu1 %v7134_v56  ;;  %1700 = vmatprep.mubr.bf16.mxu0 %v7134_v56  ;;  %v4649_v52 = vcombine.high %v2364_v21, %v2365_v22  ;;  %v4648_v27 = vcombine.low %v2364_v21, %v2365_v22  ;;  %v2153_v22 = vld [vmem:[%s7084_s9 + $0x30] sm:$0xff] }
 0x32f   : > { %1858 = vmatpush1.bf16.msra.mxu1 %v4598_v23  ;;  %2055 = vmatpush1.bf16.msra.mxu0 %v4614_v24  ;;  %v2166_v23 = vld [vmem:[%s7084_s9 + $0x6b0] sm:$0xff]  ;;  %v2362_v24 = vld [vmem:[%s7084_s9 + $0x638] sm:$0xff] }
 0x330   : > { %1859 = vmatprep.subr.bf16.mxu1 %v4597_v25  ;;  %2056 = vmatprep.subr.bf16.mxu0 %v4613_v26  ;;  %v2363_v25 = vld [vmem:[%s7084_s9 + $0x6b8] sm:$0xff]  ;;  %v4632_v26 = vcombine.low %v2167_v19, %v2168_v20  ;;  %v4631_v28 = vcombine.high %v2165_v53, %v2166_v23 }
 0x331   : > { %v4647_v29 = vcombine.high %v2362_v24, %v2363_v25  ;;  %v4646_v36 = vcombine.low %v2362_v24, %v2363_v25  ;;  %v2561_v24 = vld [vmem:[%s7084_s9 + $0x740] sm:$0xff] }
 0x332   : > { %1504 = vmatmul.mubr.bf16.gmra.mxu1 %v5700_v50  ;;  %1701 = vmatmul.mubr.bf16.gmra.mxu0 %v5700_v50  ;;  %v2562_v25 = vld [vmem:[%s7084_s9 + $0x7c0] sm:$0xff] }
 0x333   : > { %1860 = vmatpush1.bf16.msra.mxu1 %v4596_v31  ;;  %2057 = vmatpush1.bf16.msra.mxu0 %v4612_v32  ;;  %v2164_v31 = vld [vmem:[%s7084_s9 + $0x5b0] sm:$0xff]  ;;  %v2360_v32 = vld [vmem:[%s7084_s9 + $0x538] sm:$0xff] }
 0x334   : > { %1861 = vmatprep.subr.bf16.mxu1 %v4595_v33  ;;  %2058 = vmatprep.subr.bf16.mxu0 %v4611_v34  ;;  %v2361_v33 = vld [vmem:[%s7084_s9 + $0x5b8] sm:$0xff]  ;;  %v4630_v34 = vcombine.low %v2165_v53, %v2166_v23  ;;  %v4629_v39 = vcombine.high %v2163_v30, %v2164_v31 }
 0x335   : > { %1887 = vmatprep.mubr.bf16.mxu1 %v7134_v56  ;;  %2084 = vmatprep.mubr.bf16.mxu0 %v7134_v56  ;;  %v4645_v41 = vcombine.high %v2360_v32, %v2361_v33  ;;  %v4644_v58 = vcombine.low %v2360_v32, %v2361_v33  ;;  %v2350_v53 = vld [vmem:[%s7084_s9 + $0x38] sm:$0xff]  ;;  %v7110_v32 = vmov 4   ;;  %v5214_v33 = vmov 1  }
 0x336   : > { %v2351_v23 = vld [vmem:[%s7084_s9 + $0xb8] sm:$0xff] }
 0x337   : > { %1862 = vmatpush1.bf16.msra.mxu1 %v4594_v46  ;;  %2059 = vmatpush1.bf16.msra.mxu0 %v4610_v47  ;;  %v2162_v46 = vld [vmem:[%s7084_s9 + $0x4b0] sm:$0xff]  ;;  %v2358_v47 = vld [vmem:[%s7084_s9 + $0x438] sm:$0xff] }
 0x338   : > { %1863 = vmatprep.subr.bf16.mxu1 %v4593_v54  ;;  %2060 = vmatprep.subr.bf16.mxu0 %v4609_v55  ;;  %v2359_v54 = vld [vmem:[%s7084_s9 + $0x4b8] sm:$0xff]  ;;  %v4628_v55 = vcombine.low %v2163_v30, %v2164_v31  ;;  %v4627_v57 = vcombine.high %v2161_v45, %v2162_v46  ;;  %v4634_v31 = vcombine.low %v2350_v53, %v2351_v23 }
 0x339   : > { %v4643_v59 = vcombine.high %v2358_v47, %v2359_v54  ;;  %v4642_v2 = vcombine.low %v2358_v47, %v2359_v54  ;;  %v4664_v47 = vcombine.low %v2561_v24, %v2562_v25 }
 0x33b   : > { %1864 = vmatpush1.bf16.msra.mxu1 %v4592_v61  ;;  %2061 = vmatpush1.bf16.msra.mxu0 %v4608_v63  ;;  %v2160_v61 = vld [vmem:[%s7084_s9 + $0x3b0] sm:$0xff]  ;;  %v2356_v63 = vld [vmem:[%s7084_s9 + $0x338] sm:$0xff] }
 0x33c   : > { %1865 = vmatprep.subr.bf16.mxu1 %v4591_v0  ;;  %2062 = vmatprep.subr.bf16.mxu0 %v4607_v1  ;;  %v2357_v0 = vld [vmem:[%s7084_s9 + $0x3b8] sm:$0xff]  ;;  %v4626_v1 = vcombine.low %v2161_v45, %v2162_v46  ;;  %v4625_v3 = vcombine.high %v2159_v60, %v2160_v61  ;;  %v2756_v45 = vld [vmem:[%s7084_s9 + $0x648] sm:$0xff] }
 0x33d   : > { %v4641_v7 = vcombine.high %v2356_v63, %v2357_v0  ;;  %v4640_v14 = vcombine.low %v2356_v63, %v2357_v0  ;;  %v2757_v46 = vld [vmem:[%s7084_s9 + $0x6c8] sm:$0xff] }
 0x33e   : > { %v2754_v63 = vld [vmem:[%s7084_s9 + $0x548] sm:$0xff] }
 0x33f   : > { %1866 = vmatpush1.bf16.msra.mxu1 %v4590_v9  ;;  %2063 = vmatpush1.bf16.msra.mxu0 %v4606_v10  ;;  %v2158_v9 = vld [vmem:[%s7084_s9 + $0x2b0] sm:$0xff]  ;;  %v2354_v10 = vld [vmem:[%s7084_s9 + $0x238] sm:$0xff]  ;;  %v2755_v0 = vld [vmem:[%s7084_s9 + $0x5c8] sm:$0xff] }
 0x340   : > { %1867 = vmatprep.subr.bf16.mxu1 %v4589_v11  ;;  %2064 = vmatprep.subr.bf16.mxu0 %v4605_v13  ;;  %v2355_v11 = vld [vmem:[%s7084_s9 + $0x2b8] sm:$0xff]  ;;  %v4624_v13 = vcombine.low %v2159_v60, %v2160_v61  ;;  %v4623_v4 = vcombine.high %v2157_v8, %v2158_v9  ;;  %v2557_v60 = vld [vmem:[%s7084_s9 + $0x540] sm:$0xff] }
 0x341   : > { %v4639_v5 = vcombine.high %v2354_v10, %v2355_v11  ;;  %v4638_v19 = vcombine.low %v2354_v10, %v2355_v11  ;;  %v2558_v61 = vld [vmem:[%s7084_s9 + $0x5c0] sm:$0xff] }
 0x342   : > { %v2555_v10 = vld [vmem:[%s7084_s9 + $0x440] sm:$0xff]  ;;  %v4660_v11 = vcombine.low %v2557_v60, %v2558_v61 }
 0x343   : > { %1868 = vmatpush1.bf16.msra.mxu1 %v4588_v15  ;;  %2065 = vmatpush1.bf16.msra.mxu0 %v4604_v16  ;;  %v2156_v15 = vld [vmem:[%s7084_s9 + $0x1b0] sm:$0xff]  ;;  %v2352_v16 = vld [vmem:[%s7084_s9 + $0x138] sm:$0xff] }
 0x344   : > { %1869 = vmatprep.subr.bf16.mxu1 %v4587_v17  ;;  %2066 = vmatprep.subr.bf16.mxu0 %v4603_v18  ;;  %v2353_v17 = vld [vmem:[%s7084_s9 + $0x1b8] sm:$0xff]  ;;  %v4622_v18 = vcombine.low %v2157_v8, %v2158_v9  ;;  %v4621_v20 = vcombine.high %v2155_v6, %v2156_v15  ;;  %v7100_v8 = vmov 8   ;;  %v7122_v9 = vmov 5  }
 0x345   : > { %v4637_v21 = vcombine.high %v2352_v16, %v2353_v17 }
 0x347   : > { %1870 = vmatpush1.bf16.msra.mxu1 %v4586_v48  ;;  %2067 = vmatpush1.bf16.msra.mxu0 %v4602_v49  ;;  %v4620_v49 = vcombine.low %v2155_v6, %v2156_v15  ;;  %v2553_v6 = vld [vmem:[%s7084_s9 + $0x340] sm:$0xff] }
 0x348   : > { %2249 = vmatprep.subr.bf16.mxu1 %v4633_v51  ;;  %2446 = vmatprep.subr.bf16.mxu0 %v4649_v52  ;;  %v4636_v51 = vcombine.low %v2352_v16, %v2353_v17  ;;  %v2154_v52 = vld [vmem:[%s7084_s9 + $0xb0] sm:$0xff]  ;;  %v2554_v15 = vld [vmem:[%s7084_s9 + $0x3c0] sm:$0xff]  ;;  %v2750_v16 = vld [vmem:[%s7084_s9 + $0x348] sm:$0xff] }
 0x349   : > { %v4618_v30 = vcombine.low %v2153_v22, %v2154_v52  ;;  %v2751_v17 = vld [vmem:[%s7084_s9 + $0x3c8] sm:$0xff] }
 0x34a   : > { %1888 = vmatmul.mubr.bf16.vlgmr.msra.gmra.mxu1 %v5664_v12  ;;  %2085 = vmatmul.mubr.bf16.vlgmr.msra.gmra.mxu0 %v5664_v12 }
 0x34b   : > { %2250 = vmatpush1.bf16.msra.mxu1 %v4632_v26  ;;  %2447 = vmatpush1.bf16.msra.mxu0 %v4648_v27  ;;  %v2758_v26 = vld [vmem:[%s7084_s9 + $0x748] sm:$0xff] }
 0x34c   : > { %2251 = vmatprep.subr.bf16.mxu1 %v4631_v28  ;;  %2448 = vmatprep.subr.bf16.mxu0 %v4647_v29  ;;  %v2759_v27 = vld [vmem:[%s7084_s9 + $0x7c8] sm:$0xff]  ;;  %v4619_v28 = vcombine.high %v2153_v22, %v2154_v52  ;;  %v4635_v29 = vcombine.high %v2350_v53, %v2351_v23  ;;  %v7096_v22 = vmov 10   ;;  %v4673_v52 = vcombine.high %v2750_v16, %v2751_v17  ;;  %v2551_v53 = vld [vmem:[%s7084_s9 + $0x240] sm:$0xff] }
 0x34d   : > { %1897 = vmatprep.mubr.bf16.mxu1 %v7134_v56  ;;  %2094 = vmatprep.mubr.bf16.mxu0 %v7134_v56  ;;  %v4680_v54 = vcombine.low %v2758_v26, %v2759_v27  ;;  %v2552_v23 = vld [vmem:[%s7084_s9 + $0x2c0] sm:$0xff] }
 0x34f   : > { %2252 = vmatpush1.bf16.msra.mxu1 %v4630_v34  ;;  %2449 = vmatpush1.bf16.msra.mxu0 %v4646_v36  ;;  %v4665_v34 = vcombine.high %v2561_v24, %v2562_v25  ;;  %v4681_v36 = vcombine.high %v2758_v26, %v2759_v27  ;;  %v2748_v24 = vld [vmem:[%s7084_s9 + $0x248] sm:$0xff]  ;;  %v4656_v26 = vcombine.low %v2553_v6, %v2554_v15 }
 0x350   : > { %2253 = vmatprep.subr.bf16.mxu1 %v4629_v39  ;;  %2450 = vmatprep.subr.bf16.mxu0 %v4645_v41  ;;  %v2559_v39 = vld [vmem:[%s7084_s9 + $0x640] sm:$0xff]  ;;  %v2749_v25 = vld [vmem:[%s7084_s9 + $0x2c8] sm:$0xff]  ;;  %v4672_v27 = vcombine.low %v2750_v16, %v2751_v17 }
 0x351   : > { %v2560_v41 = vld [vmem:[%s7084_s9 + $0x6c0] sm:$0xff] }
 0x352   : > { %1898 = vmatmul.mubr.bf16.gmra.mxu1 %v5700_v50  ;;  %2095 = vmatmul.mubr.bf16.gmra.mxu0 %v5700_v50 }
 0x353   : > { %2254 = vmatpush1.bf16.msra.mxu1 %v4628_v55  ;;  %2451 = vmatpush1.bf16.msra.mxu0 %v4644_v58  ;;  %v7106_v55 = vmov 6   ;;  %v7147_v58 = vmov 3  }
 0x354   : > { %2255 = vmatprep.subr.bf16.mxu1 %v4627_v57  ;;  %2452 = vmatprep.subr.bf16.mxu0 %v4643_v59  ;;  %v4663_v57 = vcombine.high %v2559_v39, %v2560_v41  ;;  %v4679_v59 = vcombine.high %v2756_v45, %v2757_v46 }
 0x355   : > { %2281 = vmatprep.mubr.bf16.mxu1 %v7134_v56  ;;  %2478 = vmatprep.mubr.bf16.mxu0 %v7134_v56 }
 0x357   : > { %2256 = vmatpush1.bf16.msra.mxu1 %v4626_v1  ;;  %2453 = vmatpush1.bf16.msra.mxu0 %v4642_v2  ;;  %v4662_v1 = vcombine.low %v2559_v39, %v2560_v41  ;;  %v4678_v2 = vcombine.low %v2756_v45, %v2757_v46  ;;  %v2746_v39 = vld [vmem:[%s7084_s9 + $0x148] sm:$0xff]  ;;  %v4654_v45 = vcombine.low %v2551_v53, %v2552_v23 }
 0x358   : > { %2257 = vmatprep.subr.bf16.mxu1 %v4625_v3  ;;  %2454 = vmatprep.subr.bf16.mxu0 %v4641_v7  ;;  %v4661_v3 = vcombine.high %v2557_v60, %v2558_v61  ;;  %v4677_v7 = vcombine.high %v2754_v63, %v2755_v0  ;;  %v2747_v41 = vld [vmem:[%s7084_s9 + $0x1c8] sm:$0xff]  ;;  %v4670_v46 = vcombine.low %v2748_v24, %v2749_v25  ;;  %v2547_v60 = vld [vmem:[%s7084_s9 + $0x40] sm:$0xff] }
 0x359   : > { %v2548_v61 = vld [vmem:[%s7084_s9 + $0xc0] sm:$0xff] }
 0x35b   : > { %2258 = vmatpush1.bf16.msra.mxu1 %v4624_v13  ;;  %2455 = vmatpush1.bf16.msra.mxu0 %v4640_v14  ;;  %v4676_v13 = vcombine.low %v2754_v63, %v2755_v0  ;;  %v2556_v14 = vld [vmem:[%s7084_s9 + $0x4c0] sm:$0xff]  ;;  %v2744_v63 = vld [vmem:[%s7084_s9 + $0x48] sm:$0xff] }
 0x35c   : > { %2259 = vmatprep.subr.bf16.mxu1 %v4623_v4  ;;  %2456 = vmatprep.subr.bf16.mxu0 %v4639_v5  ;;  %v2752_v4 = vld [vmem:[%s7084_s9 + $0x448] sm:$0xff] }
 0x35d   : > { %v2753_v5 = vld [vmem:[%s7084_s9 + $0x4c8] sm:$0xff] }
 0x35e   : > { %v2745_v0 = vld [vmem:[%s7084_s9 + $0xc8] sm:$0xff] }
 0x35f   : > { %2260 = vmatpush1.bf16.msra.mxu1 %v4622_v18  ;;  %2457 = vmatpush1.bf16.msra.mxu0 %v4638_v19  ;;  %v5953_v48 = vpop.f32.mrf.mxu1  ;;  %v4659_v18 = vcombine.high %v2555_v10, %v2556_v14  ;;  %v4675_v19 = vcombine.high %v2752_v4, %v2753_v5 }
 0x360   : > { %7158 = vst [vmem:[#allocation8_spill] sm:$0xff] %v5953_v48  ;;  %1318 = vperm.xlu1 %5021, %v5953_v48   ;;  %1118 = vperm.xlu0 %5018, %v5953_v48  }
 0x361   : > { %2261 = vmatprep.subr.bf16.mxu1 %v4621_v20  ;;  %2458 = vmatprep.subr.bf16.mxu0 %v4637_v21  ;;  %v4658_v20 = vcombine.low %v2555_v10, %v2556_v14  ;;  %v4674_v21 = vcombine.low %v2752_v4, %v2753_v5  ;;  %v7142_v10 = vmov 17   ;;  %v4666_v14 = vcombine.low %v2744_v63, %v2745_v0  ;;  %v2955_v4 = vld [vmem:[%s7084_s9 + $0x750] sm:$0xff] }
 0x362   : > { %v2956_v5 = vld [vmem:[%s7084_s9 + $0x7d0] sm:$0xff] }
 0x363   : > { %2262 = vmatpush1.bf16.msra.mxu1 %v4620_v49  ;;  %2459 = vmatpush1.bf16.msra.mxu0 %v4636_v51  ;;  %v7120_v49 = vmov 7   ;;  %v4657_v51 = vcombine.high %v2553_v6, %v2554_v15  ;;  %v3152_v6 = vld [vmem:[%s7084_s9 + $0x758] sm:$0xff]  ;;  %v4697_v16 = vcombine.high %v2955_v4, %v2956_v5 }
 0x364   : > { %5023 = vset.pattern.permute.xlu1 %v7110_v32  ;;  %5020 = vset.pattern.permute.xlu0 %v5214_v33  ;;  %v3153_v15 = vld [vmem:[%s7084_s9 + $0x7d8] sm:$0xff] }
 0x365   : > { %1515 = vperm.xlu1 %5023, %v5953_v48   ;;  %1145 = vperm.xlu0 %5020, %v5953_v48   ;;  %v4713_v17 = vcombine.high %v3152_v6, %v3153_v15 }
 0x366   : > { %2263 = vmatprep.subr.bf16.mxu1 %v4619_v28  ;;  %2460 = vmatprep.subr.bf16.mxu0 %v4635_v29  ;;  %v4655_v28 = vcombine.high %v2551_v53, %v2552_v23  ;;  %v4671_v29 = vcombine.high %v2748_v24, %v2749_v25  ;;  %v3150_v53 = vld [vmem:[%s7084_s9 + $0x658] sm:$0xff]  ;;  %v2951_v24 = vld [vmem:[%s7084_s9 + $0x550] sm:$0xff] }
 0x367   : > { %2264 = vmatpush1.bf16.msra.mxu1 %v4618_v30  ;;  %2461 = vmatpush1.bf16.msra.mxu0 %v4634_v31  ;;  %v7094_v30 = vmov 12   ;;  %v7114_v31 = vmov 9   ;;  %v3151_v23 = vld [vmem:[%s7084_s9 + $0x6d8] sm:$0xff]  ;;  %v2952_v25 = vld [vmem:[%s7084_s9 + $0x5d0] sm:$0xff] }
 0x368   : > { %2643 = vmatprep.subr.bf16.mxu1 %v4665_v34  ;;  %2840 = vmatprep.subr.bf16.mxu0 %v4681_v36  ;;  %v2549_v34 = vld [vmem:[%s7084_s9 + $0x140] sm:$0xff] }
 0x369   : > { %5025 = vset.pattern.permute.xlu1 %v7106_v55  ;;  %5022 = vset.pattern.permute.xlu0 %v7147_v58  ;;  %v2550_v36 = vld [vmem:[%s7084_s9 + $0x1c0] sm:$0xff] }
 0x36a   : > { %2282 = vmatmul.mubr.bf16.vlgmr.msra.gmra.mxu1 %v5664_v12  ;;  %2479 = vmatmul.mubr.bf16.vlgmr.msra.gmra.mxu0 %v5664_v12 }
 0x36b   : > { %1712 = vperm.xlu1 %5025, %v5953_v48   ;;  %1342 = vperm.xlu0 %5022, %v5953_v48  }
 0x36c   : > { %2644 = vmatpush1.bf16.msra.mxu1 %v4664_v47  ;;  %2841 = vmatpush1.bf16.msra.mxu0 %v4680_v54  ;;  %v4653_v47 = vcombine.high %v2549_v34, %v2550_v36  ;;  %v4669_v54 = vcombine.high %v2746_v39, %v2747_v41 }
 0x36d   : > { %2645 = vmatprep.subr.bf16.mxu1 %v4663_v57  ;;  %2842 = vmatprep.subr.bf16.mxu0 %v4679_v59  ;;  %v7092_v57 = vmov 14   ;;  %v7112_v59 = vmov 11  }
 0x36e   : > { %2291 = vmatprep.mubr.bf16.mxu1 %v7134_v56  ;;  %2488 = vmatprep.mubr.bf16.mxu0 %v7134_v56 }
 0x36f   : > { %5027 = vset.pattern.permute.xlu1 %v7100_v8  ;;  %5024 = vset.pattern.permute.xlu0 %v7122_v9 }
 0x370   : > { %2646 = vmatpush1.bf16.msra.mxu1 %v4662_v1  ;;  %2843 = vmatpush1.bf16.msra.mxu0 %v4678_v2  ;;  %v4652_v1 = vcombine.low %v2549_v34, %v2550_v36  ;;  %v4668_v2 = vcombine.low %v2746_v39, %v2747_v41  ;;  %v4710_v36 = vcombine.low %v3150_v53, %v3151_v23  ;;  %v7140_v39 = vmov 20  }
 0x371   : > { %1909 = vperm.xlu1 %5027, %v5953_v48   ;;  %1539 = vperm.xlu0 %5024, %v5953_v48   ;;  %v7145_v41 = vmov 16  }
 0x372   : > { %2647 = vmatprep.subr.bf16.mxu1 %v4661_v3  ;;  %2844 = vmatprep.subr.bf16.mxu0 %v4677_v7  ;;  %v4651_v3 = vcombine.high %v2547_v60, %v2548_v61  ;;  %v4667_v7 = vcombine.high %v2744_v63, %v2745_v0  ;;  %v4692_v63 = vcombine.low %v2951_v24, %v2952_v25 }
 0x373   : > { %2292 = vmatmul.mubr.bf16.gmra.mxu1 %v5700_v50  ;;  %2489 = vmatmul.mubr.bf16.gmra.mxu0 %v5700_v50 }
 0x374   : > { %2648 = vmatpush1.bf16.msra.mxu1 %v4660_v11  ;;  %2845 = vmatpush1.bf16.msra.mxu0 %v4676_v13  ;;  %v7108_v11 = vmov 13   ;;  %v4650_v13 = vcombine.low %v2547_v60, %v2548_v61  ;;  %v3146_v60 = vld [vmem:[%s7084_s9 + $0x458] sm:$0xff] }
 0x375   : > { %5029 = vset.pattern.permute.xlu1 %v7096_v22  ;;  %5026 = vset.pattern.permute.xlu0 %v7120_v49  ;;  %v3147_v61 = vld [vmem:[%s7084_s9 + $0x4d8] sm:$0xff] }
 0x376   : > { %2106 = vperm.xlu1 %5029, %v5953_v48   ;;  %1736 = vperm.xlu0 %5026, %v5953_v48  }
 0x377   : > { %2649 = vmatprep.subr.bf16.mxu1 %v4659_v18  ;;  %2846 = vmatprep.subr.bf16.mxu0 %v4675_v19  ;;  %v2953_v18 = vld [vmem:[%s7084_s9 + $0x650] sm:$0xff]  ;;  %v7104_v19 = vmov 18  }
 0x378   : > { %2650 = vmatpush1.bf16.msra.mxu1 %v4658_v20  ;;  %2847 = vmatpush1.bf16.msra.mxu0 %v4674_v21  ;;  %v7133_v20 = vmov 15   ;;  %v4696_v21 = vcombine.low %v2955_v4, %v2956_v5  ;;  %v3144_v4 = vld [vmem:[%s7084_s9 + $0x358] sm:$0xff] }
 0x379   : > { %2651 = vmatprep.subr.bf16.mxu1 %v4657_v51  ;;  %2848 = vmatprep.subr.bf16.mxu0 %v4673_v52  ;;  %v4712_v51 = vcombine.low %v3152_v6, %v3153_v15  ;;  %v2954_v52 = vld [vmem:[%s7084_s9 + $0x6d0] sm:$0xff]  ;;  %v3145_v5 = vld [vmem:[%s7084_s9 + $0x3d8] sm:$0xff]  ;;  %v4706_v15 = vcombine.low %v3146_v60, %v3147_v61 }
 0x37a   : > { %5031 = vset.pattern.permute.xlu1 %v7094_v30  ;;  %5028 = vset.pattern.permute.xlu0 %v7114_v31  ;;  %v4694_v34 = vcombine.low %v2953_v18, %v2954_v52 }
 0x37b   : > { %2303 = vperm.xlu1 %5031, %v5953_v48   ;;  %1933 = vperm.xlu0 %5028, %v5953_v48  }
 0x37c   : > { %2652 = vmatpush1.bf16.msra.mxu1 %v4656_v26  ;;  %2849 = vmatpush1.bf16.msra.mxu0 %v4672_v27  ;;  %v3148_v26 = vld [vmem:[%s7084_s9 + $0x558] sm:$0xff] }
 0x37d   : > { %2653 = vmatprep.subr.bf16.mxu1 %v4655_v28  ;;  %2850 = vmatprep.subr.bf16.mxu0 %v4671_v29  ;;  %v3149_v27 = vld [vmem:[%s7084_s9 + $0x5d8] sm:$0xff]  ;;  %v4695_v28 = vcombine.high %v2953_v18, %v2954_v52  ;;  %v4711_v29 = vcombine.high %v3150_v53, %v3151_v23  ;;  %v7138_v18 = vmov 23   ;;  %v4704_v53 = vcombine.low %v3144_v4, %v3145_v5  ;;  %v2946_v23 = vld [vmem:[%s7084_s9 + $0x2d0] sm:$0xff] }
 0x37e   : > { %2675 = vmatprep.mubr.bf16.mxu1 %v7134_v56  ;;  %2872 = vmatprep.mubr.bf16.mxu0 %v7134_v56  ;;  %v4708_v0 = vcombine.low %v3148_v26, %v3149_v27 }
 0x37f   : > { %5033 = vset.pattern.permute.xlu1 %v7092_v57  ;;  %5030 = vset.pattern.permute.xlu0 %v7112_v59 }
 0x380   : > { %2500 = vperm.xlu1 %5033, %v5953_v48   ;;  %2130 = vperm.xlu0 %5030, %v5953_v48  }
 0x381   : > { %2654 = vmatpush1.bf16.msra.mxu1 %v4654_v45  ;;  %2851 = vmatpush1.bf16.msra.mxu0 %v4670_v46  ;;  %v4693_v45 = vcombine.high %v2951_v24, %v2952_v25  ;;  %v4709_v46 = vcombine.high %v3148_v26, %v3149_v27  ;;  %v3142_v24 = vld [vmem:[%s7084_s9 + $0x258] sm:$0xff]  ;;  %v2943_v26 = vld [vmem:[%s7084_s9 + $0x150] sm:$0xff] }
 0x382   : > { %2655 = vmatprep.subr.bf16.mxu1 %v4653_v47  ;;  %2852 = vmatprep.subr.bf16.mxu0 %v4669_v54  ;;  %v2949_v47 = vld [vmem:[%s7084_s9 + $0x450] sm:$0xff]  ;;  %v3143_v25 = vld [vmem:[%s7084_s9 + $0x2d8] sm:$0xff] }
 0x383   : > { %v2950_v54 = vld [vmem:[%s7084_s9 + $0x4d0] sm:$0xff] }
 0x384   : > { %5036 = vset.pattern.permute.xlu1 %v7142_v10  ;;  %5032 = vset.pattern.permute.xlu0 %v7108_v11  ;;  %v4690_v6 = vcombine.low %v2949_v47, %v2950_v54  ;;  %v2944_v27 = vld [vmem:[%s7084_s9 + $0x1d0] sm:$0xff] }
 0x385   : > { %2656 = vmatpush1.bf16.msra.mxu1 %v4652_v1  ;;  %2853 = vmatpush1.bf16.msra.mxu0 %v4668_v2  ;;  %v4691_v1 = vcombine.high %v2949_v47, %v2950_v54  ;;  %v4707_v2 = vcombine.high %v3146_v60, %v3147_v61  ;;  %v7102_v47 = vmov 24   ;;  %v7130_v54 = vmov 25  }
 0x386   : > { %2721 = vperm.xlu1 %5036, %v5953_v48   ;;  %2327 = vperm.xlu0 %5032, %v5953_v48   ;;  %v4685_v60 = vcombine.high %v2943_v26, %v2944_v27 }
 0x387   : > { %2657 = vmatprep.subr.bf16.mxu1 %v4651_v3  ;;  %2854 = vmatprep.subr.bf16.mxu0 %v4667_v7  ;;  %v7098_v3 = vmov 21   ;;  %v7132_v7 = vmov 19  }
 0x389   : > { %2658 = vmatpush1.bf16.msra.mxu1 %v4650_v13  ;;  %2855 = vmatpush1.bf16.msra.mxu0 %v4666_v14  ;;  %v2947_v13 = vld [vmem:[%s7084_s9 + $0x350] sm:$0xff] }
 0x38a   : > { %5037 = vset.pattern.permute.xlu1 %v7104_v19  ;;  %5034 = vset.pattern.permute.xlu0 %v7133_v20  ;;  %v2948_v14 = vld [vmem:[%s7084_s9 + $0x3d0] sm:$0xff] }
 0x38b   : > { %2894 = vperm.xlu1 %5037, %v5953_v48   ;;  %2524 = vperm.xlu0 %5034, %v5953_v48   ;;  %v4688_v52 = vcombine.low %v2947_v13, %v2948_v14 }
 0x38c   : > { %2676 = vmatmul.mubr.bf16.vlgmr.msra.gmra.mxu1 %v5664_v12  ;;  %2873 = vmatmul.mubr.bf16.vlgmr.msra.gmra.mxu0 %v5664_v12 }
 0x38d   : > { %3037 = vmatprep.subr.bf16.mxu1 %v4697_v16  ;;  %3234 = vmatprep.subr.bf16.mxu0 %v4713_v17  ;;  %v4689_v16 = vcombine.high %v2947_v13, %v2948_v14  ;;  %v4705_v17 = vcombine.high %v3144_v4, %v3145_v5  ;;  %v4684_v13 = vcombine.low %v2943_v26, %v2944_v27 }
 0x38e   : > { %3038 = vmatpush1.bf16.msra.mxu1 %v4696_v21  ;;  %3235 = vmatpush1.bf16.msra.mxu0 %v4712_v51  ;;  %v7131_v21 = vmov 22   ;;  %v2945_v51 = vld [vmem:[%s7084_s9 + $0x250] sm:$0xff] }
 0x38f   : > { %5039 = vset.pattern.permute.xlu1 %v7140_v39  ;;  %5035 = vset.pattern.permute.xlu0 %v7145_v41 }
 0x390   : > { %3091 = vperm.xlu1 %5039, %v5953_v48   ;;  %2697 = vperm.xlu0 %5035, %v5953_v48  }
 0x391   : > { %3039 = vmatprep.subr.bf16.mxu1 %v4695_v28  ;;  %3236 = vmatprep.subr.bf16.mxu0 %v4711_v29  ;;  %v3140_v28 = vld [vmem:[%s7084_s9 + $0x158] sm:$0xff] }
 0x392   : > { %3040 = vmatpush1.bf16.msra.mxu1 %v4694_v34  ;;  %3237 = vmatpush1.bf16.msra.mxu0 %v4710_v36  ;;  %v3141_v29 = vld [vmem:[%s7084_s9 + $0x1d8] sm:$0xff]  ;;  %v4687_v34 = vcombine.high %v2945_v51, %v2946_v23  ;;  %v4703_v36 = vcombine.high %v3142_v24, %v3143_v25 }
 0x393   : > { %3041 = vmatprep.subr.bf16.mxu1 %v4693_v45  ;;  %3238 = vmatprep.subr.bf16.mxu0 %v4709_v46  ;;  %v4686_v45 = vcombine.low %v2945_v51, %v2946_v23  ;;  %v4702_v46 = vcombine.low %v3142_v24, %v3143_v25  ;;  %v4701_v61 = vcombine.high %v3140_v28, %v3141_v29  ;;  %v3350_v51 = vld [vmem:[%s7084_s9 + $0x7e0] sm:$0xff] }
 0x394   : > { %5040 = vset.pattern.permute.xlu1 %v7098_v3  ;;  %5038 = vset.pattern.permute.xlu0 %v7132_v7  ;;  %v4700_v14 = vcombine.low %v3140_v28, %v3141_v29  ;;  %v7118_v28 = vmov 27   ;;  %v3347_v29 = vld [vmem:[%s7084_s9 + $0x660] sm:$0xff] }
 0x395   : > { %3115 = vperm.xlu1 %5040, %v5953_v48   ;;  %2918 = vperm.xlu0 %5038, %v5953_v48  }
 0x396   : > { %3042 = vmatpush1.bf16.msra.mxu1 %v4692_v63  ;;  %3239 = vmatpush1.bf16.msra.mxu0 %v4708_v0  ;;  %v2941_v63 = vld [vmem:[%s7084_s9 + $0x50] sm:$0xff] }
 0x397   : > { %3043 = vmatprep.subr.bf16.mxu1 %v4691_v1  ;;  %3240 = vmatprep.subr.bf16.mxu0 %v4707_v2  ;;  %v2942_v0 = vld [vmem:[%s7084_s9 + $0xd0] sm:$0xff]  ;;  %v3138_v1 = vld [vmem:[%s7084_s9 + $0x58] sm:$0xff] }
 0x398   : > { %2685 = vmatprep.mubr.bf16.mxu1 %v7134_v56  ;;  %2882 = vmatprep.mubr.bf16.mxu0 %v7134_v56  ;;  %v3139_v2 = vld [vmem:[%s7084_s9 + $0xd8] sm:$0xff]  ;;  %v4683_v4 = vcombine.high %v2941_v63, %v2942_v0  ;;  %v4682_v23 = vcombine.low %v2941_v63, %v2942_v0  ;;  %v7124_v0 = vmov 29  }
 0x399   : > { %5042 = vset.pattern.permute.xlu1 %v7138_v18  ;;  %5041 = vset.pattern.permute.xlu0 %v7131_v21  ;;  %v4699_v5 = vcombine.high %v3138_v1, %v3139_v2  ;;  %v4698_v24 = vcombine.low %v3138_v1, %v3139_v2 }
 0x39a   : > { %3044 = vmatpush1.bf16.msra.mxu1 %v4690_v6  ;;  %3241 = vmatpush1.bf16.msra.mxu0 %v4706_v15  ;;  %v7136_v6 = vmov 26   ;;  %v7144_v15 = vmov 28  }
 0x39b   : > { %3312 = vperm.xlu1 %5042, %v5953_v48   ;;  %3288 = vperm.xlu0 %5041, %v5953_v48  }
 0x39c   : > { %3045 = vmatprep.subr.bf16.mxu1 %v4689_v16  ;;  %3242 = vmatprep.subr.bf16.mxu0 %v4705_v17  ;;  %v3349_v16 = vld [vmem:[%s7084_s9 + $0x760] sm:$0xff]  ;;  %v6225_v17 = vpop.f32.mrf.mxu1 }
 0x39d   : > { %2686 = vmatmul.mubr.bf16.gmra.mxu1 %v5700_v50  ;;  %2883 = vmatmul.mubr.bf16.gmra.mxu0 %v5700_v50  ;;  %v4729_v25 = vcombine.high %v3349_v16, %v3350_v51 }
 0x39e   : > { %3046 = vmatpush1.bf16.msra.mxu1 %v4688_v52  ;;  %3243 = vmatpush1.bf16.msra.mxu0 %v4704_v53  ;;  %v3546_v52 = vld [vmem:[%s7084_s9 + $0x768] sm:$0xff]  ;;  %v6240_v27 = vpop.f32.mrf.mxu1 }
 0x39f   : > { %5043 = vset.pattern.permute.xlu1 %v7102_v47  ;;  %5044 = vset.pattern.permute.xlu0 %v7130_v54  ;;  %v3547_v53 = vld [vmem:[%s7084_s9 + $0x7e8] sm:$0xff] }
 0x3a0   : > { %3485 = vperm.xlu1 %5043, %v5953_v48   ;;  %3509 = vperm.xlu0 %5044, %v5953_v48   ;;  %v4745_v26 = vcombine.high %v3546_v52, %v3547_v53 }
 0x3a1   : > { %3047 = vmatprep.subr.bf16.mxu1 %v4687_v34  ;;  %3244 = vmatprep.subr.bf16.mxu0 %v4703_v36  ;;  %v3348_v34 = vld [vmem:[%s7084_s9 + $0x6e0] sm:$0xff]  ;;  %v3544_v36 = vld [vmem:[%s7084_s9 + $0x668] sm:$0xff] }
 0x3a2   : > { %3048 = vmatpush1.bf16.msra.mxu1 %v4686_v45  ;;  %3245 = vmatpush1.bf16.msra.mxu0 %v4702_v46  ;;  %v3545_v45 = vld [vmem:[%s7084_s9 + $0x6e8] sm:$0xff]  ;;  %v4728_v46 = vcombine.low %v3349_v16, %v3350_v51  ;;  %v4726_v1 = vcombine.low %v3347_v29, %v3348_v34 }
 0x3a3   : > { %3049 = vmatprep.subr.bf16.mxu1 %v4685_v60  ;;  %3246 = vmatprep.subr.bf16.mxu0 %v4701_v61  ;;  %v4744_v60 = vcombine.low %v3546_v52, %v3547_v53  ;;  %v4727_v61 = vcombine.high %v3347_v29, %v3348_v34  ;;  %v4743_v63 = vcombine.high %v3544_v36, %v3545_v45  ;;  %v3343_v52 = vld [vmem:[%s7084_s9 + $0x460] sm:$0xff] }
 0x3a4   : > { %5045 = vset.pattern.permute.xlu1 %v7136_v6  ;;  %5047 = vset.pattern.permute.xlu0 %v7144_v15  ;;  %v4742_v2 = vcombine.low %v3544_v36, %v3545_v45  ;;  %v3341_v29 = vld [vmem:[%s7084_s9 + $0x360] sm:$0xff]  ;;  %v3538_v36 = vld [vmem:[%s7084_s9 + $0x368] sm:$0xff] }
 0x3a5   : > { %3682 = vperm.xlu1 %5045, %v5953_v48   ;;  %3879 = vperm.xlu0 %5047, %v5953_v48   ;;  %v3342_v34 = vld [vmem:[%s7084_s9 + $0x3e0] sm:$0xff]  ;;  %v3539_v45 = vld [vmem:[%s7084_s9 + $0x3e8] sm:$0xff] }
 0x3a6   : > { %3050 = vmatpush1.bf16.msra.mxu1 %v4684_v13  ;;  %3247 = vmatpush1.bf16.msra.mxu0 %v4700_v14  ;;  %v3345_v13 = vld [vmem:[%s7084_s9 + $0x560] sm:$0xff] }
 0x3a7   : > { %3051 = vmatprep.subr.bf16.mxu1 %v4683_v4  ;;  %3248 = vmatprep.subr.bf16.mxu0 %v4699_v5  ;;  %v3346_v14 = vld [vmem:[%s7084_s9 + $0x5e0] sm:$0xff]  ;;  %v3542_v4 = vld [vmem:[%s7084_s9 + $0x568] sm:$0xff] }
 0x3a8   : > { %3069 = vmatprep.mubr.bf16.mxu1 %v7134_v56  ;;  %3266 = vmatprep.mubr.bf16.mxu0 %v7134_v56  ;;  %v3543_v5 = vld [vmem:[%s7084_s9 + $0x5e8] sm:$0xff]  ;;  %v4725_v16 = vcombine.high %v3345_v13, %v3346_v14  ;;  %v4724_v53 = vcombine.low %v3345_v13, %v3346_v14  ;;  %v4737_v13 = vcombine.high %v3538_v36, %v3539_v45  ;;  %v3339_v14 = vld [vmem:[%s7084_s9 + $0x260] sm:$0xff] }
 0x3a9   : > { %5046 = vset.pattern.permute.xlu1 %v7118_v28  ;;  %5051 = vset.pattern.permute.xlu0 %v7116_v44  ;;  %v4741_v51 = vcombine.high %v3542_v4, %v3543_v5  ;;  %v3731_v44 = vld [vmem:[%s7084_s9 + $0x170] sm:$0xff] }
 0x3aa   : > { %3706 = vperm.xlu1 %5046, %v5953_v48   ;;  %1322 = vperm.xlu0 %5051, %v6240_v27  }
 0x3ab   : > { %3052 = vmatpush1.bf16.msra.mxu1 %v4682_v23  ;;  %3249 = vmatpush1.bf16.msra.mxu0 %v4698_v24  ;;  %v4740_v23 = vcombine.low %v3542_v4, %v3543_v5  ;;  %v3344_v24 = vld [vmem:[%s7084_s9 + $0x4e0] sm:$0xff] }
 0x3ac   : > { %3431 = vmatprep.subr.bf16.mxu1 %v4729_v25  ;;  %3628 = vmatprep.subr.bf16.mxu0 %v4745_v26  ;;  %v3540_v25 = vld [vmem:[%s7084_s9 + $0x468] sm:$0xff]  ;;  %v3340_v5 = vld [vmem:[%s7084_s9 + $0x2e0] sm:$0xff] }
 0x3ad   : > { %v3541_v26 = vld [vmem:[%s7084_s9 + $0x4e8] sm:$0xff] }
 0x3ae   : > { %3070 = vmatmul.mubr.bf16.vlgmr.msra.gmra.mxu1 %v5664_v12  ;;  %3267 = vmatmul.mubr.bf16.vlgmr.msra.gmra.mxu0 %v5664_v12 }
 0x3af   : > { %5048 = vset.pattern.permute.xlu1 %v7124_v0  ;;  %5053 = vset.pattern.permute.xlu0 %v7110_v32 }
 0x3b0   : > { %3432 = vmatpush1.bf16.msra.mxu1 %v4728_v46  ;;  %3629 = vmatpush1.bf16.msra.mxu0 %v4744_v60  ;;  %v6308_v46 = vpop.f32.mrf.mxu1  ;;  %v4723_v60 = vcombine.high %v3343_v52, %v3344_v24 }
 0x3b1   : > { %3903 = vperm.xlu1 %5048, %v5953_v48   ;;  %1519 = vperm.xlu0 %5053, %v6240_v27  }
 0x3b2   : > { %3433 = vmatprep.subr.bf16.mxu1 %v4727_v61  ;;  %3630 = vmatprep.subr.bf16.mxu0 %v4743_v63  ;;  %v4739_v61 = vcombine.high %v3540_v25, %v3541_v26  ;;  %v4722_v63 = vcombine.low %v3343_v52, %v3344_v24  ;;  %v6315_v4 = vpop.f32.mrf.mxu1  ;;  %v4720_v52 = vcombine.low %v3341_v29, %v3342_v34 }
 0x3b3   : > { %3079 = vmatprep.mubr.bf16.mxu1 %v7134_v56  ;;  %3276 = vmatprep.mubr.bf16.mxu0 %v7134_v56 }
 0x3b4   : > { %3434 = vmatpush1.bf16.msra.mxu1 %v4726_v1  ;;  %3631 = vmatpush1.bf16.msra.mxu0 %v4742_v2  ;;  %v4738_v1 = vcombine.low %v3540_v25, %v3541_v26  ;;  %v4721_v2 = vcombine.high %v3341_v29, %v3342_v34  ;;  %v6328_v25 = vpop.f32.mrf.mxu1  ;;  %v3337_v26 = vld [vmem:[%s7084_s9 + $0x160] sm:$0xff]  ;;  %v3534_v34 = vld [vmem:[%s7084_s9 + $0x168] sm:$0xff] }
 0x3b5   : > { %5049 = vset.pattern.permute.xlu1 %v7134_v56  ;;  %5055 = vset.pattern.permute.xlu0 %v7106_v55  ;;  %v3338_v29 = vld [vmem:[%s7084_s9 + $0x1e0] sm:$0xff] }
 0x3b6   : > { %1716 = vperm.xlu0 %5055, %v6240_v27   ;;  %1123 = vperm.xlu1 %5049, %v6240_v27  }
 0x3b7   : > { %3080 = vmatmul.mubr.bf16.gmra.mxu1 %v5700_v50  ;;  %3277 = vmatmul.mubr.bf16.gmra.mxu0 %v5700_v50 }
 0x3b8   : > { %3435 = vmatprep.subr.bf16.mxu1 %v4725_v16  ;;  %3632 = vmatprep.subr.bf16.mxu0 %v4741_v51  ;;  %v3536_v16 = vld [vmem:[%s7084_s9 + $0x268] sm:$0xff] }
 0x3b9   : > { %3436 = vmatpush1.bf16.msra.mxu1 %v4724_v53  ;;  %3633 = vmatpush1.bf16.msra.mxu0 %v4740_v23  ;;  %v3537_v51 = vld [vmem:[%s7084_s9 + $0x2e8] sm:$0xff]  ;;  %v4736_v53 = vcombine.low %v3538_v36, %v3539_v45  ;;  %v4719_v23 = vcombine.high %v3339_v14, %v3340_v5  ;;  %v4718_v45 = vcombine.low %v3339_v14, %v3340_v5  ;;  %v3336_v5 = vld [vmem:[%s7084_s9 + $0xe0] sm:$0xff] }
 0x3ba   : > { %5057 = vset.pattern.permute.xlu0 %v7100_v8  ;;  %5050 = vset.pattern.permute.xlu1 %v5214_v33  ;;  %v4735_v24 = vcombine.high %v3536_v16, %v3537_v51  ;;  %v3535_v36 = vld [vmem:[%s7084_s9 + $0x1e8] sm:$0xff]  ;;  %v3735_v8 = vld [vmem:[%s7084_s9 + $0x370] sm:$0xff] }
 0x3bb   : > { %1913 = vperm.xlu0 %5057, %v6240_v27   ;;  %1149 = vperm.xlu1 %5050, %v6240_v27   ;;  %v4732_v14 = vcombine.low %v3534_v34, %v3535_v36 }
 0x3bc   : > { %3437 = vmatprep.subr.bf16.mxu1 %v4723_v60  ;;  %3634 = vmatprep.subr.bf16.mxu0 %v4739_v61  ;;  %v4734_v60 = vcombine.low %v3536_v16, %v3537_v51  ;;  %v6346_v61 = vpop.f32.mrf.mxu1  ;;  %v3532_v16 = vld [vmem:[%s7084_s9 + $0x68] sm:$0xff] }
 0x3bd   : > { %3438 = vmatpush1.bf16.msra.mxu1 %v4722_v63  ;;  %3635 = vmatpush1.bf16.msra.mxu0 %v4738_v1  ;;  %v4717_v63 = vcombine.high %v3337_v26, %v3338_v29  ;;  %v4733_v1 = vcombine.high %v3534_v34, %v3535_v36  ;;  %v3533_v51 = vld [vmem:[%s7084_s9 + $0xe8] sm:$0xff] }
 0x3be   : > { %3439 = vmatprep.subr.bf16.mxu1 %v4721_v2  ;;  %3636 = vmatprep.subr.bf16.mxu0 %v4737_v13  ;;  %v3335_v2 = vld [vmem:[%s7084_s9 + $0x60] sm:$0xff]  ;;  %v4716_v13 = vcombine.low %v3337_v26, %v3338_v29  ;;  %v3941_v26 = vld [vmem:[%s7084_s9 + $0x7f8] sm:$0xff]  ;;  %v4731_v34 = vcombine.high %v3532_v16, %v3533_v51 }
 0x3bf   : > { %5059 = vset.pattern.permute.xlu0 %v7096_v22  ;;  %5052 = vset.pattern.permute.xlu1 %v7147_v58  ;;  %v4715_v29 = vcombine.high %v3335_v2, %v3336_v5  ;;  %v4714_v36 = vcombine.low %v3335_v2, %v3336_v5  ;;  %v3742_v2 = vld [vmem:[%s7084_s9 + $0x6f0] sm:$0xff]  ;;  %v3939_v5 = vld [vmem:[%s7084_s9 + $0x6f8] sm:$0xff] }
 0x3c0   : > { %2110 = vperm.xlu0 %5059, %v6240_v27   ;;  %1346 = vperm.xlu1 %5052, %v6240_v27  }
 0x3c1   : > { %3440 = vmatpush1.bf16.msra.mxu1 %v4720_v52  ;;  %3637 = vmatpush1.bf16.msra.mxu0 %v4736_v53  ;;  %v3743_v52 = vld [vmem:[%s7084_s9 + $0x770] sm:$0xff]  ;;  %v6369_v53 = vpop.f32.mrf.mxu1 }
 0x3c2   : > { %3441 = vmatprep.subr.bf16.mxu1 %v4719_v23  ;;  %3638 = vmatprep.subr.bf16.mxu0 %v4735_v24  ;;  %7159 = vst [vmem:[#allocation9_spill] sm:$0xff] %v6369_v53  ;;  %v3744_v23 = vld [vmem:[%s7084_s9 + $0x7f0] sm:$0xff]  ;;  %v3940_v24 = vld [vmem:[%s7084_s9 + $0x778] sm:$0xff] }
 0x3c3   : > { %3463 = vmatprep.mubr.bf16.mxu1 %v7134_v56  ;;  %3660 = vmatprep.mubr.bf16.mxu0 %v7134_v56 }
 0x3c4   : > { %5061 = vset.pattern.permute.xlu0 %v7094_v30  ;;  %5054 = vset.pattern.permute.xlu1 %v7122_v9 }
 0x3c5   : > { %3442 = vmatpush1.bf16.msra.mxu1 %v4718_v45  ;;  %3639 = vmatpush1.bf16.msra.mxu0 %v4734_v60  ;;  %v4730_v45 = vcombine.low %v3532_v16, %v3533_v51  ;;  %v4761_v60 = vcombine.high %v3743_v52, %v3744_v23  ;;  %v4760_v51 = vcombine.low %v3743_v52, %v3744_v23  ;;  %v3740_v52 = vld [vmem:[%s7084_s9 + $0x5f0] sm:$0xff]  ;;  %v3936_v23 = vld [vmem:[%s7084_s9 + $0x578] sm:$0xff] }
 0x3c6   : > { %2307 = vperm.xlu0 %5061, %v6240_v27   ;;  %1543 = vperm.xlu1 %5054, %v6240_v27  }
 0x3c7   : > { %3443 = vmatprep.subr.bf16.mxu1 %v4717_v63  ;;  %3640 = vmatprep.subr.bf16.mxu0 %v4733_v1  ;;  %v4777_v63 = vcombine.high %v3940_v24, %v3941_v26 }
 0x3c9   : > { %3444 = vmatpush1.bf16.msra.mxu1 %v4716_v13  ;;  %3641 = vmatpush1.bf16.msra.mxu0 %v4732_v14  ;;  %v3741_v13 = vld [vmem:[%s7084_s9 + $0x670] sm:$0xff]  ;;  %v3938_v14 = vld [vmem:[%s7084_s9 + $0x678] sm:$0xff] }
 0x3ca   : > { %5063 = vset.pattern.permute.xlu0 %v7092_v57  ;;  %5056 = vset.pattern.permute.xlu1 %v7120_v49  ;;  %v6382_v1 = vpop.f32.mrf.mxu1  ;;  %v6384_v43 = vpop.f32.mrf.mxu0  ;;  %v4759_v38 = vcombine.high %v3741_v13, %v3742_v2  ;;  %v4775_v57 = vcombine.high %v3938_v14, %v3939_v5 }
 0x3cb   : > { %2504 = vperm.xlu0 %5063, %v6240_v27   ;;  %1740 = vperm.xlu1 %5056, %v6240_v27  }
 0x3cc   : > { %3445 = vmatprep.subr.bf16.mxu1 %v4715_v29  ;;  %3642 = vmatprep.subr.bf16.mxu0 %v4731_v34  ;;  %v6400_v16 = vpop.f32.mrf.mxu1  ;;  %v4776_v29 = vcombine.low %v3940_v24, %v3941_v26  ;;  %v6402_v34 = vpop.f32.mrf.mxu0  ;;  %v3937_v24 = vld [vmem:[%s7084_s9 + $0x5f8] sm:$0xff] }
 0x3cd   : > { %3446 = vmatpush1.bf16.msra.mxu1 %v4714_v36  ;;  %3643 = vmatpush1.bf16.msra.mxu0 %v4730_v45  ;;  %v3739_v36 = vld [vmem:[%s7084_s9 + $0x570] sm:$0xff]  ;;  %v4758_v45 = vcombine.low %v3741_v13, %v3742_v2  ;;  %v4773_v22 = vcombine.high %v3936_v23, %v3937_v24  ;;  %v3935_v2 = vld [vmem:[%s7084_s9 + $0x4f8] sm:$0xff] }
 0x3ce   : > { %3825 = vmatprep.subr.bf16.mxu1 %v4761_v60  ;;  %4022 = vmatprep.subr.bf16.mxu0 %v4777_v63  ;;  %v6422_v26 = vpop.f32.mrf.mxu1  ;;  %v4774_v60 = vcombine.low %v3938_v14, %v3939_v5  ;;  %v6424_v63 = vpop.f32.mrf.mxu0  ;;  %v4757_v30 = vcombine.high %v3739_v36, %v3740_v52  ;;  %v4756_v5 = vcombine.low %v3739_v36, %v3740_v52  ;;  %v3736_v52 = vld [vmem:[%s7084_s9 + $0x3f0] sm:$0xff] }
 0x3cf   : > { %5067 = vset.pattern.permute.xlu0 %v7104_v19  ;;  %5058 = vset.pattern.permute.xlu1 %v7114_v31 }
 0x3d0   : > { %2898 = vperm.xlu0 %5067, %v6240_v27   ;;  %1937 = vperm.xlu1 %5058, %v6240_v27   ;;  %v6433_v13 = vpop.f32.mrf.mxu1  ;;  %v6444_v14 = vpop.f32.mrf.mxu0 }
 0x3d1   : > { %3464 = vmatmul.mubr.bf16.vlgmr.msra.gmra.mxu1 %v5664_v12  ;;  %3661 = vmatmul.mubr.bf16.vlgmr.msra.gmra.mxu0 %v5664_v12 }
 0x3d2   : > { %3826 = vmatpush1.bf16.msra.mxu1 %v4760_v51  ;;  %4023 = vmatpush1.bf16.msra.mxu0 %v4776_v29  ;;  %v3737_v51 = vld [vmem:[%s7084_s9 + $0x470] sm:$0xff]  ;;  %v4772_v29 = vcombine.low %v3936_v23, %v3937_v24  ;;  %v6457_v36 = vpop.f32.mrf.mxu0  ;;  %v3932_v23 = vld [vmem:[%s7084_s9 + $0x378] sm:$0xff] }
 0x3d3   : > { %3827 = vmatprep.subr.bf16.mxu1 %v4759_v38  ;;  %4024 = vmatprep.subr.bf16.mxu0 %v4775_v57  ;;  %v3738_v38 = vld [vmem:[%s7084_s9 + $0x4f0] sm:$0xff]  ;;  %v3934_v57 = vld [vmem:[%s7084_s9 + $0x478] sm:$0xff] }
 0x3d4   : > { %5070 = vset.pattern.permute.xlu0 %v7098_v3  ;;  %5060 = vset.pattern.permute.xlu1 %v7112_v59  ;;  %v6450_v3 = vpop.f32.mrf.mxu1  ;;  %v3933_v24 = vld [vmem:[%s7084_s9 + $0x3f8] sm:$0xff]  ;;  %v6487_v55 = vpop.f32.mrf.mxu0 }
 0x3d5   : > { %3119 = vperm.xlu0 %5070, %v6240_v27   ;;  %2134 = vperm.xlu1 %5060, %v6240_v27  }
 0x3d6   : > { %3828 = vmatpush1.bf16.msra.mxu1 %v4758_v45  ;;  %4025 = vmatpush1.bf16.msra.mxu0 %v4774_v60  ;;  %v4755_v45 = vcombine.high %v3737_v51, %v3738_v38  ;;  %v4771_v60 = vcombine.high %v3934_v57, %v3935_v2 }
 0x3d7   : > { %3473 = vmatprep.mubr.bf16.mxu1 %v7134_v56  ;;  %3670 = vmatprep.mubr.bf16.mxu0 %v7134_v56 }
 0x3d8   : > { %3829 = vmatprep.subr.bf16.mxu1 %v4757_v30  ;;  %4026 = vmatprep.subr.bf16.mxu0 %v4773_v22  ;;  %v4754_v22 = vcombine.low %v3737_v51, %v3738_v38  ;;  %v4770_v30 = vcombine.low %v3934_v57, %v3935_v2  ;;  %v3733_v38 = vld [vmem:[%s7084_s9 + $0x270] sm:$0xff]  ;;  %v3930_v2 = vld [vmem:[%s7084_s9 + $0x278] sm:$0xff] }
 0x3d9   : > { %3474 = vmatmul.mubr.bf16.gmra.mxu1 %v5700_v50  ;;  %3671 = vmatmul.mubr.bf16.gmra.mxu0 %v5700_v50  ;;  %v3734_v57 = vld [vmem:[%s7084_s9 + $0x2f0] sm:$0xff] }
 0x3da   : > { %5073 = vset.pattern.permute.xlu0 %v7102_v47  ;;  %5062 = vset.pattern.permute.xlu1 %v7108_v11  ;;  %v4751_v11 = vcombine.high %v3733_v38, %v3734_v57 }
 0x3db   : > { %3830 = vmatpush1.bf16.msra.mxu1 %v4756_v5  ;;  %4027 = vmatpush1.bf16.msra.mxu0 %v4772_v29  ;;  %v1319_v47 = vpop.permute.xlu1 %1318  ;;  %v1119_v19 = vpop.permute.xlu0 %1118  ;;  %v3931_v5 = vld [vmem:[%s7084_s9 + $0x2f8] sm:$0xff] }
 0x3dc   : > { %3489 = vperm.xlu0 %5073, %v6240_v27   ;;  %2331 = vperm.xlu1 %5062, %v6240_v27   ;;  %v1136_v51 = vmul.f32 %v1119_v19, %v6382_v1  ;;  %v6483_v29 = vpop.f32.mrf.mxu1  ;;  %v4753_v19 = vcombine.high %v3735_v8, %v3736_v52  ;;  %v4769_v1 = vcombine.high %v3932_v23, %v3933_v24 }
 0x3dd   : > { %3831 = vmatprep.subr.bf16.mxu1 %v4755_v45  ;;  %4028 = vmatprep.subr.bf16.mxu0 %v4771_v60  ;;  %v4752_v45 = vcombine.low %v3735_v8, %v3736_v52  ;;  %v4768_v60 = vcombine.low %v3932_v23, %v3933_v24  ;;  %v4767_v32 = vcombine.high %v3930_v2, %v3931_v5  ;;  %v3928_v52 = vld [vmem:[%s7084_s9 + $0x178] sm:$0xff] }
 0x3de   : > { %3857 = vmatprep.mubr.bf16.mxu1 %v7134_v56  ;;  %4054 = vmatprep.mubr.bf16.mxu0 %v7134_v56  ;;  %v1140_v8 = vadd.f32 %v1136_v51, %v6225_v17  ;;  %v3929_v23 = vld [vmem:[%s7084_s9 + $0x1f8] sm:$0xff]  ;;  %v6507_v24 = vpop.f32.mrf.mxu1  ;;  %v4766_v17 = vcombine.low %v3930_v2, %v3931_v5  ;;  %v6510_v51 = vpop.f32.mrf.mxu0 }
 0x3df   : > { %3832 = vmatpush1.bf16.msra.mxu1 %v4754_v22  ;;  %4029 = vmatpush1.bf16.msra.mxu0 %v4770_v30  ;;  %v3732_v30 = vld [vmem:[%s7084_s9 + $0x1f0] sm:$0xff]  ;;  %7160 = vst [vmem:[#allocation10_spill] sm:$0xff] %v6507_v24  ;;  %7161 = vst [vmem:[#allocation11_spill] sm:$0xff] %v6510_v51  ;;  %v4765_v9 = vcombine.high %v3928_v52, %v3929_v23  ;;  %v3927_v2 = vld [vmem:[%s7084_s9 + $0xf8] sm:$0xff]  ;;  %v7193_v24 = vmov 17  }
 0x3e0   : > { %5076 = vset.pattern.permute.xlu0 %v7118_v28  ;;  %5064 = vset.pattern.permute.xlu1 %v7133_v20  ;;  %v1516_v59 = vpop.permute.xlu1 %1515  ;;  %v1146_v31 = vpop.permute.xlu0 %1145  ;;  %v4750_v28 = vcombine.low %v3733_v38, %v3734_v57  ;;  %v4749_v49 = vcombine.high %v3731_v44, %v3732_v30  ;;  %v3729_v38 = vld [vmem:[%s7084_s9 + $0x70] sm:$0xff] }
 0x3e1   : > { %3710 = vperm.xlu0 %5076, %v6240_v27   ;;  %2528 = vperm.xlu1 %5064, %v6240_v27   ;;  %v1160_v22 = vmul.f32 %v1146_v31, %v6400_v16  ;;  %v1333_v31 = vmul.f32 %v1319_v47, %v6384_v43  ;;  %v6517_v57 = vpop.f32.mrf.mxu1  ;;  %v3926_v47 = vld [vmem:[%s7084_s9 + $0x78] sm:$0xff] }
 0x3e2   : > { %3833 = vmatprep.subr.bf16.mxu1 %v4753_v19  ;;  %4030 = vmatprep.subr.bf16.mxu0 %v4769_v1  ;;  %7162 = vst [vmem:[#allocation12_spill] sm:$0xff] %v6517_v57  ;;  %v6531_v19 = vpop.f32.mrf.mxu0  ;;  %v4748_v1 = vcombine.low %v3731_v44, %v3732_v30 }
 0x3e3   : > { %3834 = vmatpush1.bf16.msra.mxu1 %v4752_v45  ;;  %4031 = vmatpush1.bf16.msra.mxu0 %v4768_v60  ;;  %v1164_v16 = vadd.f32 %v1160_v22, %v1140_v8  ;;  %7163 = vst [vmem:[#allocation13_spill] sm:$0xff] %v6531_v19  ;;  %v4764_v45 = vcombine.low %v3928_v52, %v3929_v23 }
 0x3e4   : > { %3835 = vmatprep.subr.bf16.mxu1 %v4751_v11  ;;  %4032 = vmatprep.subr.bf16.mxu0 %v4767_v32  ;;  %v3730_v32 = vld [vmem:[%s7084_s9 + $0xf0] sm:$0xff]  ;;  %v4763_v22 = vcombine.high %v3926_v47, %v3927_v2 }
 0x3e5   : > { %5079 = vset.pattern.permute.xlu0 %v7134_v56  ;;  %5065 = vset.pattern.permute.xlu1 %v7145_v41  ;;  %v1337_v0 = vadd.f32 %v1333_v31, %v1164_v16  ;;  %v4747_v8 = vcombine.high %v3729_v38, %v3730_v32  ;;  %v4746_v44 = vcombine.low %v3729_v38, %v3730_v32 }
 0x3e6   : > { %2701 = vperm.xlu1 %5065, %v6240_v27   ;;  %1128 = vperm.xlu0 %5079, %v6315_v4   ;;  %v1713_v43 = vpop.permute.xlu1 %1712  ;;  %v1343_v11 = vpop.permute.xlu0 %1342 }
 0x3e7   : > { %3836 = vmatpush1.bf16.msra.mxu1 %v4750_v28  ;;  %4033 = vmatpush1.bf16.msra.mxu0 %v4766_v17  ;;  %v1357_v5 = vmul.f32 %v1343_v11, %v6402_v34 }
 0x3e8   : > { %3837 = vmatprep.subr.bf16.mxu1 %v4749_v49  ;;  %4034 = vmatprep.subr.bf16.mxu0 %v4765_v9  ;;  %v4762_v49 = vcombine.low %v3926_v47, %v3927_v2 }
 0x3e9   : > { %v1361_v60 = vadd.f32 %v1357_v5, %v1337_v0 }
 0x3ea   : > { %5066 = vset.pattern.permute.xlu1 %v7142_v10  ;;  %5094 = vset.pattern.permute.xlu0 %v7133_v20  ;;  %v1495_v31 = vpop.f32.mrf.mxu1  ;;  %v1692_v34 = vpop.f32.mrf.mxu0 }
 0x3eb   : > { %2725 = vperm.xlu1 %5066, %v6240_v27   ;;  %2532 = vperm.xlu0 %5094, %v6315_v4   ;;  %v1530_v28 = vmul.f32 %v1516_v59, %v1495_v31  ;;  %v1727_v59 = vmul.f32 %v1713_v43, %v1692_v34 }
 0x3ec   : > { %3838 = vmatpush1.bf16.msra.mxu1 %v4748_v1  ;;  %4035 = vmatpush1.bf16.msra.mxu0 %v4764_v45  ;;  %v6537_v30 = vpop.permute.xlu1 %1909  ;;  %v1540_v9 = vpop.permute.xlu0 %1539 }
 0x3ed   : > { %3839 = vmatprep.subr.bf16.mxu1 %v4747_v8  ;;  %4036 = vmatprep.subr.bf16.mxu0 %v4763_v22  ;;  %v1534_v0 = vadd.f32 %v1530_v28, %v1361_v60  ;;  %v1497_v52 = vpop.f32.mrf.mxu1  ;;  %v1694_v17 = vpop.f32.mrf.mxu0 }
 0x3ee   : > { %v1554_v23 = vmul.f32 %v1540_v9, %v1497_v52 }
 0x3ef   : > { %5068 = vset.pattern.permute.xlu1 %v7132_v7  ;;  %5098 = vset.pattern.permute.xlu0 %v7132_v7  ;;  %v6541_v11 = vpop.f32.mrf.mxu1  ;;  %v6543_v38 = vpop.f32.mrf.mxu0 }
 0x3f0   : > { %3840 = vmatpush1.bf16.msra.mxu1 %v4746_v44  ;;  %4037 = vmatpush1.bf16.msra.mxu0 %v4762_v49  ;;  %v1558_v16 = vadd.f32 %v1554_v23, %v1534_v0 }
 0x3f1   : > { %2922 = vperm.xlu1 %5068, %v6240_v27   ;;  %2926 = vperm.xlu0 %5098, %v6315_v4   ;;  %v6547_v32 = vpop.permute.xlu1 %2106  ;;  %v1737_v47 = vpop.permute.xlu0 %1736 }
 0x3f2   : > { %v1731_v2 = vadd.f32 %v1727_v59, %v1558_v16  ;;  %v1751_v5 = vmul.f32 %v1737_v47, %v1694_v17  ;;  %4908 = vmatprep.subr.bf16.mxu1 %v7126_v62  ;;  %v6554_v1 = vpop.f32.mrf.mxu1  ;;  %v6556_v45 = vpop.f32.mrf.mxu0 }
 0x3f3   : > { %3858 = vmatmul.mubr.bf16.vlgmr.msra.gmra.mxu1 %v5664_v12  ;;  %4055 = vmatmul.mubr.bf16.vlgmr.msra.gmra.mxu0 %v5664_v12 }
 0x3f4   : > { %v1755_v43 = vadd.f32 %v1751_v5, %v1731_v2  ;;  %3867 = vmatprep.mubr.bf16.mxu1 %v7134_v56  ;;  %4064 = vmatprep.mubr.bf16.mxu0 %v7134_v56  ;;  %v6564_v8 = vpop.f32.mrf.mxu1  ;;  %v6566_v22 = vpop.f32.mrf.mxu0 }
 0x3f5   : > { %5069 = vset.pattern.permute.xlu1 %v7140_v39  ;;  %5101 = vset.pattern.permute.xlu0 %v7131_v21 }
 0x3f6   : > { %3095 = vperm.xlu1 %5069, %v6240_v27   ;;  %3296 = vperm.xlu0 %5101, %v6315_v4   ;;  %v6562_v60 = vpop.permute.xlu1 %2303  ;;  %v1934_v12 = vpop.permute.xlu0 %1933 }
 0x3f7   : > { %v6576_v34 = vpop.f32.mrf.mxu1  ;;  %v6578_v44 = vpop.f32.mrf.mxu0 }
 0x3f9   : > { %v6584_v49 = vpop.f32.mrf.mxu1  ;;  %v6586_v9 = vpop.f32.mrf.mxu0 }
 0x3fa   : > { %5071 = vset.pattern.permute.xlu1 %v7131_v21  ;;  %5104 = vset.pattern.permute.xlu0 %v7130_v54  ;;  %7164 = vst [vmem:[#allocation14_spill] sm:$0xff] %v6584_v49  ;;  %7165 = vst [vmem:[#allocation15_spill] sm:$0xff] %v6586_v9 }
 0x3fb   : > { %3292 = vperm.xlu1 %5071, %v6240_v27   ;;  %3517 = vperm.xlu0 %5104, %v6315_v4   ;;  %v6572_v31 = vpop.permute.xlu1 %2500  ;;  %v2131_v28 = vpop.permute.xlu0 %2130 }
 0x3fc   : > { %3868 = vmatmul.mubr.bf16.gmra.mxu1 %v5700_v50  ;;  %4065 = vmatmul.mubr.bf16.gmra.mxu0 %v5700_v50  ;;  %v7128_v50 = vmov 31   ;;  %v6596_v23 = vpop.f32.mrf.mxu1  ;;  %v6598_v17 = vpop.f32.mrf.mxu0 }
 0x3fd   : > { %7166 = vst [vmem:[#allocation16_spill] sm:$0xff] %v6596_v23  ;;  %7167 = vst [vmem:[#allocation17_spill] sm:$0xff] %v6598_v17 }
 0x3ff   : > { %5072 = vset.pattern.permute.xlu1 %v7138_v18  ;;  %5107 = vset.pattern.permute.xlu0 %v7144_v15 }
 0x400   : > { %3316 = vperm.xlu1 %5072, %v6240_v27   ;;  %3887 = vperm.xlu0 %5107, %v6315_v4  }
 0x401   : > { %v6588_v0 = vpop.permute.xlu1 %2721  ;;  %v6590_v52 = vpop.permute.xlu0 %2327 }
 0x404   : > { %5074 = vset.pattern.permute.xlu1 %v7130_v54  ;;  %5110 = vset.pattern.permute.xlu0 %v7128_v50 }
 0x405   : > { %3513 = vperm.xlu1 %5074, %v6240_v27   ;;  %4108 = vperm.xlu0 %5110, %v6315_v4  }
 0x406   : > { %v6600_v59 = vpop.permute.xlu1 %2894  ;;  %v6602_v16 = vpop.permute.xlu0 %2524 }
 0x409   : > { %5075 = vset.pattern.permute.xlu1 %v7136_v6  ;;  %5112 = vset.pattern.permute.xlu0 %v5214_v33 }
 0x40a   : > { %3686 = vperm.xlu1 %5075, %v6240_v27   ;;  %1157 = vperm.xlu0 %5112, %v6346_v61   ;;  %v1889_v47 = vpop.f32.mrf.mxu1  ;;  %v2086_v2 = vpop.f32.mrf.mxu0 }
 0x40b   : > { %v6608_v5 = vpop.permute.xlu1 %3091  ;;  %v6610_v62 = vpop.permute.xlu0 %2697  ;;  %v1924_v50 = vmul.f32 %v6537_v30, %v1889_v47  ;;  %v2121_v6 = vmul.f32 %v6547_v32, %v2086_v2 }
 0x40c   : > { %7168 = vst [vmem:[#allocation18_spill] sm:$0xff] %v6608_v5  ;;  %v1891_v54 = vpop.f32.mrf.mxu1  ;;  %v2088_v21 = vpop.f32.mrf.mxu0 }
 0x40d   : > { %v1928_v7 = vadd.f32 %v1924_v50, %v1755_v43  ;;  %v1948_v20 = vmul.f32 %v1934_v12, %v1891_v54  ;;  %v2145_v56 = vmul.f32 %v2131_v28, %v2088_v21  ;;  %v7170_v21 = vmov 29  }
 0x40e   : > { %5077 = vset.pattern.permute.xlu1 %v7144_v15  ;;  %5114 = vset.pattern.permute.xlu0 %v7147_v58  ;;  %v6622_v47 = vpop.f32.mrf.mxu1  ;;  %v6624_v54 = vpop.f32.mrf.mxu0  ;;  %v7171_v43 = vmov 5   ;;  %v7178_v15 = vmov 9  }
 0x40f   : > { %3883 = vperm.xlu1 %5077, %v6240_v27   ;;  %1354 = vperm.xlu0 %5114, %v6346_v61   ;;  %v1952_v18 = vadd.f32 %v1948_v20, %v1928_v7 }
 0x410   : > { %v6618_v39 = vpop.permute.xlu1 %3115  ;;  %v6620_v10 = vpop.permute.xlu0 %2918 }
 0x411   : > { %7169 = vst [vmem:[#allocation19_spill] sm:$0xff] %v6618_v39  ;;  %v2125_v30 = vadd.f32 %v2121_v6, %v1952_v18  ;;  %v6630_v32 = vpop.f32.mrf.mxu1  ;;  %v6632_v20 = vpop.f32.mrf.mxu0  ;;  %v7174_v6 = vmov 7  }
 0x413   : > { %5078 = vset.pattern.permute.xlu1 %v7170_v21  ;;  %5116 = vset.pattern.permute.xlu0 %v7171_v43  ;;  %v2149_v12 = vadd.f32 %v2145_v56, %v2125_v30  ;;  %v6642_v56 = vpop.f32.mrf.mxu1  ;;  %v6644_v28 = vpop.f32.mrf.mxu0  ;;  %v7177_v30 = vmov 2  }
 0x414   : > { %3907 = vperm.xlu1 %5078, %v6240_v27   ;;  %1551 = vperm.xlu0 %5116, %v6346_v61  }
 0x415   : > { %v6652_v41 = vpop.f32.mrf.mxu1 }
 0x416   : > { %v6634_v7 = vpop.permute.xlu1 %3312  ;;  %v6636_v18 = vpop.permute.xlu0 %3288 }
 0x417   : > { %7172 = vst [vmem:[#allocation20_spill] sm:$0xff] %v6634_v7  ;;  %7173 = vst [vmem:[#allocation21_spill] sm:$0xff] %v6636_v18  ;;  %v6662_v18 = vpop.f32.mrf.mxu1 }
 0x418   : > { %5080 = vset.pattern.permute.xlu1 %v5214_v33  ;;  %5118 = vset.pattern.permute.xlu0 %v7174_v6  ;;  %v6656_v33 = vpop.f32.mrf.mxu0  ;;  %7181 = vst [vmem:[#allocation26_spill] sm:$0xff] %v6662_v18 }
 0x419   : > { %1153 = vperm.xlu1 %5080, %v6315_v4   ;;  %1748 = vperm.xlu0 %5118, %v6346_v61   ;;  %v6670_v5 = vpop.f32.mrf.mxu1 }
 0x41a   : > { %v6668_v39 = vpop.f32.mrf.mxu0  ;;  %7185 = vst [vmem:[#allocation28_spill] sm:$0xff] %v6670_v5 }
 0x41b   : > { %v6646_v50 = vpop.permute.xlu1 %3485  ;;  %v6648_v2 = vpop.permute.xlu0 %3509  ;;  %7184 = vst [vmem:[#allocation27_spill] sm:$0xff] %v6668_v39  ;;  %v7190_v39 = vmov 16  }
 0x41c   : > { %7175 = vst [vmem:[#allocation22_spill] sm:$0xff] %v6646_v50  ;;  %7176 = vst [vmem:[#allocation23_spill] sm:$0xff] %v6648_v2  ;;  %v7182_v50 = vmov 3   ;;  %v7183_v2 = vmov 11   ;;  %v6676_v18 = vpop.f32.mrf.mxu0 }
 0x41d   : > { %5081 = vset.pattern.permute.xlu1 %v7177_v30  ;;  %5120 = vset.pattern.permute.xlu0 %v7178_v15  ;;  %7189 = vst [vmem:[#allocation30_spill] sm:$0xff] %v6676_v18 }
 0x41e   : > { %1326 = vperm.xlu1 %5081, %v6315_v4   ;;  %1945 = vperm.xlu0 %5120, %v6346_v61  }
 0x420   : > { %v6658_v58 = vpop.permute.xlu1 %3682  ;;  %v6660_v7 = vpop.permute.xlu0 %3879 }
 0x421   : > { %7179 = vst [vmem:[#allocation24_spill] sm:$0xff] %v6658_v58  ;;  %7180 = vst [vmem:[#allocation25_spill] sm:$0xff] %v6660_v7  ;;  %v7187_v58 = vmov 4   ;;  %v7188_v7 = vmov 13  }
 0x422   : > { %5082 = vset.pattern.permute.xlu1 %v7182_v50  ;;  %5122 = vset.pattern.permute.xlu0 %v7183_v2 }
 0x423   : > { %1350 = vperm.xlu1 %5082, %v6315_v4   ;;  %2142 = vperm.xlu0 %5122, %v6346_v61  }
 0x425   : > { %v6672_v17 = vpop.permute.xlu1 %3706  ;;  %v1323_v9 = vpop.permute.xlu0 %1322 }
 0x426   : > { %7186 = vst [vmem:[#allocation29_spill] sm:$0xff] %v6672_v17 }
 0x427   : > { %5083 = vset.pattern.permute.xlu1 %v7187_v58  ;;  %5124 = vset.pattern.permute.xlu0 %v7188_v7 }
 0x428   : > { %1523 = vperm.xlu1 %5083, %v6315_v4   ;;  %2339 = vperm.xlu0 %5124, %v6346_v61  }
 0x42a   : > { %v2283_v50 = vpop.f32.mrf.mxu1  ;;  %v2480_v49 = vpop.f32.mrf.mxu0 }
 0x42b   : > { %v2318_v23 = vmul.f32 %v6562_v60, %v2283_v50  ;;  %v2515_v60 = vmul.f32 %v6572_v31, %v2480_v49 }
 0x42c   : > { %5084 = vset.pattern.permute.xlu1 %v7171_v43  ;;  %5127 = vset.pattern.permute.xlu0 %v7190_v39  ;;  %v6683_v17 = vpop.permute.xlu1 %3903  ;;  %v1520_v5 = vpop.permute.xlu0 %1519  ;;  %v7192_v43 = vmov 6  }
 0x42d   : > { %7191 = vst [vmem:[#allocation31_spill] sm:$0xff] %v6683_v17  ;;  %1547 = vperm.xlu1 %5084, %v6315_v4   ;;  %2709 = vperm.xlu0 %5127, %v6346_v61   ;;  %v1531_v18 = vmul.f32 %v1520_v5, %v6541_v11  ;;  %v2322_v19 = vadd.f32 %v2318_v23, %v2149_v12  ;;  %v2285_v51 = vpop.f32.mrf.mxu1  ;;  %v2482_v57 = vpop.f32.mrf.mxu0 }
 0x42e   : > { %v2342_v53 = vmul.f32 %v6590_v52, %v2285_v51  ;;  %v2539_v5 = vmul.f32 %v6602_v16, %v2482_v57  ;;  %v7195_v16 = vmov 8  }
 0x42f   : > { %v6703_v49 = vpop.f32.mrf.mxu1 }
 0x430   : > { %v2346_v50 = vadd.f32 %v2342_v53, %v2322_v19  ;;  %v6699_v53 = vpop.f32.mrf.mxu0  ;;  %v7194_v19 = vmov 18  }
 0x431   : > { %5085 = vset.pattern.permute.xlu1 %v7192_v43  ;;  %5128 = vset.pattern.permute.xlu0 %v7193_v24  ;;  %v1717_v17 = vpop.permute.xlu0 %1716  ;;  %v1124_v48 = vpop.permute.xlu1 %1123 }
 0x432   : > { %1720 = vperm.xlu1 %5085, %v6315_v4   ;;  %2733 = vperm.xlu0 %5128, %v6346_v61   ;;  %v1728_v11 = vmul.f32 %v1717_v17, %v6543_v38  ;;  %v2519_v23 = vadd.f32 %v2515_v60, %v2346_v50  ;;  %v1137_v51 = vmul.f32 %v1124_v48, %v6422_v26  ;;  %v6709_v48 = vpop.f32.mrf.mxu1  ;;  %v6711_v26 = vpop.f32.mrf.mxu0 }
 0x433   : > { %v1334_v38 = vmul.f32 %v1323_v9, %v6424_v63  ;;  %v7197_v63 = vmov 24  }
 0x434   : > { %v6697_v52 = vadd.f32 %v2539_v5, %v2519_v23  ;;  %v1141_v12 = vadd.f32 %v1137_v51, %v6308_v46  ;;  %v6721_v23 = vpop.f32.mrf.mxu0 }
 0x436   : > { %5086 = vset.pattern.permute.xlu1 %v7174_v6  ;;  %5129 = vset.pattern.permute.xlu0 %v7194_v19  ;;  %v1150_v31 = vpop.permute.xlu1 %1149  ;;  %v7196_v6 = vmov 21  }
 0x437   : > { %1744 = vperm.xlu1 %5086, %v6315_v4   ;;  %2906 = vperm.xlu0 %5129, %v6346_v61   ;;  %v1161_v57 = vmul.f32 %v1150_v31, %v6433_v13  ;;  %v6719_v13 = vpop.f32.mrf.mxu1  ;;  %v6727_v31 = vpop.f32.mrf.mxu0 }
 0x438   : > { %7198 = vst [vmem:[#allocation32_spill] sm:$0xff] %v6727_v31 }
 0x439   : > { %v1165_v17 = vadd.f32 %v1161_v57, %v1141_v12  ;;  %v6725_v51 = vpop.f32.mrf.mxu1  ;;  %v1914_v57 = vpop.permute.xlu0 %1913 }
 0x43b   : > { %5087 = vset.pattern.permute.xlu1 %v7195_v16  ;;  %5132 = vset.pattern.permute.xlu0 %v7196_v6  ;;  %v1347_v60 = vpop.permute.xlu1 %1346  ;;  %v1338_v50 = vadd.f32 %v1334_v38, %v1165_v17  ;;  %v6732_v17 = vpop.f32.mrf.mxu1 }
 0x43c   : > { %1917 = vperm.xlu1 %5087, %v6315_v4   ;;  %3127 = vperm.xlu0 %5132, %v6346_v61   ;;  %v1358_v46 = vmul.f32 %v1347_v60, %v6444_v14  ;;  %7199 = vst [vmem:[#allocation33_spill] sm:$0xff] %v6732_v17  ;;  %v6734_v60 = vpop.f32.mrf.mxu0 }
 0x43d   : > { %7200 = vst [vmem:[#allocation34_spill] sm:$0xff] %v6734_v60  ;;  %v6741_v31 = vpop.f32.mrf.mxu1  ;;  %v7150_v60 = vmov 30  }
 0x43e   : > { %v1362_v5 = vadd.f32 %v1358_v46, %v1338_v50  ;;  %7203 = vst [vmem:[#allocation35_spill] sm:$0xff] %v6741_v31 }
 0x440   : > { %5088 = vset.pattern.permute.xlu1 %v7178_v15  ;;  %5135 = vset.pattern.permute.xlu0 %v7197_v63  ;;  %v1535_v9 = vadd.f32 %v1531_v18, %v1362_v5  ;;  %v7201_v15 = vmov 10   ;;  %v7202_v18 = vmov 27  }
 0x441   : > { %1941 = vperm.xlu1 %5088, %v6315_v4   ;;  %3497 = vperm.xlu0 %5135, %v6346_v61   ;;  %v1544_v12 = vpop.permute.xlu1 %1543 }
 0x442   : > { %v1555_v14 = vmul.f32 %v1544_v12, %v6554_v1  ;;  %v6743_v1 = vpop.f32.mrf.mxu0  ;;  %v2111_v12 = vpop.permute.xlu0 %2110 }
 0x443   : > { %7204 = vst [vmem:[#allocation36_spill] sm:$0xff] %v6743_v1 }
 0x444   : > { %v1559_v38 = vadd.f32 %v1555_v14, %v1535_v9  ;;  %v1925_v9 = vmul.f32 %v1914_v57, %v6622_v47  ;;  %v2122_v47 = vmul.f32 %v2111_v12, %v6624_v54 }
 0x445   : > { %5089 = vset.pattern.permute.xlu1 %v7201_v15  ;;  %5138 = vset.pattern.permute.xlu0 %v7202_v18 }
 0x446   : > { %2114 = vperm.xlu1 %5089, %v6315_v4   ;;  %3718 = vperm.xlu0 %5138, %v6346_v61   ;;  %v1741_v50 = vpop.permute.xlu1 %1740  ;;  %v1732_v46 = vadd.f32 %v1728_v11, %v1559_v38 }
 0x447   : > { %v1752_v5 = vmul.f32 %v1741_v50, %v6556_v45 }
 0x449   : > { %v1756_v14 = vadd.f32 %v1752_v5, %v1732_v46  ;;  %v7205_v5 = vmov 12  }
 0x44a   : > { %5090 = vset.pattern.permute.xlu1 %v7183_v2  ;;  %5141 = vset.pattern.permute.xlu0 %v7150_v60  ;;  %v2308_v2 = vpop.permute.xlu0 %2307 }
 0x44b   : > { %2138 = vperm.xlu1 %5090, %v6315_v4   ;;  %4088 = vperm.xlu0 %5141, %v6346_v61   ;;  %v1938_v11 = vpop.permute.xlu1 %1937  ;;  %v1929_v38 = vadd.f32 %v1925_v9, %v1756_v14 }
 0x44c   : > { %v1949_v45 = vmul.f32 %v1938_v11, %v6630_v32  ;;  %v2677_v50 = vpop.f32.mrf.mxu1  ;;  %v2874_v31 = vpop.f32.mrf.mxu0  ;;  %v2319_v11 = vmul.f32 %v2308_v2, %v6703_v49 }
 0x44d   : > { %v2712_v1 = vmul.f32 %v6610_v62, %v2677_v50  ;;  %v2909_v54 = vmul.f32 %v6600_v59, %v2874_v31  ;;  %v7207_v59 = vmov 14  }
 0x44e   : > { %v1953_v57 = vadd.f32 %v1949_v45, %v1929_v38  ;;  %v2679_v46 = vpop.f32.mrf.mxu1  ;;  %v2876_v14 = vpop.f32.mrf.mxu0 }
 0x44f   : > { %5091 = vset.pattern.permute.xlu1 %v7205_v5  ;;  %4080 = vperm.xlu0 %5141, %v6240_v27   ;;  %v2716_v60 = vadd.f32 %v2712_v1, %v6697_v52  ;;  %v2736_v17 = vmul.f32 %v6588_v0, %v2679_v46  ;;  %v2933_v50 = vmul.f32 %v6620_v10, %v2876_v14  ;;  %v2505_v1 = vpop.permute.xlu0 %2504 }
 0x450   : > { %2311 = vperm.xlu1 %5091, %v6315_v4   ;;  %v2135_v32 = vpop.permute.xlu1 %2134  ;;  %v2126_v9 = vadd.f32 %v2122_v47, %v1953_v57  ;;  %v2681_v57 = vpop.f32.mrf.mxu1  ;;  %v2516_v49 = vmul.f32 %v2505_v1, %v6699_v53 }
 0x451   : > { %v2146_v62 = vmul.f32 %v2135_v32, %v6632_v20  ;;  %v2740_v12 = vadd.f32 %v2736_v17, %v2716_v60  ;;  %v2878_v60 = vpop.f32.mrf.mxu0 }
 0x452   : > { %v2683_v10 = vpop.f32.mrf.mxu1 }
 0x453   : > { %v2150_v38 = vadd.f32 %v2146_v62, %v2126_v9  ;;  %v2913_v45 = vadd.f32 %v2909_v54, %v2740_v12  ;;  %v2880_v2 = vpop.f32.mrf.mxu0 }
 0x454   : > { %5092 = vset.pattern.permute.xlu1 %v7188_v7 }
 0x455   : > { %2335 = vperm.xlu1 %5092, %v6315_v4   ;;  %v6764_v0 = vadd.f32 %v2933_v50, %v2913_v45  ;;  %v2323_v52 = vadd.f32 %v2319_v11, %v2150_v38  ;;  %v2899_v45 = vpop.permute.xlu0 %2898 }
 0x457   : > { %7206 = vst [vmem:[#allocation37_spill] sm:$0xff] %v6764_v0  ;;  %v2332_v47 = vpop.permute.xlu1 %2331 }
 0x458   : > { %v2343_v20 = vmul.f32 %v2332_v47, %v6709_v48 }
 0x459   : > { %5093 = vset.pattern.permute.xlu1 %v7207_v59 }
 0x45a   : > { %v2347_v31 = vadd.f32 %v2343_v20, %v2323_v52  ;;  %2508 = vperm.xlu1 %5093, %v6315_v4   ;;  %v7209_v20 = vmov 20  }
 0x45c   : > { %v2529_v17 = vpop.permute.xlu1 %2528  ;;  %v2520_v7 = vadd.f32 %v2516_v49, %v2347_v31 }
 0x45d   : > { %v6771_v46 = vpop.f32.mrf.mxu1  ;;  %v2540_v48 = vmul.f32 %v2529_v17, %v6711_v26  ;;  %v6778_v14 = vpop.f32.mrf.mxu0  ;;  %v2910_v26 = vmul.f32 %v2899_v45, %v2878_v60 }
 0x45e   : > { %5095 = vset.pattern.permute.xlu1 %v7190_v39 }
 0x45f   : > { %2705 = vperm.xlu1 %5095, %v6315_v4   ;;  %v6775_v9 = vpop.f32.mrf.mxu1  ;;  %v2544_v62 = vadd.f32 %v2540_v48, %v2520_v7  ;;  %v6783_v38 = vpop.f32.mrf.mxu0  ;;  %v7214_v7 = vpack.c.bf16 %v5644_v42, %v5640_v40  ;;  %v7218_v42 = vmov 0  }
 0x461   : > { %v2702_v32 = vpop.permute.xlu1 %2701  ;;  %v6781_v39 = vpop.f32.mrf.mxu1 }
 0x462   : > { %v2713_v53 = vmul.f32 %v2702_v32, %v2681_v57  ;;  %v6789_v1 = vpop.f32.mrf.mxu0  ;;  %v7210_v57 = vpack.c.bf16 %v5634_v37, %v5630_v35  ;;  %v3120_v32 = vpop.permute.xlu0 %3119 }
 0x463   : > { %5096 = vset.pattern.permute.xlu1 %v7193_v24  ;;  %v6787_v24 = vpop.f32.mrf.mxu1  ;;  %7208 = vst [vmem:[#allocation38_spill] sm:$0xff] %v6789_v1 }
 0x464   : > { %2729 = vperm.xlu1 %5096, %v6315_v4   ;;  %v2717_v12 = vadd.f32 %v2713_v53, %v2544_v62  ;;  %v6798_v31 = vpop.f32.mrf.mxu0 }
 0x465   : > { %7212 = vst [vmem:[#allocation40_spill] sm:$0xff] %v6798_v31 }
 0x466   : > { %v2726_v54 = vpop.permute.xlu1 %2725 }
 0x467   : > { %v2737_v11 = vmul.f32 %v2726_v54, %v2683_v10 }
 0x468   : > { %5097 = vset.pattern.permute.xlu1 %v7194_v19 }
 0x469   : > { %v2741_v50 = vadd.f32 %v2737_v11, %v2717_v12  ;;  %2902 = vperm.xlu1 %5097, %v6315_v4   ;;  %v7217_v11 = vmov 23  }
 0x46b   : > { %v2914_v52 = vadd.f32 %v2910_v26, %v2741_v50 }
 0x46c   : > { %v2923_v47 = vpop.permute.xlu1 %2922 }
 0x46d   : > { %5099 = vset.pattern.permute.xlu1 %v7209_v20  ;;  %4157 = vxpose.xlu0.c.b16.start [1/2] (short) (narrow) %v7210_v57, 16  ;;  %v2934_v19 = vmul.f32 %v2923_v47, %v2880_v2  ;;  %v3490_v57 = vpop.permute.xlu0 %3489 }
 0x46e   : > { %3099 = vperm.xlu1 %5099, %v6315_v4   ;;  %v6796_v49 = vpop.f32.mrf.mxu1  ;;  %v6807_v35 = vpop.f32.mrf.mxu0 }
 0x46f   : > { %7211 = vst [vmem:[#allocation39_spill] sm:$0xff] %v6796_v49  ;;  %v2938_v48 = vadd.f32 %v2934_v19, %v2914_v52  ;;  %7215 = vst [vmem:[#allocation42_spill] sm:$0xff] %v6807_v35  ;;  %v7219_v52 = vmov 26   ;;  %v7224_v35 = vmov 30  }
 0x470   : > { %v6800_v10 = vpop.f32.mrf.mxu1  ;;  %v6809_v12 = vpop.f32.mrf.mxu0 }
 0x471   : > { %7213 = vst [vmem:[#allocation41_spill] sm:$0xff] %v6800_v10  ;;  %v3096_v17 = vpop.permute.xlu1 %3095  ;;  %4158 = vxpose.xlu0.c.b16.end [2/2] (short) (narrow) %v7214_v7, 16  ;;  %7216 = vst [vmem:[#allocation43_spill] sm:$0xff] %v6809_v12 }
 0x472   : > { %5100 = vset.pattern.permute.xlu1 %v7196_v6  ;;  %v3075_v60 = vpop.f32.mrf.mxu1  ;;  %v3272_v6 = vpop.f32.mrf.mxu0 }
 0x473   : > { %3123 = vperm.xlu1 %5100, %v6315_v4   ;;  %v3107_v37 = vmul.f32 %v3096_v17, %v3075_v60 }
 0x474   : > { %v3077_v2 = vpop.f32.mrf.mxu1  ;;  %v3274_v26 = vpop.f32.mrf.mxu0 }
 0x475   : > { %v3111_v53 = vadd.f32 %v3107_v37, %v2938_v48  ;;  %v3131_v62 = vmul.f32 %v3120_v32, %v3077_v2 }
 0x476   : > { %v3293_v54 = vpop.permute.xlu1 %3292 }
 0x477   : > { %5102 = vset.pattern.permute.xlu1 %v7217_v11  ;;  %v3135_v40 = vadd.f32 %v3131_v62, %v3111_v53  ;;  %v6817_v47 = vpop.f32.mrf.mxu1  ;;  %v6820_v19 = vpop.f32.mrf.mxu0  ;;  %v3304_v12 = vmul.f32 %v3293_v54, %v3272_v6 }
 0x478   : > { %3320 = vperm.xlu1 %5102, %v6315_v4  }
 0x479   : > { %v6822_v7 = vpop.f32.mrf.mxu1  ;;  %v6825_v60 = vpop.f32.mrf.mxu0  ;;  %v3308_v49 = vadd.f32 %v3304_v12, %v3135_v40 }
 0x47a   : > { %5145 = vset.pattern.permute.xlu0 %v7218_v42 }
 0x47b   : > { %v3317_v45 = vpop.permute.xlu1 %3316  ;;  %v6828_v48 = vpop.f32.mrf.mxu1 }
 0x47c   : > { %5103 = vset.pattern.permute.xlu1 %v7197_v63  ;;  %v3711_v63 = vpop.permute.xlu0 %3710  ;;  %7220 = vst [vmem:[#allocation44_spill] sm:$0xff] %v6828_v48  ;;  %v6832_v32 = vpop.f32.mrf.mxu0 }
 0x47d   : > { %3493 = vperm.xlu1 %5103, %v6315_v4   ;;  %7221 = vst [vmem:[#allocation45_spill] sm:$0xff] %v6832_v32  ;;  %v6836_v2 = vpop.f32.mrf.mxu1  ;;  %v3328_v32 = vmul.f32 %v3317_v45, %v3274_v26 }
 0x47e   : > { %7222 = vst [vmem:[#allocation46_spill] sm:$0xff] %v6836_v2  ;;  %v6838_v53 = vpop.f32.mrf.mxu0 }
 0x47f   : > { %7223 = vst [vmem:[#allocation47_spill] sm:$0xff] %v6838_v53  ;;  %v3332_v1 = vadd.f32 %v3328_v32, %v3308_v49 }
 0x480   : > { %v3514_v50 = vpop.permute.xlu1 %3513  ;;  %v1129_v62 = vpop.permute.xlu0 %1128 }
 0x481   : > { %5105 = vset.pattern.permute.xlu1 %v7219_v52  ;;  %v1138_v53 = vmul.f32 %v1129_v62, %v6450_v3 }
 0x482   : > { %3690 = vperm.xlu1 %5105, %v6315_v4  }
 0x483   : > { %v1142_v12 = vadd.f32 %v1138_v53, %v6328_v25 }
 0x485   : > { %v3687_v17 = vpop.permute.xlu1 %3686 }
 0x486   : > { %5106 = vset.pattern.permute.xlu1 %v7202_v18 }
 0x487   : > { %3714 = vperm.xlu1 %5106, %v6315_v4  }
 0x48a   : > { %v6830_v37 = vpop.permute.xlu1 %3883 }
 0x48b   : > { %5108 = vset.pattern.permute.xlu1 %v7170_v21 }
 0x48c   : > { %3911 = vperm.xlu1 %5108, %v6315_v4  }
 0x48f   : > { %v6840_v18 = vpop.permute.xlu1 %3907 }
 0x490   : > { %5109 = vset.pattern.permute.xlu1 %v7224_v35 }
 0x491   : > { %4084 = vperm.xlu1 %5109, %v6315_v4   ;;  %v6844_v10 = vpop.f32.mrf.mxu1  ;;  %v6846_v0 = vpop.f32.mrf.mxu0 }
 0x492   : > { %7225 = vst [vmem:[#allocation48_spill] sm:$0xff] %v6844_v10  ;;  %7226 = vst [vmem:[#allocation49_spill] sm:$0xff] %v6846_v0 }
 0x493   : > { %v6848_v48 = vpop.f32.mrf.mxu1  ;;  %v6850_v31 = vpop.f32.mrf.mxu0 }
 0x494   : > { %7227 = vst [vmem:[#allocation50_spill] sm:$0xff] %v6848_v48  ;;  %7228 = vst [vmem:[#allocation51_spill] sm:$0xff] %v6850_v31  ;;  %v1154_v2 = vpop.permute.xlu1 %1153 }
 0x495   : > { %5111 = vset.pattern.permute.xlu1 %v7218_v42  ;;  %v3469_v54 = vpop.f32.mrf.mxu1  ;;  %v3666_v6 = vpop.f32.mrf.mxu0  ;;  %v1162_v4 = vmul.f32 %v1154_v2, %v6483_v29 }
 0x496   : > { %1133 = vperm.xlu1 %5111, %v6346_v61   ;;  %v3501_v10 = vmul.f32 %v3490_v57, %v3469_v54  ;;  %v3698_v3 = vmul.f32 %v3687_v17, %v3666_v6 }
 0x497   : > { %v3471_v0 = vpop.f32.mrf.mxu1  ;;  %v3668_v31 = vpop.f32.mrf.mxu0  ;;  %v1166_v48 = vadd.f32 %v1162_v4, %v1142_v12 }
 0x498   : > { %v3505_v40 = vadd.f32 %v3501_v10, %v3332_v1  ;;  %v3525_v45 = vmul.f32 %v3514_v50, %v3471_v0  ;;  %v3722_v32 = vmul.f32 %v3711_v63, %v3668_v31 }
 0x499   : > { %v1327_v26 = vpop.permute.xlu1 %1326 }
 0x49a   : > { %v1335_v62 = vmul.f32 %v1327_v26, %v6457_v36  ;;  %v3529_v42 = vadd.f32 %v3525_v45, %v3505_v40  ;;  %5113 = vset.pattern.permute.xlu1 %v7177_v30  ;;  %v6865_v30 = vpop.f32.mrf.mxu1 }
 0x49b   : > { %1330 = vperm.xlu1 %5113, %v6346_v61  }
 0x49c   : > { %v1339_v29 = vadd.f32 %v1335_v62, %v1166_v48  ;;  %v3702_v49 = vadd.f32 %v3698_v3, %v3529_v42  ;;  %v6868_v50 = vpop.f32.mrf.mxu1  ;;  %v7229_v62 = vmov 15  }
 0x49e   : > { %v3726_v57 = vadd.f32 %v3722_v32, %v3702_v49  ;;  %v1351_v2 = vpop.permute.xlu1 %1350  ;;  %v6873_v17 = vpop.f32.mrf.mxu1 }
 0x49f   : > { %v1359_v25 = vmul.f32 %v1351_v2, %v6487_v55  ;;  %5115 = vset.pattern.permute.xlu1 %v7187_v58 }
 0x4a0   : > { %1527 = vperm.xlu1 %5115, %v6346_v61   ;;  %v6878_v48 = vpop.f32.mrf.mxu1 }
 0x4a1   : > { %v1363_v0 = vadd.f32 %v1359_v25, %v1339_v29  ;;  %v7230_v29 = vmov 19   ;;  %v7231_v25 = vmov 22  }
 0x4a3   : > { %v1524_v1 = vpop.permute.xlu1 %1523 }
 0x4a4   : > { %v1532_v36 = vmul.f32 %v1524_v1, %v6564_v8  ;;  %5117 = vset.pattern.permute.xlu1 %v7192_v43 }
 0x4a5   : > { %1724 = vperm.xlu1 %5117, %v6346_v61  }
 0x4a6   : > { %v1536_v10 = vadd.f32 %v1532_v36, %v1363_v0 }
 0x4a8   : > { %v1548_v31 = vpop.permute.xlu1 %1547 }
 0x4a9   : > { %v1556_v55 = vmul.f32 %v1548_v31, %v6576_v34  ;;  %5119 = vset.pattern.permute.xlu1 %v7195_v16  ;;  %v2533_v31 = vpop.permute.xlu0 %2532 }
 0x4aa   : > { %1921 = vperm.xlu1 %5119, %v6346_v61  }
 0x4ab   : > { %v1560_v58 = vadd.f32 %v1556_v55, %v1536_v10  ;;  %v7232_v10 = vmov 25  }
 0x4ad   : > { %v1721_v8 = vpop.permute.xlu1 %1720 }
 0x4ae   : > { %v1729_v43 = vmul.f32 %v1721_v8, %v6566_v22  ;;  %5121 = vset.pattern.permute.xlu1 %v7201_v15 }
 0x4af   : > { %2118 = vperm.xlu1 %5121, %v6346_v61  }
 0x4b0   : > { %v1733_v63 = vadd.f32 %v1729_v43, %v1560_v58 }
 0x4b2   : > { %v1745_v53 = vpop.permute.xlu1 %1744 }
 0x4b3   : > { %v1753_v34 = vmul.f32 %v1745_v53, %v6578_v44  ;;  %5123 = vset.pattern.permute.xlu1 %v7205_v5  ;;  %v6882_v16 = vpop.f32.mrf.mxu1  ;;  %v7234_v53 = vmov 28  }
 0x4b4   : > { %2315 = vperm.xlu1 %5123, %v6346_v61  }
 0x4b5   : > { %v1757_v54 = vadd.f32 %v1753_v34, %v1733_v63  ;;  %v6885_v6 = vpop.f32.mrf.mxu1 }
 0x4b7   : > { %v1918_v22 = vpop.permute.xlu1 %1917  ;;  %v3863_v4 = vpop.f32.mrf.mxu1 }
 0x4b8   : > { %v1926_v15 = vmul.f32 %v1918_v22, %v6642_v56  ;;  %5125 = vset.pattern.permute.xlu1 %v7207_v59  ;;  %v3895_v12 = vmul.f32 %v6830_v37, %v3863_v4 }
 0x4b9   : > { %2512 = vperm.xlu1 %5125, %v6346_v61   ;;  %v3865_v40 = vpop.f32.mrf.mxu1 }
 0x4ba   : > { %v1930_v44 = vadd.f32 %v1926_v15, %v1757_v54  ;;  %v3899_v5 = vadd.f32 %v3895_v12, %v3726_v57  ;;  %v3919_v45 = vmul.f32 %v6840_v18, %v3865_v40  ;;  %v2927_v15 = vpop.permute.xlu0 %2926  ;;  %v7235_v40 = vmov 31  }
 0x4bc   : > { %v6892_v26 = vadd.f32 %v3919_v45, %v3899_v5  ;;  %v1942_v3 = vpop.permute.xlu1 %1941 }
 0x4bd   : > { %5126 = vset.pattern.permute.xlu1 %v7229_v62  ;;  %v1950_v42 = vmul.f32 %v1942_v3, %v6652_v41  ;;  %v7236_v62 = vld [vmem:[#allocation8_spill] sm:$0xff] }
 0x4be   : > { %2536 = vperm.xlu1 %5126, %v6346_v61   ;;  %v3297_v45 = vpop.permute.xlu0 %3296 }
 0x4bf   : > { %v1954_v56 = vadd.f32 %v1950_v42, %v1930_v44  ;;  %v3672_v44 = vpop.f32.mrf.mxu0 }
 0x4c1   : > { %v2115_v59 = vpop.permute.xlu1 %2114 }
 0x4c2   : > { %v2123_v37 = vmul.f32 %v2115_v59, %v6644_v28  ;;  %5130 = vset.pattern.permute.xlu1 %v7230_v29 }
 0x4c3   : > { %2930 = vperm.xlu1 %5130, %v6346_v61  }
 0x4c4   : > { %v2127_v49 = vadd.f32 %v2123_v37, %v1954_v56  ;;  %v3518_v37 = vpop.permute.xlu0 %3517 }
 0x4c6   : > { %v2139_v32 = vpop.permute.xlu1 %2138 }
 0x4c7   : > { %v2147_v18 = vmul.f32 %v2139_v32, %v6656_v33  ;;  %5131 = vset.pattern.permute.xlu1 %v7209_v20 }
 0x4c8   : > { %3103 = vperm.xlu1 %5131, %v6346_v61   ;;  %v3888_v32 = vpop.permute.xlu0 %3887 }
 0x4c9   : > { %v2151_v57 = vadd.f32 %v2147_v18, %v2127_v49  ;;  %v3526_v18 = vmul.f32 %v3518_v37, %v6868_v50  ;;  %v7243_v37 = vld [vmem:[#allocation14_spill] sm:$0xff] }
 0x4cb   : > { %v2312_v41 = vpop.permute.xlu1 %2311 }
 0x4cc   : > { %v2320_v2 = vmul.f32 %v2312_v41, %v6719_v13  ;;  %5133 = vset.pattern.permute.xlu1 %v7231_v25  ;;  %v7233_v13 = vld [vmem:[#allocation32_spill] sm:$0xff] }
 0x4cd   : > { %3300 = vperm.xlu1 %5133, %v6346_v61   ;;  %v2541_v55 = vmul.f32 %v2533_v31, %v7233_v13 }
 0x4ce   : > { %v2324_v28 = vadd.f32 %v2320_v2, %v2151_v57 }
 0x4d0   : > { %v2336_v0 = vpop.permute.xlu1 %2335 }
 0x4d1   : > { %v2344_v1 = vmul.f32 %v2336_v0, %v6725_v51  ;;  %5134 = vset.pattern.permute.xlu1 %v7217_v11  ;;  %v4109_v0 = vpop.permute.xlu0 %4108 }
 0x4d2   : > { %3324 = vperm.xlu1 %5134, %v6346_v61  }
 0x4d3   : > { %v2348_v33 = vadd.f32 %v2344_v1, %v2324_v28 }
 0x4d5   : > { %v2509_v20 = vpop.permute.xlu1 %2508  ;;  %v1158_v31 = vpop.permute.xlu0 %1157 }
 0x4d6   : > { %v2517_v36 = vmul.f32 %v2509_v20, %v6721_v23  ;;  %5136 = vset.pattern.permute.xlu1 %v7232_v10  ;;  %v3869_v20 = vpop.f32.mrf.mxu1 }
 0x4d7   : > { %3521 = vperm.xlu1 %5136, %v6346_v61   ;;  %v3896_v10 = vmul.f32 %v3888_v32, %v3869_v20 }
 0x4d8   : > { %v2521_v58 = vadd.f32 %v2517_v36, %v2348_v33  ;;  %v3871_v13 = vpop.f32.mrf.mxu1 }
 0x4da   : > { %v2706_v8 = vpop.permute.xlu1 %2705  ;;  %v2545_v43 = vadd.f32 %v2541_v55, %v2521_v58 }
 0x4db   : > { %v2714_v51 = vmul.f32 %v2706_v8, %v6771_v46  ;;  %5137 = vset.pattern.permute.xlu1 %v7219_v52  ;;  %v2935_v46 = vmul.f32 %v2927_v15, %v6783_v38  ;;  %v3305_v38 = vmul.f32 %v3297_v45, %v6820_v19 }
 0x4dc   : > { %3694 = vperm.xlu1 %5137, %v6346_v61  }
 0x4dd   : > { %v2718_v11 = vadd.f32 %v2714_v51, %v2545_v43 }
 0x4df   : > { %v2730_v63 = vpop.permute.xlu1 %2729 }
 0x4e0   : > { %v2738_v23 = vmul.f32 %v2730_v63, %v6775_v9  ;;  %5139 = vset.pattern.permute.xlu1 %v7234_v53 }
 0x4e1   : > { %3891 = vperm.xlu1 %5139, %v6346_v61  }
 0x4e2   : > { %v2742_v34 = vadd.f32 %v2738_v23, %v2718_v11  ;;  %v1355_v23 = vpop.permute.xlu0 %1354 }
 0x4e4   : > { %v2903_v54 = vpop.permute.xlu1 %2902 }
 0x4e5   : > { %v2911_v22 = vmul.f32 %v2903_v54, %v6778_v14  ;;  %5140 = vset.pattern.permute.xlu1 %v7170_v21  ;;  %v3674_v14 = vpop.f32.mrf.mxu0 }
 0x4e6   : > { %3915 = vperm.xlu1 %5140, %v6346_v61  }
 0x4e7   : > { %v2915_v52 = vadd.f32 %v2911_v22, %v2742_v34  ;;  %v6930_v56 = vpop.f32.mrf.mxu0 }
 0x4e9   : > { %v3100_v4 = vpop.permute.xlu1 %3099  ;;  %v2939_v12 = vadd.f32 %v2935_v46, %v2915_v52  ;;  %v6935_v29 = vpop.f32.mrf.mxu0  ;;  %v7238_v46 = vld [vmem:[#allocation10_spill] sm:$0xff] }
 0x4ea   : > { %v3108_v9 = vmul.f32 %v3100_v4, %v6817_v47  ;;  %5142 = vset.pattern.permute.xlu1 %v7235_v40  ;;  %v1552_v4 = vpop.permute.xlu0 %1551 }
 0x4eb   : > { %4112 = vperm.xlu1 %5142, %v6346_v61  }
 0x4ec   : > { %v3112_v5 = vadd.f32 %v3108_v9, %v2939_v12  ;;  %v7239_v12 = vld [vmem:[#allocation12_spill] sm:$0xff]  ;;  %v7240_v9 = vld [vmem:[#allocation9_spill] sm:$0xff] }
 0x4ee   : > { %v3124_v3 = vpop.permute.xlu1 %3123 }
 0x4ef   : > { %v3132_v21 = vmul.f32 %v3124_v3, %v6822_v7  ;;  %5143 = vset.pattern.permute.xlu1 %v7224_v35  ;;  %v6937_v35 = vpop.f32.mrf.mxu0 }
 0x4f0   : > { %4076 = vperm.xlu1 %5143, %v7236_v62  }
 0x4f1   : > { %v3136_v42 = vadd.f32 %v3132_v21, %v3112_v5  ;;  %v6942_v41 = vpop.f32.mrf.mxu0  ;;  %v7242_v21 = vld [vmem:[#allocation13_spill] sm:$0xff] }
 0x4f3   : > { %v3321_v47 = vpop.permute.xlu1 %3320  ;;  %v3309_v59 = vadd.f32 %v3305_v38, %v3136_v42  ;;  %v6945_v1 = vpop.f32.mrf.mxu0 }
 0x4f4   : > { %v3329_v61 = vmul.f32 %v3321_v47, %v6825_v60  ;;  %5144 = vset.pattern.permute.xlu1 %v7235_v40  ;;  %v7237_v60 = vmov 0.0   ;;  %v1749_v38 = vpop.permute.xlu0 %1748 }
 0x4f5   : > { %4100 = vperm.xlu1 %5144, %v7236_v62   ;;  %4912 = vmatprep.mubr.msk.bf16.mxu1 %vm5243_vm0, %v7237_v60  ;;  %v1360_v62 = vmul.f32 %v1355_v23, %v7242_v21 }
 0x4f6   : > { %v3333_v7 = vadd.f32 %v3329_v61, %v3309_v59 }
 0x4f8   : > { %v3494_v49 = vpop.permute.xlu1 %3493  ;;  %v1946_v32 = vpop.permute.xlu0 %1945 }
 0x4f9   : > { %v3502_v19 = vmul.f32 %v3494_v49, %v6865_v30  ;;  %4104 = vperm.xlu1 %5144, %v6240_v27   ;;  %v6947_v27 = vpop.f32.mrf.mxu0 }
 0x4fb   : > { %v3506_v57 = vadd.f32 %v3502_v19, %v3333_v7  ;;  %v4066_v8 = vpop.f32.mrf.mxu0  ;;  %v7244_v7 = vld [vmem:[#allocation16_spill] sm:$0xff] }
 0x4fc   : > { %v1557_v49 = vmul.f32 %v1552_v4, %v7244_v7  ;;  %v2143_v20 = vpop.permute.xlu0 %2142 }
 0x4fd   : > { %v3691_v2 = vpop.permute.xlu1 %3690  ;;  %v3530_v25 = vadd.f32 %v3526_v18, %v3506_v57  ;;  %v4068_v11 = vpop.f32.mrf.mxu0 }
 0x4fe   : > { %v3699_v28 = vmul.f32 %v3691_v2, %v3672_v44  ;;  %v4117_v34 = vmul.f32 %v4109_v0, %v4068_v11  ;;  %v1163_v44 = vmul.f32 %v1158_v31, %v7239_v12  ;;  %v7245_v2 = vld [vmem:[#allocation15_spill] sm:$0xff]  ;;  %v7248_v31 = vld [vmem:[#allocation28_spill] sm:$0xff] }
 0x4ff   : > { %v7252_v12 = vld [vmem:[#allocation35_spill] sm:$0xff] }
 0x500   : > { %v3703_v33 = vadd.f32 %v3699_v28, %v3530_v25  ;;  %v7246_v28 = vld [vmem:[#allocation17_spill] sm:$0xff] }
 0x501   : > { %v1754_v0 = vmul.f32 %v1749_v38, %v7246_v28 }
 0x502   : > { %v3715_v30 = vpop.permute.xlu1 %3714 }
 0x503   : > { %v3723_v36 = vmul.f32 %v3715_v30, %v3674_v14  ;;  %v7241_v14 = vld [vmem:[#allocation11_spill] sm:$0xff] }
 0x505   : > { %v3727_v50 = vadd.f32 %v3723_v36, %v3703_v33 }
 0x507   : > { %v3912_v55 = vpop.permute.xlu1 %3911  ;;  %v3900_v58 = vadd.f32 %v3896_v10, %v3727_v50  ;;  %v7247_v10 = vld [vmem:[#allocation26_spill] sm:$0xff] }
 0x508   : > { %v3920_v43 = vmul.f32 %v3912_v55, %v3871_v13  ;;  %v1951_v13 = vmul.f32 %v1946_v32, %v7248_v31  ;;  %v7259_v31 = vld [vmem:[#allocation45_spill] sm:$0xff] }
 0x50a   : > { %v3924_v51 = vadd.f32 %v3920_v43, %v3900_v58  ;;  %v2340_v43 = vpop.permute.xlu0 %2339 }
 0x50c   : > { %v4085_v63 = vpop.permute.xlu1 %4084 }
 0x50d   : > { %v4093_v53 = vmul.f32 %v4085_v63, %v4066_v8  ;;  %v7250_v63 = vld [vmem:[#allocation30_spill] sm:$0xff] }
 0x50e   : > { %v2148_v23 = vmul.f32 %v2143_v20, %v7250_v63 }
 0x50f   : > { %v4097_v54 = vadd.f32 %v4093_v53, %v3924_v51  ;;  %v7249_v51 = vld [vmem:[#allocation27_spill] sm:$0xff] }
 0x511   : > { %v6949_v22 = vadd.f32 %v4117_v34, %v4097_v54  ;;  %v1134_v15 = vpop.permute.xlu1 %1133 }
 0x512   : > { %v1139_v52 = vmul.f32 %v1134_v15, %v7238_v46  ;;  %v7251_v15 = vld [vmem:[#allocation33_spill] sm:$0xff] }
 0x514   : > { %v1143_v40 = vadd.f32 %v1139_v52, %v7240_v9  ;;  %v2710_v52 = vpop.permute.xlu0 %2709 }
 0x516   : > { %v1331_v5 = vpop.permute.xlu1 %1330  ;;  %v1167_v45 = vadd.f32 %v1163_v44, %v1143_v40  ;;  %v2345_v44 = vmul.f32 %v2340_v43, %v7252_v12  ;;  %v7261_v43 = vld [vmem:[#allocation39_spill] sm:$0xff] }
 0x517   : > { %v1336_v3 = vmul.f32 %v1331_v5, %v7241_v14  ;;  %v7253_v5 = vld [vmem:[#allocation34_spill] sm:$0xff] }
 0x518   : > { %v2734_v14 = vpop.permute.xlu0 %2733 }
 0x519   : > { %v1340_v42 = vadd.f32 %v1336_v3, %v1167_v45 }
 0x51b   : > { %v1528_v47 = vpop.permute.xlu1 %1527  ;;  %v1364_v59 = vadd.f32 %v1360_v62, %v1340_v42  ;;  %v7254_v62 = vld [vmem:[#allocation36_spill] sm:$0xff]  ;;  %v2715_v42 = vmul.f32 %v2710_v52, %v6781_v39  ;;  %v7265_v52 = vld [vmem:[#allocation19_spill] sm:$0xff] }
 0x51c   : > { %v1533_v61 = vmul.f32 %v1528_v47, %v7243_v37  ;;  %v2739_v37 = vmul.f32 %v2734_v14, %v6787_v24  ;;  %v7266_v14 = vld [vmem:[#allocation42_spill] sm:$0xff] }
 0x51e   : > { %v1537_v19 = vadd.f32 %v1533_v61, %v1364_v59  ;;  %v2907_v59 = vpop.permute.xlu0 %2906 }
 0x520   : > { %v1725_v18 = vpop.permute.xlu1 %1724  ;;  %v1561_v57 = vadd.f32 %v1557_v49, %v1537_v19  ;;  %v7255_v49 = vld [vmem:[#allocation38_spill] sm:$0xff] }
 0x521   : > { %v1730_v25 = vmul.f32 %v1725_v18, %v7245_v2  ;;  %v2912_v19 = vmul.f32 %v2907_v59, %v7255_v49  ;;  %v7270_v49 = vld [vmem:[#allocation48_spill] sm:$0xff] }
 0x522   : > { %v3128_v20 = vpop.permute.xlu0 %3127 }
 0x523   : > { %v1734_v33 = vadd.f32 %v1730_v25, %v1561_v57  ;;  %v7256_v57 = vld [vmem:[#allocation40_spill] sm:$0xff] }
 0x525   : > { %v1922_v30 = vpop.permute.xlu1 %1921  ;;  %v1758_v36 = vadd.f32 %v1754_v0, %v1734_v33  ;;  %v7257_v0 = vld [vmem:[#allocation44_spill] sm:$0xff] }
 0x526   : > { %v1927_v50 = vmul.f32 %v1922_v30, %v7247_v10  ;;  %v3498_v63 = vpop.permute.xlu0 %3497 }
 0x528   : > { %v1931_v55 = vadd.f32 %v1927_v50, %v1758_v36  ;;  %v7258_v36 = vld [vmem:[#allocation46_spill] sm:$0xff] }
 0x529   : > { %v3133_v39 = vmul.f32 %v3128_v20, %v7258_v36 }
 0x52a   : > { %v2119_v58 = vpop.permute.xlu1 %2118  ;;  %v1955_v8 = vadd.f32 %v1951_v13, %v1931_v55 }
 0x52b   : > { %v2124_v11 = vmul.f32 %v2119_v58, %v7249_v51  ;;  %v7260_v58 = vld [vmem:[#allocation47_spill] sm:$0xff]  ;;  %v7262_v51 = vld [vmem:[#allocation18_spill] sm:$0xff] }
 0x52d   : > { %v2128_v53 = vadd.f32 %v2124_v11, %v1955_v8  ;;  %v3106_v11 = vmul.f32 %v7262_v51, %v7261_v43 }
 0x52f   : > { %v2316_v34 = vpop.permute.xlu1 %2315  ;;  %v2152_v54 = vadd.f32 %v2148_v23, %v2128_v53  ;;  %v3503_v53 = vmul.f32 %v3498_v63, %v6873_v17  ;;  %v7276_v63 = vld [vmem:[#allocation51_spill] sm:$0xff] }
 0x530   : > { %v2321_v46 = vmul.f32 %v2316_v34, %v7251_v15 }
 0x532   : > { %v2325_v4 = vadd.f32 %v2321_v46, %v2152_v54  ;;  %v7263_v54 = vld [vmem:[#allocation37_spill] sm:$0xff] }
 0x533   : > { %v3110_v15 = vadd.f32 %v3106_v11, %v7263_v54  ;;  %v7264_v46 = vld [vmem:[#allocation41_spill] sm:$0xff] }
 0x534   : > { %v2513_v9 = vpop.permute.xlu1 %2512  ;;  %v2349_v40 = vadd.f32 %v2345_v44, %v2325_v4  ;;  %v3130_v4 = vmul.f32 %v7265_v52, %v7264_v46 }
 0x535   : > { %v2518_v45 = vmul.f32 %v2513_v9, %v7253_v5 }
 0x536   : > { %v3134_v9 = vadd.f32 %v3130_v4, %v3110_v15 }
 0x537   : > { %v2522_v21 = vadd.f32 %v2518_v45, %v2349_v40 }
 0x539   : > { %v2537_v3 = vpop.permute.xlu1 %2536 }
 0x53a   : > { %v2542_v38 = vmul.f32 %v2537_v3, %v7254_v62  ;;  %v7267_v3 = vld [vmem:[#allocation21_spill] sm:$0xff]  ;;  %v3719_v62 = vpop.permute.xlu0 %3718 }
 0x53c   : > { %v2546_v47 = vadd.f32 %v2542_v38, %v2522_v21  ;;  %v3303_v21 = vmul.f32 %v7267_v3, %v7266_v14 }
 0x53e   : > { %v2719_v61 = vadd.f32 %v2715_v42, %v2546_v47  ;;  %v2931_v7 = vpop.permute.xlu1 %2930  ;;  %v3307_v17 = vadd.f32 %v3303_v21, %v3134_v9  ;;  %v3873_v42 = vpop.f32.mrf.mxu1  ;;  %v3724_v47 = vmul.f32 %v3719_v62, %v6935_v29 }
 0x53f   : > { %v2936_v2 = vmul.f32 %v2931_v7, %v7256_v57 }
 0x540   : > { %v2743_v32 = vadd.f32 %v2739_v37, %v2719_v61  ;;  %v7268_v37 = vld [vmem:[#allocation43_spill] sm:$0xff]  ;;  %v7269_v61 = vld [vmem:[#allocation20_spill] sm:$0xff] }
 0x541   : > { %v3327_v7 = vmul.f32 %v7269_v61, %v7268_v37 }
 0x542   : > { %v2916_v18 = vadd.f32 %v2912_v19, %v2743_v32 }
 0x543   : > { %v3104_v25 = vpop.permute.xlu1 %3103  ;;  %v3331_v57 = vadd.f32 %v3327_v7, %v3307_v17 }
 0x544   : > { %v2940_v28 = vadd.f32 %v2936_v2, %v2916_v18  ;;  %v3109_v33 = vmul.f32 %v3104_v25, %v7257_v0  ;;  %v7272_v25 = vld [vmem:[#allocation50_spill] sm:$0xff] }
 0x546   : > { %v3113_v30 = vadd.f32 %v3109_v33, %v2940_v28  ;;  %v7273_v28 = vld [vmem:[#allocation23_spill] sm:$0xff]  ;;  %v4089_v33 = vpop.permute.xlu0 %4088 }
 0x547   : > { %v3524_v0 = vmul.f32 %v7273_v28, %v7272_v25 }
 0x548   : > { %v3301_v10 = vpop.permute.xlu1 %3300  ;;  %v3137_v50 = vadd.f32 %v3133_v39, %v3113_v30  ;;  %v4070_v30 = vpop.f32.mrf.mxu0 }
 0x549   : > { %v3306_v24 = vmul.f32 %v3301_v10, %v7259_v31  ;;  %v4094_v39 = vmul.f32 %v4089_v33, %v4070_v30 }
 0x54a   : > { %v4072_v31 = vpop.f32.mrf.mxu0  ;;  %v4081_v4 = vpop.permute.xlu0 %4080 }
 0x54b   : > { %v3310_v55 = vadd.f32 %v3306_v24, %v3137_v50 }
 0x54d   : > { %v3325_v13 = vpop.permute.xlu1 %3324 }
 0x54e   : > { %v3330_v8 = vmul.f32 %v3325_v13, %v7260_v58  ;;  %v7275_v58 = vld [vmem:[#allocation24_spill] sm:$0xff]  ;;  %v4165_v17 = vpop.trf.xlu0 }
 0x550   : > { %v3334_v23 = vadd.f32 %v3330_v8, %v3310_v55  ;;  %v7274_v55 = vld [vmem:[#allocation49_spill] sm:$0xff] }
 0x551   : > { %v3697_v8 = vmul.f32 %v7275_v58, %v7274_v55 }
 0x552   : > { %v3522_v34 = vpop.permute.xlu1 %3521  ;;  %v3507_v12 = vadd.f32 %v3503_v53, %v3334_v23  ;;  %v7277_v23 = vld [vmem:[#allocation29_spill] sm:$0xff] }
 0x553   : > { %v3527_v44 = vmul.f32 %v3522_v34, %v6878_v48  ;;  %v7271_v48 = vld [vmem:[#allocation22_spill] sm:$0xff]  ;;  %v3721_v53 = vmul.f32 %v7277_v23, %v7276_v63  ;;  %v7278_v34 = vld [vmem:[#allocation25_spill] sm:$0xff] }
 0x554   : > { %v3500_v19 = vmul.f32 %v7271_v48, %v7270_v49  ;;  %v3894_v54 = vmul.f32 %v7278_v34, %v6882_v16 }
 0x555   : > { %v3531_v5 = vadd.f32 %v3527_v44, %v3507_v12  ;;  %v7279_v44 = vld [vmem:[#allocation31_spill] sm:$0xff] }
 0x556   : > { %v3504_v2 = vadd.f32 %v3500_v19, %v3331_v57  ;;  %v3918_v9 = vmul.f32 %v7279_v44, %v6885_v6 }
 0x557   : > { %v3695_v40 = vpop.permute.xlu1 %3694 }
 0x558   : > { %v3700_v45 = vmul.f32 %v3695_v40, %v6930_v56  ;;  %v3875_v56 = vpop.f32.mrf.mxu1  ;;  %v3528_v50 = vadd.f32 %v3524_v0, %v3504_v2 }
 0x55a   : > { %v3704_v38 = vadd.f32 %v3700_v45, %v3531_v5  ;;  %v3701_v51 = vadd.f32 %v3697_v8, %v3528_v50  ;;  %v4092_v5 = vmul.f32 %v4081_v4, %v6945_v1 }
 0x55c   : > { %v3892_v59 = vpop.permute.xlu1 %3891  ;;  %v3728_v32 = vadd.f32 %v3724_v47, %v3704_v38  ;;  %v3725_v52 = vadd.f32 %v3721_v53, %v3701_v51  ;;  %v4096_v3 = vadd.f32 %v4092_v5, %v6892_v26 }
 0x55d   : > { %v3897_v18 = vmul.f32 %v3892_v59, %v3873_v42  ;;  %v4154_v42 = vld [vmem:[%s5371_s15 + $0x8] sm:$0xff] }
 0x55e   : > { %v3898_v12 = vadd.f32 %v3894_v54, %v3725_v52 }
 0x55f   : > { %v3901_v36 = vadd.f32 %v3897_v18, %v3728_v32 }
 0x560   : > { %v3922_v16 = vadd.f32 %v3918_v9, %v3898_v12 }
 0x561   : > { %v3916_v20 = vpop.permute.xlu1 %3915 }
 0x562   : > { %v3921_v29 = vmul.f32 %v3916_v20, %v3875_v56 }
 0x564   : > { %v3925_v10 = vadd.f32 %v3921_v29, %v3901_v36 }
 0x566   : > { %v4113_v24 = vpop.permute.xlu1 %4112  ;;  %v4098_v13 = vadd.f32 %v4094_v39, %v3925_v10 }
 0x567   : > { %v4118_v43 = vmul.f32 %v4113_v24, %v4072_v31 }
 0x569   : > { %v4122_v11 = vadd.f32 %v4118_v43, %v4098_v13 }
 0x56b   : > { %v4156_v15 = vpack.c.bf16 %v4122_v11, %v6949_v22  ;;  %v4077_v46 = vpop.permute.xlu1 %4076 }
 0x56c   : > { %v4091_v45 = vmul.f32 %v4077_v46, %v6937_v35  ;;  %v4153_v35 = vld [vmem:[%s5371_s15] sm:$0xff] }
 0x56d   : > { %4909 = vmatpush3.bf16.msra.mxu1 %v4156_v15 }
 0x56e   : > { %4910 = vmatprep.subr.bf16.mxu1 %v7237_v60  ;;  %v4095_v21 = vadd.f32 %v4091_v45, %v3922_v16 }
 0x570   : > { %v4101_v40 = vpop.permute.xlu1 %4100 }
 0x571   : > { %v4115_v22 = vmul.f32 %v4101_v40, %v6942_v41 }
 0x573   : > { %v4119_v62 = vadd.f32 %v4115_v22, %v4095_v21 }
 0x574   : > { %v4105_v14 = vpop.permute.xlu1 %4104 }
 0x575   : > { %v4116_v60 = vmul.f32 %v4105_v14, %v6947_v27 }
 0x577   : > { %v4120_v6 = vadd.f32 %v4116_v60, %v4096_v3 }
 0x579   : > { %v4155_v38 = vpack.c.bf16 %v4120_v6, %v4119_v62 }
 0x57b   : > { %4911 = vmatpush3.bf16.msra.mxu1 %v4155_v38 }
 0x57e   : > { %4913 = vmatmul.mubr.msk.bf16.vlgmr.msra.gmra.mxu1 %vm4173_vm1, %v4165_v17 }
 0x63e   : > { %v4211_v1 = vpop.f32.mrf.mxu1 }
 0x63f   : > { %v4218_v47 = vadd.f32 %v4211_v1, %v4153_v35 }
 0x640   : > { %v4914_v41 = vpop.f32.mrf.mxu1 }
 0x641   : > { %4220 = vst [vmem:[%s5371_s15] sm:$0xff] %v4218_v47  ;;  %4225 = sbr.rel (%p4783_p8) target bundleno = 1980 (0x7bc), region = 80 }
 0x642   : > { %v4214_v59 = vpop.f32.mrf.mxu1 }
 0x643   : > { %v4219_v37 = vadd.f32 %v4214_v59, %v4154_v42 }
 0x644   : > { %v4915_v26 = vpop.f32.mrf.mxu1 }
 0x645   : > { %4221 = vst [vmem:[%s5371_s15 + $0x8] sm:$0xff] %v4219_v37 }
 0x646   : > { %v4228_v27 = vld [vmem:[%s7081_s6] sm:$0xff]  ;;  %v5244_v61 = vmov 0   ;;  %v4229_v7 = vld [vmem:[%s7081_s6 + $0x8] sm:$0xff]  ;;  %s7280_s29 = sld [smem:[#allocation52_spill]] (!%p4784_p9) }
 0x647   : > { %5159 = vset.pattern.permute.xlu0 %v5244_v61 }
 0x648   : > { %4232 = vperm.xlu0 %5159, %v4228_v27   ;;  %v4226_v49 = vld [vmem:[%s5371_s15] sm:$0xff] }
 0x64c   : > { %4237 = vperm.xlu0 %5159, %v4229_v7   ;;  %v4227_v32 = vld [vmem:[%s5371_s15 + $0x8] sm:$0xff] }
 0x6c3   : > { %v4233_v48 = vpop.permute.xlu0 %4232 }
 0x6c4   : > { %v4240_v19 = vmul.f32 %v4233_v48, %v4226_v49  ;;  %4245 = sbr.rel (%p4784_p9) target bundleno = 1972 (0x7b4), region = 84 }
 0x6c7   : > { %v4238_v18 = vpop.permute.xlu0 %4237 }
 0x6c8   : > { %v4241_v57 = vmul.f32 %v4238_v18, %v4227_v32 }
 0x6c9   : > { %v5160_v56 = vld [vmem:[%s7086_s11 + $0x38] sm:$0xff]   ;;  %v5245_v2 = vmov 0.0   ;;  %v5161_v25 = vld [vmem:[%s7086_s11 + $0x30] sm:$0xff]   ;;  %vm5246_vm2 = vmmov 0   ;;  %v5162_v28 = vld [vmem:[%s7086_s11 + $0x28] sm:$0xff]  }
 0x6ca   : > { %4916 = vmatprep.subr.bf16.mxu0 %v5245_v2  ;;  %4932 = vmatprep.mubr.msk.bf16.mxu0 %vm5246_vm2, %v5245_v2  ;;  %v5163_v0 = vld [vmem:[%s7086_s11 + $0x20] sm:$0xff]   ;;  %v5164_v33 = vld [vmem:[%s7086_s11 + $0x18] sm:$0xff]   ;;  %v5165_v20 = vld [vmem:[%s7086_s11 + $0x10] sm:$0xff]  }
 0x6cb   : > { %4917 = vmatpush3.bf16.msra.mxu0 %v5160_v56  ;;  %v5166_v30 = vld [vmem:[%s7086_s11 + $0x8] sm:$0xff]   ;;  %v5167_v36 = vld [vmem:[%s7086_s11] sm:$0xff]  }
 0x6cc   : > { %4918 = vmatprep.subr.bf16.mxu0 %v5245_v2  ;;  %v5168_v29 = vld [vmem:[#allocation2] ss:$8 sps:$4 sm:$0xff]  }
 0x6cd   : > { %v4359_v39 = vld [vmem:[%s7075_s0] sm:$0xff]  ;;  %v4360_v50 = vld [vmem:[%s7075_s0 + $0x8] sm:$0xff] }
 0x6ce   : > { %v4361_v10 = vadd.f32 %v4359_v39, %v4240_v19  ;;  %v4794_v24 = vld [vmem:[%s7280_s29] ss:$0 sm:$0xff]  ;;  %v4362_v55 = vadd.f32 %v4360_v50, %v4241_v57 }
 0x6cf   : > { %4919 = vmatpush3.bf16.msra.mxu0 %v5161_v25 }
 0x6d0   : > { %4920 = vmatprep.subr.bf16.mxu0 %v5245_v2 }
 0x6d3   : > { %4921 = vmatpush3.bf16.msra.mxu0 %v5162_v28 }
 0x6d4   : > { %4922 = vmatprep.subr.bf16.mxu0 %v5245_v2 }
 0x6d7   : > { %4923 = vmatpush3.bf16.msra.mxu0 %v5163_v0 }
 0x6d8   : > { %4924 = vmatprep.subr.bf16.mxu0 %v5245_v2 }
 0x6db   : > { %4925 = vmatpush3.bf16.msra.mxu0 %v5164_v33 }
 0x6dc   : > { %4926 = vmatprep.subr.bf16.mxu0 %v5245_v2 }
 0x6df   : > { %4927 = vmatpush3.bf16.msra.mxu0 %v5165_v20 }
 0x6e0   : > { %4928 = vmatprep.subr.bf16.mxu0 %v5245_v2 }
 0x6e3   : > { %4929 = vmatpush3.bf16.msra.mxu0 %v5166_v30 }
 0x6e4   : > { %4930 = vmatprep.subr.bf16.mxu0 %v5245_v2 }
 0x6e7   : > { %4931 = vmatpush3.bf16.msra.mxu0 %v5167_v36 }
 0x6ea   : > { %4933 = vmatmul.mubr.bf16.vlgmr.msra.gmra.mxu0 %v5168_v29 }
 0x7aa   : > { %v4352_v31 = vpop.f32.mrf.mxu0 }
 0x7ab   : > { %v4363_v13 = vadd.f32 %v4361_v10, %v4352_v31 }
 0x7ac   : > { %v4934_v58 = vpop.f32.mrf.mxu0 }
 0x7ad   : > { %v4372_v8 = vadd.f32 %v4794_v24, %v4363_v13 }
 0x7ae   : > { %v4355_v43 = vpop.f32.mrf.mxu0 }
 0x7af   : > { %4374 = vst [vmem:[%s5371_s15] sm:$0xff] %v4372_v8  ;;  %v4364_v51 = vadd.f32 %v4362_v55, %v4355_v43 }
 0x7b0   : > { %v4935_v11 = vpop.f32.mrf.mxu0 }
 0x7b1   : > { %v4373_v63 = vadd.f32 %v4794_v24, %v4364_v51 }
 0x7b3   : > { %4375 = vst [vmem:[%s5371_s15 + $0x8] sm:$0xff] %v4373_v63 }
 0x7b4 PF: > { %p4795_p10 = scmp.eq.s32.totalorder %s5195_s26, 0 }
 0x7b6   : > { %4379 = sbr.rel (%p4795_p10) target bundleno = 1980 (0x7bc), region = 88 }
 0x7bb   : > { %4380 = vst [vmem:[%s5371_s15] sm:$0xff] %v4240_v19  ;;  %4381 = vst [vmem:[%s5371_s15 + $0x8] sm:$0xff] %v4241_v57 }
 0x7bc PF: > { %s7281_s16 = sld [smem:[#allocation5_spill]] }
 0x7bd   : > { %s7282_s25 = sld [smem:[#allocation3_spill]] }
 0x7be   : > { %s7283_s26 = sld [smem:[#allocation4_spill]] }
 0x7bf   : > { %s7284_s27 = sld [smem:[#allocation6_spill]] }
 0x7c0   : > { %s7285_s28 = sld [smem:[#allocation7_spill]] }
 0x7c2   : > { %s23_s29 = sadd.s32 1, %s7281_s16  }
 0x7c3   : > { %p20_p11 = scmp.ge.s32.totalorder %s23_s29, 6  }
 0x7c5   :  { %22 = sbr.rel (!%p20_p11) target bundleno = 3 (0x3), region = 124 }

</bundles_post_ra>
